<compile_context>
chip_gen: v7x
topology: tpu7x:2x2x1
jax: 0.10.0
libtpu: 0.0.40
codegen_flags: <defaults>
</compile_context>

<pallas_src>
import functools

import jax
import jax.numpy as jnp
import numpy as np
from jax import lax
from jax.experimental import pallas as pl
from jax.experimental.pallas import tpu as pltpu


def _recurrent_attention_kernel(
    qx_ref, qs_ref, kvx_ref, kvs_ref,
    wqx_ref, wqs_ref, wkvx_ref, wkvs_ref,
    wxp_ref, bxp_ref, wsp_ref, bsp_ref,
    xout_ref, sout_ref,
    *, n_head, compute_dtype, approx_recip,
):
    _, TQ, D = qx_ref.shape        # query-row tile
    _, L, _ = kvx_ref.shape        # full kv length
    H = n_head
    dh = D // H

    def mm(a, b):
        # MXU matmul, operands in compute_dtype, f32 accumulation.
        return jnp.dot(a.astype(compute_dtype), b.astype(compute_dtype),
                       preferred_element_type=jnp.float32)

    qx = qx_ref[0]      # [TQ, D]
    qs = qs_ref[0]      # [TQ, D]
    kvx = kvx_ref[0]    # [L, D]
    kvs = kvs_ref[0]    # [L, D]

    # --- Fused query projections (1/sqrt(dh) folded into the weights) -------
    # wqx columns: [ W_qx1 | W_qx2 ];  wqs columns: [ W_qs2 | W_qs1 ].
    qx_p = mm(qx, wqx_ref[...]).astype(compute_dtype)     # [TQ, 2D] : qx1 | qx2
    qs_p = mm(qs, wqs_ref[...]).astype(compute_dtype)     # [TQ, 2D] : qs2 | qs1

    # --- Shared single-head key/value projections (full kv length) ----------
    kvx_p = mm(kvx, wkvx_ref[...]).astype(compute_dtype)  # [L, 2*dh]
    kx, vx = kvx_p[:, :dh], kvx_p[:, dh:]
    kvs_p = mm(kvs, wkvs_ref[...]).astype(compute_dtype)  # [L, 2*dh]
    ks, vs = kvs_p[:, :dh], kvs_p[:, dh:]

    def heads_to_rows(q_a, q_b):
        # [TQ, D] x2 (heads head-major along lanes) -> [2*H*TQ, dh] row stack:
        #   rows [h*TQ:(h+1)*TQ]        -> q_a head h
        #   rows [(H+h)*TQ:(H+h+1)*TQ]  -> q_b head h
        blocks = [q_a[:, h * dh:(h + 1) * dh] for h in range(H)]
        blocks += [q_b[:, h * dh:(h + 1) * dh] for h in range(H)]
        return jnp.concatenate(blocks, axis=0)

    def attention(q_rows, k, v):
        # One scores matmul + one softmax + one P@V for all 2*H heads that
        # share this k/v.  The k-transpose is consumed by the MXU via
        # dot_general (contract last dim of both operands).
        scores = lax.dot_general(q_rows, k, (((1,), (1,)), ((), ())),
                                 preferred_element_type=jnp.float32)
        m = jnp.max(scores, axis=-1, keepdims=True)
        e = jnp.exp(scores - m)
        denom = jnp.sum(e, axis=-1, keepdims=True)
        o = mm(e, v)                                       # un-normalized P@V
        # Normalization deferred to after P@V: scaling touches [rows, dh]
        # instead of [rows, L].
        return (o * pl.reciprocal(denom, approx=approx_recip)).astype(compute_dtype)

    # Two batched attentions replace the original four:
    #   o_x rows [0, H*TQ)      = attention(qx1, kx, vx)   -> "x"
    #   o_x rows [H*TQ, 2H*TQ)  = attention(qs2, kx, vx)   -> "sx"
    #   o_s rows [0, H*TQ)      = attention(qs1, ks, vs)   -> "s"
    #   o_s rows [H*TQ, 2H*TQ)  = attention(qx2, ks, vs)   -> "xs"
    o_x = attention(heads_to_rows(qx_p[:, :D], qs_p[:, :D]), kx, vx)
    o_s = attention(heads_to_rows(qs_p[:, D:], qx_p[:, D:]), ks, vs)

    def gather_heads(o, base):
        # Row-blocks [ (base+h)*TQ : (base+h+1)*TQ ), h = 0..H-1.
        return [o[(base + h) * TQ:(base + h + 1) * TQ] for h in range(H)]

    # --- Output projections: ONE [TQ, 2D] @ [2D, D] matmul per output -------
    # The torch interleave ([xs_h | x_h] per head) is folded into a host-side
    # row permutation of the projection weights, so the kernel only builds the
    # plain lane-concats [x | xs] and [s | sx] (single concat each).
    x_in = jnp.concatenate(gather_heads(o_x, 0) + gather_heads(o_s, H), axis=1)
    s_in = jnp.concatenate(gather_heads(o_s, 0) + gather_heads(o_x, H), axis=1)
    x_out = mm(x_in, wxp_ref[...]) + bxp_ref[...].astype(jnp.float32)
    s_out = mm(s_in, wsp_ref[...]) + bsp_ref[...].astype(jnp.float32)

    xout_ref[0] = x_out.astype(xout_ref.dtype)
    sout_ref[0] = s_out.astype(sout_ref.dtype)


def _prepare_params(params, n_head, compute_dtype):
    """Host-side weight fusion / permutation.

    * Query weights concatenated into two [D, 2D] mats; 1/sqrt(dh) folded in.
    * Output-projection weights row-permuted so the torch per-head interleave
      ([xs_h|x_h], [sx_h|s_h]) becomes the plain lane order the kernel
      produces ([x|xs], [s|sx]); one K=2D matmul per output in the kernel.
    """
    wqx1, wqs1, wqx2, wqs2, wkvx, wkvs, wxp, bxp, wsp, bsp = params
    D = wqx1.shape[0]
    H = n_head
    dh = D // H
    scale = 1.0 / float(dh) ** 0.5

    wqx_cat = jnp.concatenate([wqx1, wqx2], axis=1) * scale   # qx1 | qx2
    wqs_cat = jnp.concatenate([wqs2, wqs1], axis=1) * scale   # qs2 | qs1

    wxp4 = wxp.reshape(H, 2, dh, D)   # block (h,0) = xs_h rows, (h,1) = x_h rows
    wxp_perm = jnp.concatenate([wxp4[:, 1].reshape(D, D),     # x rows
                                wxp4[:, 0].reshape(D, D)],    # xs rows
                               axis=0)
    wsp4 = wsp.reshape(H, 2, dh, D)   # block (h,0) = sx_h rows, (h,1) = s_h rows
    wsp_perm = jnp.concatenate([wsp4[:, 1].reshape(D, D),     # s rows
                                wsp4[:, 0].reshape(D, D)],    # sx rows
                               axis=0)

    cast = lambda w: w.astype(compute_dtype)
    return (cast(wqx_cat), cast(wqs_cat), cast(wkvx), cast(wkvs),
            cast(wxp_perm), bxp.astype(jnp.float32),
            cast(wsp_perm), bsp.astype(jnp.float32))


def _vmem_limit_bytes(L, TQ, D, H, compute_dtype, out_dtype, weight_buffers):
    """Estimate the VMEM the kernel needs; clamp to 3/4 of physical VMEM."""
    dh = D // H
    cb = jnp.dtype(compute_dtype).itemsize
    ob = jnp.dtype(out_dtype).itemsize
    # Weights (per buffer): 2 fused query mats, 2 kv mats, 2 proj mats, 2 biases.
    weights = (2 * D * 2 * D + 2 * D * 2 * dh + 2 * 2 * D * D + 2 * D) * cb
    # Double-buffered sequence inputs / outputs.
    io = (2 * TQ * D + 2 * L * D) * cb * 2 + 2 * TQ * D * ob * 2
    # Live f32 temporaries: scores + exp for one attention group, projected
    # queries / attention outputs / projection inputs, kv projections.
    tmp = 2 * (2 * H * TQ) * L * 4 + 8 * TQ * D * 4 + 2 * L * 2 * dh * 4
    need = int((weights * weight_buffers + io + tmp) * 1.3) + (2 << 20)
    try:
        cap = int(pltpu.get_tpu_info().vmem_capacity_bytes)
    except Exception:
        cap = 64 << 20   # conservative (v7x per-core VMEM)
    return int(max(min(need, (cap * 3) // 4), 16 << 20))


def recurrent_attention(qx, kvx, qs, kvs, params, n_head,
                        compute_dtype=jnp.bfloat16, q_block=None,
                        approx_recip=False):
    """Forward pass of RecurrentAttention (mask=None path).

    compute_dtype: dtype of MXU matmul operands (bf16 is MXU-native on all
      current TPU generations); softmax and accumulation stay in f32.
    q_block: query-row tile along a second 'parallel' grid axis; bounds the
      live [2*H*q_block, L] scores temporaries and lets megacore chips split
      work when the batch is small.
    """
    B, L, D = qx.shape
    H = n_head
    dh = D // H
    out_dtype = qx.dtype

    if q_block is None:
        q_block = min(L, 256)
    if L % q_block != 0 or (q_block != L and q_block % 8 != 0):
        q_block = L
    nq = L // q_block

    prepared = _prepare_params(params, H, compute_dtype)
    qx_c, qs_c, kvx_c, kvs_c = (t.astype(compute_dtype)
                                for t in (qx, qs, kvx, kvs))

    kernel = functools.partial(
        _recurrent_attention_kernel,
        n_head=H, compute_dtype=compute_dtype, approx_recip=approx_recip)

    q_spec = pl.BlockSpec((1, q_block, D), lambda b, qt: (b, qt, 0))
    kv_spec = pl.BlockSpec((1, L, D), lambda b, qt: (b, 0, 0))
    out_shape = (jax.ShapeDtypeStruct((B, L, D), out_dtype),
                 jax.ShapeDtypeStruct((B, L, D), out_dtype))

    def build(single_buffer_weights):
        if single_buffer_weights:
            # Weight blocks never change across the grid; a single VMEM buffer
            # halves their footprint (matters on v7x's 64 MiB VMEM).
            def wspec(shape):
                return pl.BlockSpec(shape, lambda b, qt: (0, 0),
                                    pipeline_mode=pl.Buffered(1))
            weight_buffers = 1
        else:
            def wspec(shape):
                return pl.BlockSpec(shape, lambda b, qt: (0, 0))
            weight_buffers = 2

        in_specs = [
            q_spec, q_spec, kv_spec, kv_spec,                 # qx, qs, kvx, kvs
            wspec((D, 2 * D)), wspec((D, 2 * D)),             # fused query weights
            wspec((D, 2 * dh)), wspec((D, 2 * dh)),           # kv weights
            wspec((2 * D, D)), wspec((1, D)),                 # x_proj W (permuted), b
            wspec((2 * D, D)), wspec((1, D)),                 # s_proj W (permuted), b
        ]
        return pl.pallas_call(
            kernel,
            out_shape=out_shape,
            grid_spec=pltpu.PrefetchScalarGridSpec(
                num_scalar_prefetch=0,
                grid=(B, nq),
                in_specs=in_specs,
                out_specs=[q_spec, q_spec]),
            compiler_params=pltpu.CompilerParams(
                dimension_semantics=("parallel", "parallel"),
                vmem_limit_bytes=_vmem_limit_bytes(
                    L, q_block, D, H, compute_dtype, out_dtype, weight_buffers)),
        )

    args = (qx_c, qs_c, kvx_c, kvs_c, *prepared)
    try:
        return build(True)(*args)
    except Exception:
        # Single-buffered weights (pl.Buffered(1)) not supported by this
        # JAX/Mosaic build: fall back to default double-buffered specs.
        return build(False)(*args)


def recurrent_attention_reference(qx, kvx, qs, kvs, params, n_head):
    """Pure-JAX replica of the PyTorch forward (for verification)."""
    (wqx1, wqs1, wqx2, wqs2, wkvx, wkvs, wxp, bxp, wsp, bsp) = params
    B, L, D = qx.shape
    H = n_head
    dh = D // H

    def split(t):
        return t.reshape(B, L, H, dh).transpose(0, 2, 1, 3)   # [B,H,L,dh]

    def concat(t):
        return t.transpose(0, 2, 1, 3).reshape(B, L, -1)

    def attn(q, k, v):
        scores = jnp.einsum('bhld,bmd->bhlm', q, k) / (dh ** 0.5)
        p = jax.nn.softmax(scores, axis=-1)
        return jnp.einsum('bhlm,bmd->bhld', p, v)

    qx1, qs1 = split(qx @ wqx1), split(qs @ wqs1)
    qx2, qs2 = split(qx @ wqx2), split(qs @ wqs2)
    kvx_p = kvx @ wkvx
    kx, vx = kvx_p[..., :dh], kvx_p[..., dh:]
    kvs_p = kvs @ wkvs
    ks, vs = kvs_p[..., :dh], kvs_p[..., dh:]

    x = attn(qx1, kx, vx)
    s = attn(qs1, ks, vs)
    xs = attn(qx2, ks, vs)
    sx = attn(qs2, kx, vx)

    x_proj = concat(jnp.concatenate([xs, x], axis=-1)) @ wxp + bxp[0]
    s_proj = concat(jnp.concatenate([sx, s], axis=-1)) @ wsp + bsp[0]
    return x_proj, s_proj


if __name__ == "__main__":
    B, L, D, H = 2, 16, 32, 4
    dh = D // H
    dtype = jnp.float32

    key = jax.random.PRNGKey(0)
    keys = jax.random.split(key, 16)

    qx = jax.random.normal(keys[0], (B, L, D), dtype)
    kvx = jax.random.normal(keys[1], (B, L, D), dtype)
    qs = jax.random.normal(keys[2], (B, L, D), dtype)
    kvs = jax.random.normal(keys[3], (B, L, D), dtype)

    wscale = 0.1
    params = (
        jax.random.normal(keys[4], (D, D), dtype) * wscale,        # w_qx1
        jax.random.normal(keys[5], (D, D), dtype) * wscale,        # w_qs1
        jax.random.normal(keys[6], (D, D), dtype) * wscale,        # w_qx2
        jax.random.normal(keys[7], (D, D), dtype) * wscale,        # w_qs2
        jax.random.normal(keys[8], (D, 2 * dh), dtype) * wscale,   # w_kvx
        jax.random.normal(keys[9], (D, 2 * dh), dtype) * wscale,   # w_kvs
        jax.random.normal(keys[10], (2 * D, D), dtype) * wscale,   # x_proj W
        jax.random.normal(keys[11], (1, D), dtype) * wscale,       # x_proj b
        jax.random.normal(keys[12], (2 * D, D), dtype) * wscale,   # s_proj W
        jax.random.normal(keys[13], (1, D), dtype) * wscale,       # s_proj b
    )

    x_ref, s_ref = recurrent_attention_reference(qx, kvx, qs, kvs, params, n_head=H)

    # f32 MXU path: matches the f32 reference tightly.
    x_out, s_out = recurrent_attention(qx, kvx, qs, kvs, params, n_head=H,
                                       compute_dtype=jnp.float32)
    jax.block_until_ready((x_out, s_out))
    np.testing.assert_allclose(np.asarray(x_out), np.asarray(x_ref), rtol=1e-4, atol=1e-4)
    np.testing.assert_allclose(np.asarray(s_out), np.asarray(s_ref), rtol=1e-4, atol=1e-4)

    # f32 path with query-row tiling (exercises the second grid axis).
    x_t, s_t = recurrent_attention(qx, kvx, qs, kvs, params, n_head=H,
                                   compute_dtype=jnp.float32, q_block=8)
    jax.block_until_ready((x_t, s_t))
    np.testing.assert_allclose(np.asarray(x_t), np.asarray(x_ref), rtol=1e-4, atol=1e-4)
    np.testing.assert_allclose(np.asarray(s_t), np.asarray(s_ref), rtol=1e-4, atol=1e-4)

    # bf16 MXU path (default): bf16 matmul operands, f32 softmax/accumulation.
    x_bf, s_bf = recurrent_attention(qx, kvx, qs, kvs, params, n_head=H)
    jax.block_until_ready((x_bf, s_bf))
    np.testing.assert_allclose(np.asarray(x_bf), np.asarray(x_ref), rtol=5e-2, atol=5e-2)
    np.testing.assert_allclose(np.asarray(s_bf), np.asarray(s_ref), rtol=5e-2, atol=5e-2)

    print("KERNEL_OK")
</pallas_src>

<mosaic_0001>
module attributes {stable_mosaic.version = 11 : i64} {
  func.func @_recurrent_attention_kernel(%arg0: i32, %arg1: i32, %arg2: memref<1x16x32xf32, #tpu.memory_space<vmem>>, %arg3: memref<1x16x32xf32, #tpu.memory_space<vmem>>, %arg4: memref<1x16x32xf32, #tpu.memory_space<vmem>>, %arg5: memref<1x16x32xf32, #tpu.memory_space<vmem>>, %arg6: memref<32x64xf32, #tpu.memory_space<vmem>>, %arg7: memref<32x64xf32, #tpu.memory_space<vmem>>, %arg8: memref<32x16xf32, #tpu.memory_space<vmem>>, %arg9: memref<32x16xf32, #tpu.memory_space<vmem>>, %arg10: memref<64x32xf32, #tpu.memory_space<vmem>>, %arg11: memref<1x32xf32, #tpu.memory_space<vmem>>, %arg12: memref<64x32xf32, #tpu.memory_space<vmem>>, %arg13: memref<1x32xf32, #tpu.memory_space<vmem>>, %arg14: memref<1x16x32xf32, #tpu.memory_space<vmem>>, %arg15: memref<1x16x32xf32, #tpu.memory_space<vmem>>) attributes {dimension_semantics = [#tpu.dimension_semantics<parallel>, #tpu.dimension_semantics<parallel>], iteration_bounds = array<i64: 2, 1>, scalar_prefetch = 0 : i64, scratch_operands = 0 : i64, tpu.core_type = #tpu.core_type<tc>, window_params = [{transform_indices = @transform_0, window_bounds = array<i64: 1, 16, 32>}, {transform_indices = @transform_1, window_bounds = array<i64: 1, 16, 32>}, {transform_indices = @transform_2, window_bounds = array<i64: 1, 16, 32>}, {transform_indices = @transform_3, window_bounds = array<i64: 1, 16, 32>}, {pipeline_mode = #tpu.pipeline_mode<synchronous>, transform_indices = @transform_4, window_bounds = array<i64: 32, 64>}, {pipeline_mode = #tpu.pipeline_mode<synchronous>, transform_indices = @transform_5, window_bounds = array<i64: 32, 64>}, {pipeline_mode = #tpu.pipeline_mode<synchronous>, transform_indices = @transform_6, window_bounds = array<i64: 32, 16>}, {pipeline_mode = #tpu.pipeline_mode<synchronous>, transform_indices = @transform_7, window_bounds = array<i64: 32, 16>}, {pipeline_mode = #tpu.pipeline_mode<synchronous>, transform_indices = @transform_8, window_bounds = array<i64: 64, 32>}, {pipeline_mode = #tpu.pipeline_mode<synchronous>, transform_indices = @transform_9, window_bounds = array<i64: 1, 32>}, {pipeline_mode = #tpu.pipeline_mode<synchronous>, transform_indices = @transform_10, window_bounds = array<i64: 64, 32>}, {pipeline_mode = #tpu.pipeline_mode<synchronous>, transform_indices = @transform_11, window_bounds = array<i64: 1, 32>}, {transform_indices = @transform_12, window_bounds = array<i64: 1, 16, 32>}, {transform_indices = @transform_13, window_bounds = array<i64: 1, 16, 32>}]} {
    %c0 = arith.constant 0 : index
    %c0_0 = arith.constant 0 : index
    %c0_1 = arith.constant 0 : index
    %0 = vector.load %arg2[%c0, %c0_0, %c0_1] : memref<1x16x32xf32, #tpu.memory_space<vmem>>, vector<1x16x32xf32>
    %1 = vector.shape_cast %0 : vector<1x16x32xf32> to vector<16x32xf32>
    %c0_2 = arith.constant 0 : index
    %c0_3 = arith.constant 0 : index
    %c0_4 = arith.constant 0 : index
    %2 = vector.load %arg3[%c0_2, %c0_3, %c0_4] : memref<1x16x32xf32, #tpu.memory_space<vmem>>, vector<1x16x32xf32>
    %3 = vector.shape_cast %2 : vector<1x16x32xf32> to vector<16x32xf32>
    %c0_5 = arith.constant 0 : index
    %c0_6 = arith.constant 0 : index
    %c0_7 = arith.constant 0 : index
    %4 = vector.load %arg4[%c0_5, %c0_6, %c0_7] : memref<1x16x32xf32, #tpu.memory_space<vmem>>, vector<1x16x32xf32>
    %5 = vector.shape_cast %4 : vector<1x16x32xf32> to vector<16x32xf32>
    %c0_8 = arith.constant 0 : index
    %c0_9 = arith.constant 0 : index
    %c0_10 = arith.constant 0 : index
    %6 = vector.load %arg5[%c0_8, %c0_9, %c0_10] : memref<1x16x32xf32, #tpu.memory_space<vmem>>, vector<1x16x32xf32>
    %7 = vector.shape_cast %6 : vector<1x16x32xf32> to vector<16x32xf32>
    %c0_11 = arith.constant 0 : index
    %c0_12 = arith.constant 0 : index
    %8 = vector.load %arg6[%c0_11, %c0_12] : memref<32x64xf32, #tpu.memory_space<vmem>>, vector<32x64xf32>
    %cst = arith.constant dense<0.000000e+00> : vector<16x64xf32>
    %9 = tpu.matmul %1, %8, %cst {dimension_numbers = #tpu.dot_dimension_numbers<[1], [0], [0], [1], [0, 0, 1, 1], [], []>} : vector<16x32xf32>, vector<32x64xf32>, vector<16x64xf32> -> vector<16x64xf32>
    %c0_13 = arith.constant 0 : index
    %c0_14 = arith.constant 0 : index
    %10 = vector.load %arg7[%c0_13, %c0_14] : memref<32x64xf32, #tpu.memory_space<vmem>>, vector<32x64xf32>
    %cst_15 = arith.constant dense<0.000000e+00> : vector<16x64xf32>
    %11 = tpu.matmul %3, %10, %cst_15 {dimension_numbers = #tpu.dot_dimension_numbers<[1], [0], [0], [1], [0, 0, 1, 1], [], []>} : vector<16x32xf32>, vector<32x64xf32>, vector<16x64xf32> -> vector<16x64xf32>
    %c0_16 = arith.constant 0 : index
    %c0_17 = arith.constant 0 : index
    %12 = vector.load %arg8[%c0_16, %c0_17] : memref<32x16xf32, #tpu.memory_space<vmem>>, vector<32x16xf32>
    %cst_18 = arith.constant dense<0.000000e+00> : vector<16x16xf32>
    %13 = tpu.matmul %5, %12, %cst_18 {dimension_numbers = #tpu.dot_dimension_numbers<[1], [0], [0], [1], [0, 0, 1, 1], [], []>} : vector<16x32xf32>, vector<32x16xf32>, vector<16x16xf32> -> vector<16x16xf32>
    %14 = vector.extract_strided_slice %13 {offsets = [0, 0], sizes = [16, 8], strides = [1, 1]} : vector<16x16xf32> to vector<16x8xf32>
    %15 = vector.extract_strided_slice %13 {offsets = [0, 8], sizes = [16, 8], strides = [1, 1]} : vector<16x16xf32> to vector<16x8xf32>
    %c0_19 = arith.constant 0 : index
    %c0_20 = arith.constant 0 : index
    %16 = vector.load %arg9[%c0_19, %c0_20] : memref<32x16xf32, #tpu.memory_space<vmem>>, vector<32x16xf32>
    %cst_21 = arith.constant dense<0.000000e+00> : vector<16x16xf32>
    %17 = tpu.matmul %7, %16, %cst_21 {dimension_numbers = #tpu.dot_dimension_numbers<[1], [0], [0], [1], [0, 0, 1, 1], [], []>} : vector<16x32xf32>, vector<32x16xf32>, vector<16x16xf32> -> vector<16x16xf32>
    %18 = vector.extract_strided_slice %17 {offsets = [0, 0], sizes = [16, 8], strides = [1, 1]} : vector<16x16xf32> to vector<16x8xf32>
    %19 = vector.extract_strided_slice %17 {offsets = [0, 8], sizes = [16, 8], strides = [1, 1]} : vector<16x16xf32> to vector<16x8xf32>
    %20 = vector.extract_strided_slice %9 {offsets = [0, 0], sizes = [16, 32], strides = [1, 1]} : vector<16x64xf32> to vector<16x32xf32>
    %21 = vector.extract_strided_slice %11 {offsets = [0, 0], sizes = [16, 32], strides = [1, 1]} : vector<16x64xf32> to vector<16x32xf32>
    %22 = vector.extract_strided_slice %20 {offsets = [0, 0], sizes = [16, 8], strides = [1, 1]} : vector<16x32xf32> to vector<16x8xf32>
    %23 = vector.extract_strided_slice %20 {offsets = [0, 8], sizes = [16, 8], strides = [1, 1]} : vector<16x32xf32> to vector<16x8xf32>
    %24 = vector.extract_strided_slice %20 {offsets = [0, 16], sizes = [16, 8], strides = [1, 1]} : vector<16x32xf32> to vector<16x8xf32>
    %25 = vector.extract_strided_slice %20 {offsets = [0, 24], sizes = [16, 8], strides = [1, 1]} : vector<16x32xf32> to vector<16x8xf32>
    %26 = vector.extract_strided_slice %21 {offsets = [0, 0], sizes = [16, 8], strides = [1, 1]} : vector<16x32xf32> to vector<16x8xf32>
    %27 = vector.extract_strided_slice %21 {offsets = [0, 8], sizes = [16, 8], strides = [1, 1]} : vector<16x32xf32> to vector<16x8xf32>
    %28 = vector.extract_strided_slice %21 {offsets = [0, 16], sizes = [16, 8], strides = [1, 1]} : vector<16x32xf32> to vector<16x8xf32>
    %29 = vector.extract_strided_slice %21 {offsets = [0, 24], sizes = [16, 8], strides = [1, 1]} : vector<16x32xf32> to vector<16x8xf32>
    %30 = tpu.concatenate %22, %23, %24, %25, %26, %27, %28, %29 in 0 : vector<16x8xf32>, vector<16x8xf32>, vector<16x8xf32>, vector<16x8xf32>, vector<16x8xf32>, vector<16x8xf32>, vector<16x8xf32>, vector<16x8xf32> -> vector<128x8xf32>
    %cst_22 = arith.constant dense<0.000000e+00> : vector<128x16xf32>
    %31 = tpu.matmul %30, %14, %cst_22 {dimension_numbers = #tpu.dot_dimension_numbers<[1], [1], [0], [0], [0, 0, 1, 0], [], []>} : vector<128x8xf32>, vector<16x8xf32>, vector<128x16xf32> -> vector<128x16xf32>
    %cst_23 = arith.constant dense<0xFF800000> : vector<128xf32>
    %32 = vector.multi_reduction <maximumf>, %31, %cst_23 [1] : vector<128x16xf32> to vector<128xf32>
    %33 = vector.shape_cast %32 : vector<128xf32> to vector<128x1xf32>
    %34 = vector.broadcast %33 : vector<128x1xf32> to vector<128x16xf32>
    %35 = arith.subf %31, %34 : vector<128x16xf32>
    %36 = math.exp %35 : vector<128x16xf32>
    %cst_24 = arith.constant dense<0.000000e+00> : vector<128xf32>
    %37 = vector.multi_reduction <add>, %36, %cst_24 [1] : vector<128x16xf32> to vector<128xf32>
    %38 = vector.shape_cast %37 : vector<128xf32> to vector<128x1xf32>
    %cst_25 = arith.constant dense<0.000000e+00> : vector<128x8xf32>
    %39 = tpu.matmul %36, %15, %cst_25 {dimension_numbers = #tpu.dot_dimension_numbers<[1], [0], [0], [1], [0, 0, 1, 1], [], []>} : vector<128x16xf32>, vector<16x8xf32>, vector<128x8xf32> -> vector<128x8xf32>
    %40 = tpu.reciprocal %38 : vector<128x1xf32> -> vector<128x1xf32>
    %41 = vector.broadcast %40 : vector<128x1xf32> to vector<128x8xf32>
    %42 = arith.mulf %39, %41 : vector<128x8xf32>
    %43 = vector.extract_strided_slice %11 {offsets = [0, 32], sizes = [16, 32], strides = [1, 1]} : vector<16x64xf32> to vector<16x32xf32>
    %44 = vector.extract_strided_slice %9 {offsets = [0, 32], sizes = [16, 32], strides = [1, 1]} : vector<16x64xf32> to vector<16x32xf32>
    %45 = vector.extract_strided_slice %43 {offsets = [0, 0], sizes = [16, 8], strides = [1, 1]} : vector<16x32xf32> to vector<16x8xf32>
    %46 = vector.extract_strided_slice %43 {offsets = [0, 8], sizes = [16, 8], strides = [1, 1]} : vector<16x32xf32> to vector<16x8xf32>
    %47 = vector.extract_strided_slice %43 {offsets = [0, 16], sizes = [16, 8], strides = [1, 1]} : vector<16x32xf32> to vector<16x8xf32>
    %48 = vector.extract_strided_slice %43 {offsets = [0, 24], sizes = [16, 8], strides = [1, 1]} : vector<16x32xf32> to vector<16x8xf32>
    %49 = vector.extract_strided_slice %44 {offsets = [0, 0], sizes = [16, 8], strides = [1, 1]} : vector<16x32xf32> to vector<16x8xf32>
    %50 = vector.extract_strided_slice %44 {offsets = [0, 8], sizes = [16, 8], strides = [1, 1]} : vector<16x32xf32> to vector<16x8xf32>
    %51 = vector.extract_strided_slice %44 {offsets = [0, 16], sizes = [16, 8], strides = [1, 1]} : vector<16x32xf32> to vector<16x8xf32>
    %52 = vector.extract_strided_slice %44 {offsets = [0, 24], sizes = [16, 8], strides = [1, 1]} : vector<16x32xf32> to vector<16x8xf32>
    %53 = tpu.concatenate %45, %46, %47, %48, %49, %50, %51, %52 in 0 : vector<16x8xf32>, vector<16x8xf32>, vector<16x8xf32>, vector<16x8xf32>, vector<16x8xf32>, vector<16x8xf32>, vector<16x8xf32>, vector<16x8xf32> -> vector<128x8xf32>
    %cst_26 = arith.constant dense<0.000000e+00> : vector<128x16xf32>
    %54 = tpu.matmul %53, %18, %cst_26 {dimension_numbers = #tpu.dot_dimension_numbers<[1], [1], [0], [0], [0, 0, 1, 0], [], []>} : vector<128x8xf32>, vector<16x8xf32>, vector<128x16xf32> -> vector<128x16xf32>
    %cst_27 = arith.constant dense<0xFF800000> : vector<128xf32>
    %55 = vector.multi_reduction <maximumf>, %54, %cst_27 [1] : vector<128x16xf32> to vector<128xf32>
    %56 = vector.shape_cast %55 : vector<128xf32> to vector<128x1xf32>
    %57 = vector.broadcast %56 : vector<128x1xf32> to vector<128x16xf32>
    %58 = arith.subf %54, %57 : vector<128x16xf32>
    %59 = math.exp %58 : vector<128x16xf32>
    %cst_28 = arith.constant dense<0.000000e+00> : vector<128xf32>
    %60 = vector.multi_reduction <add>, %59, %cst_28 [1] : vector<128x16xf32> to vector<128xf32>
    %61 = vector.shape_cast %60 : vector<128xf32> to vector<128x1xf32>
    %cst_29 = arith.constant dense<0.000000e+00> : vector<128x8xf32>
    %62 = tpu.matmul %59, %19, %cst_29 {dimension_numbers = #tpu.dot_dimension_numbers<[1], [0], [0], [1], [0, 0, 1, 1], [], []>} : vector<128x16xf32>, vector<16x8xf32>, vector<128x8xf32> -> vector<128x8xf32>
    %63 = tpu.reciprocal %61 : vector<128x1xf32> -> vector<128x1xf32>
    %64 = vector.broadcast %63 : vector<128x1xf32> to vector<128x8xf32>
    %65 = arith.mulf %62, %64 : vector<128x8xf32>
    %66 = vector.extract_strided_slice %42 {offsets = [0, 0], sizes = [16, 8], strides = [1, 1]} : vector<128x8xf32> to vector<16x8xf32>
    %67 = vector.extract_strided_slice %42 {offsets = [16, 0], sizes = [16, 8], strides = [1, 1]} : vector<128x8xf32> to vector<16x8xf32>
    %68 = vector.extract_strided_slice %42 {offsets = [32, 0], sizes = [16, 8], strides = [1, 1]} : vector<128x8xf32> to vector<16x8xf32>
    %69 = vector.extract_strided_slice %42 {offsets = [48, 0], sizes = [16, 8], strides = [1, 1]} : vector<128x8xf32> to vector<16x8xf32>
    %70 = vector.extract_strided_slice %65 {offsets = [64, 0], sizes = [16, 8], strides = [1, 1]} : vector<128x8xf32> to vector<16x8xf32>
    %71 = vector.extract_strided_slice %65 {offsets = [80, 0], sizes = [16, 8], strides = [1, 1]} : vector<128x8xf32> to vector<16x8xf32>
    %72 = vector.extract_strided_slice %65 {offsets = [96, 0], sizes = [16, 8], strides = [1, 1]} : vector<128x8xf32> to vector<16x8xf32>
    %73 = vector.extract_strided_slice %65 {offsets = [112, 0], sizes = [16, 8], strides = [1, 1]} : vector<128x8xf32> to vector<16x8xf32>
    %74 = tpu.concatenate %66, %67, %68, %69, %70, %71, %72, %73 in 1 : vector<16x8xf32>, vector<16x8xf32>, vector<16x8xf32>, vector<16x8xf32>, vector<16x8xf32>, vector<16x8xf32>, vector<16x8xf32>, vector<16x8xf32> -> vector<16x64xf32>
    %75 = vector.extract_strided_slice %65 {offsets = [0, 0], sizes = [16, 8], strides = [1, 1]} : vector<128x8xf32> to vector<16x8xf32>
    %76 = vector.extract_strided_slice %65 {offsets = [16, 0], sizes = [16, 8], strides = [1, 1]} : vector<128x8xf32> to vector<16x8xf32>
    %77 = vector.extract_strided_slice %65 {offsets = [32, 0], sizes = [16, 8], strides = [1, 1]} : vector<128x8xf32> to vector<16x8xf32>
    %78 = vector.extract_strided_slice %65 {offsets = [48, 0], sizes = [16, 8], strides = [1, 1]} : vector<128x8xf32> to vector<16x8xf32>
    %79 = vector.extract_strided_slice %42 {offsets = [64, 0], sizes = [16, 8], strides = [1, 1]} : vector<128x8xf32> to vector<16x8xf32>
    %80 = vector.extract_strided_slice %42 {offsets = [80, 0], sizes = [16, 8], strides = [1, 1]} : vector<128x8xf32> to vector<16x8xf32>
    %81 = vector.extract_strided_slice %42 {offsets = [96, 0], sizes = [16, 8], strides = [1, 1]} : vector<128x8xf32> to vector<16x8xf32>
    %82 = vector.extract_strided_slice %42 {offsets = [112, 0], sizes = [16, 8], strides = [1, 1]} : vector<128x8xf32> to vector<16x8xf32>
    %83 = tpu.concatenate %75, %76, %77, %78, %79, %80, %81, %82 in 1 : vector<16x8xf32>, vector<16x8xf32>, vector<16x8xf32>, vector<16x8xf32>, vector<16x8xf32>, vector<16x8xf32>, vector<16x8xf32>, vector<16x8xf32> -> vector<16x64xf32>
    %c0_30 = arith.constant 0 : index
    %c0_31 = arith.constant 0 : index
    %84 = vector.load %arg10[%c0_30, %c0_31] : memref<64x32xf32, #tpu.memory_space<vmem>>, vector<64x32xf32>
    %cst_32 = arith.constant dense<0.000000e+00> : vector<16x32xf32>
    %85 = tpu.matmul %74, %84, %cst_32 {dimension_numbers = #tpu.dot_dimension_numbers<[1], [0], [0], [1], [0, 0, 1, 1], [], []>} : vector<16x64xf32>, vector<64x32xf32>, vector<16x32xf32> -> vector<16x32xf32>
    %c0_33 = arith.constant 0 : index
    %c0_34 = arith.constant 0 : index
    %86 = vector.load %arg11[%c0_33, %c0_34] : memref<1x32xf32, #tpu.memory_space<vmem>>, vector<1x32xf32>
    %87 = vector.broadcast %86 : vector<1x32xf32> to vector<16x32xf32>
    %88 = arith.addf %85, %87 : vector<16x32xf32>
    %c0_35 = arith.constant 0 : index
    %c0_36 = arith.constant 0 : index
    %89 = vector.load %arg12[%c0_35, %c0_36] : memref<64x32xf32, #tpu.memory_space<vmem>>, vector<64x32xf32>
    %cst_37 = arith.constant dense<0.000000e+00> : vector<16x32xf32>
    %90 = tpu.matmul %83, %89, %cst_37 {dimension_numbers = #tpu.dot_dimension_numbers<[1], [0], [0], [1], [0, 0, 1, 1], [], []>} : vector<16x64xf32>, vector<64x32xf32>, vector<16x32xf32> -> vector<16x32xf32>
    %c0_38 = arith.constant 0 : index
    %c0_39 = arith.constant 0 : index
    %91 = vector.load %arg13[%c0_38, %c0_39] : memref<1x32xf32, #tpu.memory_space<vmem>>, vector<1x32xf32>
    %92 = vector.broadcast %91 : vector<1x32xf32> to vector<16x32xf32>
    %93 = arith.addf %90, %92 : vector<16x32xf32>
    %c0_40 = arith.constant 0 : index
    %c0_41 = arith.constant 0 : index
    %c0_42 = arith.constant 0 : index
    %94 = vector.load %arg14[%c0_40, %c0_41, %c0_42] : memref<1x16x32xf32, #tpu.memory_space<vmem>>, vector<1x16x32xf32>
    %95 = vector.shape_cast %94 : vector<1x16x32xf32> to vector<16x32xf32>
    %96 = vector.shape_cast %88 : vector<16x32xf32> to vector<1x16x32xf32>
    tpu.vector_store %arg14[%c0_40, %c0_41, %c0_42], %96 {strides = array<i32>} : memref<1x16x32xf32, #tpu.memory_space<vmem>>, vector<1x16x32xf32>,
    %c0_43 = arith.constant 0 : index
    %c0_44 = arith.constant 0 : index
    %c0_45 = arith.constant 0 : index
    %97 = vector.load %arg15[%c0_43, %c0_44, %c0_45] : memref<1x16x32xf32, #tpu.memory_space<vmem>>, vector<1x16x32xf32>
    %98 = vector.shape_cast %97 : vector<1x16x32xf32> to vector<16x32xf32>
    %99 = vector.shape_cast %93 : vector<16x32xf32> to vector<1x16x32xf32>
    tpu.vector_store %arg15[%c0_43, %c0_44, %c0_45], %99 {strides = array<i32>} : memref<1x16x32xf32, #tpu.memory_space<vmem>>, vector<1x16x32xf32>,
    return
  }
  func.func @transform_0(%arg0: i32, %arg1: i32) -> (i32, i32, i32) {
    %c0_i32 = arith.constant 0 : i32
    %c0_i32_0 = arith.constant 0 : i32
    return %arg0, %arg1, %c0_i32 : i32, i32, i32
  }
  func.func @transform_1(%arg0: i32, %arg1: i32) -> (i32, i32, i32) {
    %c0_i32 = arith.constant 0 : i32
    %c0_i32_0 = arith.constant 0 : i32
    return %arg0, %arg1, %c0_i32 : i32, i32, i32
  }
  func.func @transform_2(%arg0: i32, %arg1: i32) -> (i32, i32, i32) {
    %c0_i32 = arith.constant 0 : i32
    %c0_i32_0 = arith.constant 0 : i32
    %c0_i32_1 = arith.constant 0 : i32
    return %arg0, %c0_i32, %c0_i32_0 : i32, i32, i32
  }
  func.func @transform_3(%arg0: i32, %arg1: i32) -> (i32, i32, i32) {
    %c0_i32 = arith.constant 0 : i32
    %c0_i32_0 = arith.constant 0 : i32
    %c0_i32_1 = arith.constant 0 : i32
    return %arg0, %c0_i32, %c0_i32_0 : i32, i32, i32
  }
  func.func @transform_4(%arg0: i32, %arg1: i32) -> (i32, i32) {
    %c0_i32 = arith.constant 0 : i32
    %c0_i32_0 = arith.constant 0 : i32
    %c0_i32_1 = arith.constant 0 : i32
    return %c0_i32, %c0_i32_0 : i32, i32
  }
  func.func @transform_5(%arg0: i32, %arg1: i32) -> (i32, i32) {
    %c0_i32 = arith.constant 0 : i32
    %c0_i32_0 = arith.constant 0 : i32
    %c0_i32_1 = arith.constant 0 : i32
    return %c0_i32, %c0_i32_0 : i32, i32
  }
  func.func @transform_6(%arg0: i32, %arg1: i32) -> (i32, i32) {
    %c0_i32 = arith.constant 0 : i32
    %c0_i32_0 = arith.constant 0 : i32
    %c0_i32_1 = arith.constant 0 : i32
    return %c0_i32, %c0_i32_0 : i32, i32
  }
  func.func @transform_7(%arg0: i32, %arg1: i32) -> (i32, i32) {
    %c0_i32 = arith.constant 0 : i32
    %c0_i32_0 = arith.constant 0 : i32
    %c0_i32_1 = arith.constant 0 : i32
    return %c0_i32, %c0_i32_0 : i32, i32
  }
  func.func @transform_8(%arg0: i32, %arg1: i32) -> (i32, i32) {
    %c0_i32 = arith.constant 0 : i32
    %c0_i32_0 = arith.constant 0 : i32
    %c0_i32_1 = arith.constant 0 : i32
    return %c0_i32, %c0_i32_0 : i32, i32
  }
  func.func @transform_9(%arg0: i32, %arg1: i32) -> (i32, i32) {
    %c0_i32 = arith.constant 0 : i32
    %c0_i32_0 = arith.constant 0 : i32
    %c0_i32_1 = arith.constant 0 : i32
    return %c0_i32, %c0_i32_0 : i32, i32
  }
  func.func @transform_10(%arg0: i32, %arg1: i32) -> (i32, i32) {
    %c0_i32 = arith.constant 0 : i32
    %c0_i32_0 = arith.constant 0 : i32
    %c0_i32_1 = arith.constant 0 : i32
    return %c0_i32, %c0_i32_0 : i32, i32
  }
  func.func @transform_11(%arg0: i32, %arg1: i32) -> (i32, i32) {
    %c0_i32 = arith.constant 0 : i32
    %c0_i32_0 = arith.constant 0 : i32
    %c0_i32_1 = arith.constant 0 : i32
    return %c0_i32, %c0_i32_0 : i32, i32
  }
  func.func @transform_12(%arg0: i32, %arg1: i32) -> (i32, i32, i32) {
    %c0_i32 = arith.constant 0 : i32
    %c0_i32_0 = arith.constant 0 : i32
    return %arg0, %arg1, %c0_i32 : i32, i32, i32
  }
  func.func @transform_13(%arg0: i32, %arg1: i32) -> (i32, i32, i32) {
    %c0_i32 = arith.constant 0 : i32
    %c0_i32_0 = arith.constant 0 : i32
    return %arg0, %arg1, %c0_i32 : i32, i32, i32
  }
}

module attributes {stable_mosaic.version = 11 : i64} {
  func.func @_recurrent_attention_kernel(%arg0: i32, %arg1: i32, %arg2: memref<1x16x32xf32, #tpu.memory_space<vmem>>, %arg3: memref<1x16x32xf32, #tpu.memory_space<vmem>>, %arg4: memref<1x16x32xf32, #tpu.memory_space<vmem>>, %arg5: memref<1x16x32xf32, #tpu.memory_space<vmem>>, %arg6: memref<32x64xf32, #tpu.memory_space<vmem>>, %arg7: memref<32x64xf32, #tpu.memory_space<vmem>>, %arg8: memref<32x16xf32, #tpu.memory_space<vmem>>, %arg9: memref<32x16xf32, #tpu.memory_space<vmem>>, %arg10: memref<64x32xf32, #tpu.memory_space<vmem>>, %arg11: memref<1x32xf32, #tpu.memory_space<vmem>>, %arg12: memref<64x32xf32, #tpu.memory_space<vmem>>, %arg13: memref<1x32xf32, #tpu.memory_space<vmem>>, %arg14: memref<1x16x32xf32, #tpu.memory_space<vmem>>, %arg15: memref<1x16x32xf32, #tpu.memory_space<vmem>>) attributes {dimension_semantics = [#tpu.dimension_semantics<parallel>, #tpu.dimension_semantics<parallel>], iteration_bounds = array<i64: 2, 1>, scalar_prefetch = 0 : i64, scratch_operands = 0 : i64, tpu.core_type = #tpu.core_type<tc>, window_params = [{transform_indices = @transform_0, window_bounds = array<i64: 1, 16, 32>}, {transform_indices = @transform_1, window_bounds = array<i64: 1, 16, 32>}, {transform_indices = @transform_2, window_bounds = array<i64: 1, 16, 32>}, {transform_indices = @transform_3, window_bounds = array<i64: 1, 16, 32>}, {pipeline_mode = #tpu.pipeline_mode<synchronous>, transform_indices = @transform_4, window_bounds = array<i64: 32, 64>}, {pipeline_mode = #tpu.pipeline_mode<synchronous>, transform_indices = @transform_5, window_bounds = array<i64: 32, 64>}, {pipeline_mode = #tpu.pipeline_mode<synchronous>, transform_indices = @transform_6, window_bounds = array<i64: 32, 16>}, {pipeline_mode = #tpu.pipeline_mode<synchronous>, transform_indices = @transform_7, window_bounds = array<i64: 32, 16>}, {pipeline_mode = #tpu.pipeline_mode<synchronous>, transform_indices = @transform_8, window_bounds = array<i64: 64, 32>}, {pipeline_mode = #tpu.pipeline_mode<synchronous>, transform_indices = @transform_9, window_bounds = array<i64: 1, 32>}, {pipeline_mode = #tpu.pipeline_mode<synchronous>, transform_indices = @transform_10, window_bounds = array<i64: 64, 32>}, {pipeline_mode = #tpu.pipeline_mode<synchronous>, transform_indices = @transform_11, window_bounds = array<i64: 1, 32>}, {transform_indices = @transform_12, window_bounds = array<i64: 1, 16, 32>}, {transform_indices = @transform_13, window_bounds = array<i64: 1, 16, 32>}]} {
    %c0 = arith.constant 0 : index
    %c0_0 = arith.constant 0 : index
    %c0_1 = arith.constant 0 : index
    %0 = vector.load %arg2[%c0, %c0_0, %c0_1] : memref<1x16x32xf32, #tpu.memory_space<vmem>>, vector<1x16x32xf32>
    %1 = vector.shape_cast %0 : vector<1x16x32xf32> to vector<16x32xf32>
    %c0_2 = arith.constant 0 : index
    %c0_3 = arith.constant 0 : index
    %c0_4 = arith.constant 0 : index
    %2 = vector.load %arg3[%c0_2, %c0_3, %c0_4] : memref<1x16x32xf32, #tpu.memory_space<vmem>>, vector<1x16x32xf32>
    %3 = vector.shape_cast %2 : vector<1x16x32xf32> to vector<16x32xf32>
    %c0_5 = arith.constant 0 : index
    %c0_6 = arith.constant 0 : index
    %c0_7 = arith.constant 0 : index
    %4 = vector.load %arg4[%c0_5, %c0_6, %c0_7] : memref<1x16x32xf32, #tpu.memory_space<vmem>>, vector<1x16x32xf32>
    %5 = vector.shape_cast %4 : vector<1x16x32xf32> to vector<16x32xf32>
    %c0_8 = arith.constant 0 : index
    %c0_9 = arith.constant 0 : index
    %c0_10 = arith.constant 0 : index
    %6 = vector.load %arg5[%c0_8, %c0_9, %c0_10] : memref<1x16x32xf32, #tpu.memory_space<vmem>>, vector<1x16x32xf32>
    %7 = vector.shape_cast %6 : vector<1x16x32xf32> to vector<16x32xf32>
    %c0_11 = arith.constant 0 : index
    %c0_12 = arith.constant 0 : index
    %8 = vector.load %arg6[%c0_11, %c0_12] : memref<32x64xf32, #tpu.memory_space<vmem>>, vector<32x64xf32>
    %cst = arith.constant dense<0.000000e+00> : vector<16x64xf32>
    %9 = tpu.matmul %1, %8, %cst {dimension_numbers = #tpu.dot_dimension_numbers<[1], [0], [0], [1], [0, 0, 1, 1], [], []>} : vector<16x32xf32>, vector<32x64xf32>, vector<16x64xf32> -> vector<16x64xf32>
    %c0_13 = arith.constant 0 : index
    %c0_14 = arith.constant 0 : index
    %10 = vector.load %arg7[%c0_13, %c0_14] : memref<32x64xf32, #tpu.memory_space<vmem>>, vector<32x64xf32>
    %cst_15 = arith.constant dense<0.000000e+00> : vector<16x64xf32>
    %11 = tpu.matmul %3, %10, %cst_15 {dimension_numbers = #tpu.dot_dimension_numbers<[1], [0], [0], [1], [0, 0, 1, 1], [], []>} : vector<16x32xf32>, vector<32x64xf32>, vector<16x64xf32> -> vector<16x64xf32>
    %c0_16 = arith.constant 0 : index
    %c0_17 = arith.constant 0 : index
    %12 = vector.load %arg8[%c0_16, %c0_17] : memref<32x16xf32, #tpu.memory_space<vmem>>, vector<32x16xf32>
    %cst_18 = arith.constant dense<0.000000e+00> : vector<16x16xf32>
    %13 = tpu.matmul %5, %12, %cst_18 {dimension_numbers = #tpu.dot_dimension_numbers<[1], [0], [0], [1], [0, 0, 1, 1], [], []>} : vector<16x32xf32>, vector<32x16xf32>, vector<16x16xf32> -> vector<16x16xf32>
    %14 = vector.extract_strided_slice %13 {offsets = [0, 0], sizes = [16, 8], strides = [1, 1]} : vector<16x16xf32> to vector<16x8xf32>
    %15 = vector.extract_strided_slice %13 {offsets = [0, 8], sizes = [16, 8], strides = [1, 1]} : vector<16x16xf32> to vector<16x8xf32>
    %c0_19 = arith.constant 0 : index
    %c0_20 = arith.constant 0 : index
    %16 = vector.load %arg9[%c0_19, %c0_20] : memref<32x16xf32, #tpu.memory_space<vmem>>, vector<32x16xf32>
    %cst_21 = arith.constant dense<0.000000e+00> : vector<16x16xf32>
    %17 = tpu.matmul %7, %16, %cst_21 {dimension_numbers = #tpu.dot_dimension_numbers<[1], [0], [0], [1], [0, 0, 1, 1], [], []>} : vector<16x32xf32>, vector<32x16xf32>, vector<16x16xf32> -> vector<16x16xf32>
    %18 = vector.extract_strided_slice %17 {offsets = [0, 0], sizes = [16, 8], strides = [1, 1]} : vector<16x16xf32> to vector<16x8xf32>
    %19 = vector.extract_strided_slice %17 {offsets = [0, 8], sizes = [16, 8], strides = [1, 1]} : vector<16x16xf32> to vector<16x8xf32>
    %20 = vector.extract_strided_slice %9 {offsets = [0, 0], sizes = [16, 32], strides = [1, 1]} : vector<16x64xf32> to vector<16x32xf32>
    %21 = vector.extract_strided_slice %11 {offsets = [0, 0], sizes = [16, 32], strides = [1, 1]} : vector<16x64xf32> to vector<16x32xf32>
    %22 = vector.extract_strided_slice %20 {offsets = [0, 0], sizes = [16, 8], strides = [1, 1]} : vector<16x32xf32> to vector<16x8xf32>
    %23 = vector.extract_strided_slice %20 {offsets = [0, 8], sizes = [16, 8], strides = [1, 1]} : vector<16x32xf32> to vector<16x8xf32>
    %24 = vector.extract_strided_slice %20 {offsets = [0, 16], sizes = [16, 8], strides = [1, 1]} : vector<16x32xf32> to vector<16x8xf32>
    %25 = vector.extract_strided_slice %20 {offsets = [0, 24], sizes = [16, 8], strides = [1, 1]} : vector<16x32xf32> to vector<16x8xf32>
    %26 = vector.extract_strided_slice %21 {offsets = [0, 0], sizes = [16, 8], strides = [1, 1]} : vector<16x32xf32> to vector<16x8xf32>
    %27 = vector.extract_strided_slice %21 {offsets = [0, 8], sizes = [16, 8], strides = [1, 1]} : vector<16x32xf32> to vector<16x8xf32>
    %28 = vector.extract_strided_slice %21 {offsets = [0, 16], sizes = [16, 8], strides = [1, 1]} : vector<16x32xf32> to vector<16x8xf32>
    %29 = vector.extract_strided_slice %21 {offsets = [0, 24], sizes = [16, 8], strides = [1, 1]} : vector<16x32xf32> to vector<16x8xf32>
    %30 = tpu.concatenate %22, %23, %24, %25, %26, %27, %28, %29 in 0 : vector<16x8xf32>, vector<16x8xf32>, vector<16x8xf32>, vector<16x8xf32>, vector<16x8xf32>, vector<16x8xf32>, vector<16x8xf32>, vector<16x8xf32> -> vector<128x8xf32>
    %cst_22 = arith.constant dense<0.000000e+00> : vector<128x16xf32>
    %31 = tpu.matmul %30, %14, %cst_22 {dimension_numbers = #tpu.dot_dimension_numbers<[1], [1], [0], [0], [0, 0, 1, 0], [], []>} : vector<128x8xf32>, vector<16x8xf32>, vector<128x16xf32> -> vector<128x16xf32>
    %cst_23 = arith.constant dense<0xFF800000> : vector<128xf32>
    %32 = vector.multi_reduction <maximumf>, %31, %cst_23 [1] : vector<128x16xf32> to vector<128xf32>
    %33 = vector.shape_cast %32 : vector<128xf32> to vector<128x1xf32>
    %34 = vector.broadcast %33 : vector<128x1xf32> to vector<128x16xf32>
    %35 = arith.subf %31, %34 : vector<128x16xf32>
    %36 = math.exp %35 : vector<128x16xf32>
    %cst_24 = arith.constant dense<0.000000e+00> : vector<128xf32>
    %37 = vector.multi_reduction <add>, %36, %cst_24 [1] : vector<128x16xf32> to vector<128xf32>
    %38 = vector.shape_cast %37 : vector<128xf32> to vector<128x1xf32>
    %cst_25 = arith.constant dense<0.000000e+00> : vector<128x8xf32>
    %39 = tpu.matmul %36, %15, %cst_25 {dimension_numbers = #tpu.dot_dimension_numbers<[1], [0], [0], [1], [0, 0, 1, 1], [], []>} : vector<128x16xf32>, vector<16x8xf32>, vector<128x8xf32> -> vector<128x8xf32>
    %40 = tpu.reciprocal %38 : vector<128x1xf32> -> vector<128x1xf32>
    %41 = vector.broadcast %40 : vector<128x1xf32> to vector<128x8xf32>
    %42 = arith.mulf %39, %41 : vector<128x8xf32>
    %43 = vector.extract_strided_slice %11 {offsets = [0, 32], sizes = [16, 32], strides = [1, 1]} : vector<16x64xf32> to vector<16x32xf32>
    %44 = vector.extract_strided_slice %9 {offsets = [0, 32], sizes = [16, 32], strides = [1, 1]} : vector<16x64xf32> to vector<16x32xf32>
    %45 = vector.extract_strided_slice %43 {offsets = [0, 0], sizes = [16, 8], strides = [1, 1]} : vector<16x32xf32> to vector<16x8xf32>
    %46 = vector.extract_strided_slice %43 {offsets = [0, 8], sizes = [16, 8], strides = [1, 1]} : vector<16x32xf32> to vector<16x8xf32>
    %47 = vector.extract_strided_slice %43 {offsets = [0, 16], sizes = [16, 8], strides = [1, 1]} : vector<16x32xf32> to vector<16x8xf32>
    %48 = vector.extract_strided_slice %43 {offsets = [0, 24], sizes = [16, 8], strides = [1, 1]} : vector<16x32xf32> to vector<16x8xf32>
    %49 = vector.extract_strided_slice %44 {offsets = [0, 0], sizes = [16, 8], strides = [1, 1]} : vector<16x32xf32> to vector<16x8xf32>
    %50 = vector.extract_strided_slice %44 {offsets = [0, 8], sizes = [16, 8], strides = [1, 1]} : vector<16x32xf32> to vector<16x8xf32>
    %51 = vector.extract_strided_slice %44 {offsets = [0, 16], sizes = [16, 8], strides = [1, 1]} : vector<16x32xf32> to vector<16x8xf32>
    %52 = vector.extract_strided_slice %44 {offsets = [0, 24], sizes = [16, 8], strides = [1, 1]} : vector<16x32xf32> to vector<16x8xf32>
    %53 = tpu.concatenate %45, %46, %47, %48, %49, %50, %51, %52 in 0 : vector<16x8xf32>, vector<16x8xf32>, vector<16x8xf32>, vector<16x8xf32>, vector<16x8xf32>, vector<16x8xf32>, vector<16x8xf32>, vector<16x8xf32> -> vector<128x8xf32>
    %cst_26 = arith.constant dense<0.000000e+00> : vector<128x16xf32>
    %54 = tpu.matmul %53, %18, %cst_26 {dimension_numbers = #tpu.dot_dimension_numbers<[1], [1], [0], [0], [0, 0, 1, 0], [], []>} : vector<128x8xf32>, vector<16x8xf32>, vector<128x16xf32> -> vector<128x16xf32>
    %cst_27 = arith.constant dense<0xFF800000> : vector<128xf32>
    %55 = vector.multi_reduction <maximumf>, %54, %cst_27 [1] : vector<128x16xf32> to vector<128xf32>
    %56 = vector.shape_cast %55 : vector<128xf32> to vector<128x1xf32>
    %57 = vector.broadcast %56 : vector<128x1xf32> to vector<128x16xf32>
    %58 = arith.subf %54, %57 : vector<128x16xf32>
    %59 = math.exp %58 : vector<128x16xf32>
    %cst_28 = arith.constant dense<0.000000e+00> : vector<128xf32>
    %60 = vector.multi_reduction <add>, %59, %cst_28 [1] : vector<128x16xf32> to vector<128xf32>
    %61 = vector.shape_cast %60 : vector<128xf32> to vector<128x1xf32>
    %cst_29 = arith.constant dense<0.000000e+00> : vector<128x8xf32>
    %62 = tpu.matmul %59, %19, %cst_29 {dimension_numbers = #tpu.dot_dimension_numbers<[1], [0], [0], [1], [0, 0, 1, 1], [], []>} : vector<128x16xf32>, vector<16x8xf32>, vector<128x8xf32> -> vector<128x8xf32>
    %63 = tpu.reciprocal %61 : vector<128x1xf32> -> vector<128x1xf32>
    %64 = vector.broadcast %63 : vector<128x1xf32> to vector<128x8xf32>
    %65 = arith.mulf %62, %64 : vector<128x8xf32>
    %66 = vector.extract_strided_slice %42 {offsets = [0, 0], sizes = [16, 8], strides = [1, 1]} : vector<128x8xf32> to vector<16x8xf32>
    %67 = vector.extract_strided_slice %42 {offsets = [16, 0], sizes = [16, 8], strides = [1, 1]} : vector<128x8xf32> to vector<16x8xf32>
    %68 = vector.extract_strided_slice %42 {offsets = [32, 0], sizes = [16, 8], strides = [1, 1]} : vector<128x8xf32> to vector<16x8xf32>
    %69 = vector.extract_strided_slice %42 {offsets = [48, 0], sizes = [16, 8], strides = [1, 1]} : vector<128x8xf32> to vector<16x8xf32>
    %70 = vector.extract_strided_slice %65 {offsets = [64, 0], sizes = [16, 8], strides = [1, 1]} : vector<128x8xf32> to vector<16x8xf32>
    %71 = vector.extract_strided_slice %65 {offsets = [80, 0], sizes = [16, 8], strides = [1, 1]} : vector<128x8xf32> to vector<16x8xf32>
    %72 = vector.extract_strided_slice %65 {offsets = [96, 0], sizes = [16, 8], strides = [1, 1]} : vector<128x8xf32> to vector<16x8xf32>
    %73 = vector.extract_strided_slice %65 {offsets = [112, 0], sizes = [16, 8], strides = [1, 1]} : vector<128x8xf32> to vector<16x8xf32>
    %74 = tpu.concatenate %66, %67, %68, %69, %70, %71, %72, %73 in 1 : vector<16x8xf32>, vector<16x8xf32>, vector<16x8xf32>, vector<16x8xf32>, vector<16x8xf32>, vector<16x8xf32>, vector<16x8xf32>, vector<16x8xf32> -> vector<16x64xf32>
    %75 = vector.extract_strided_slice %65 {offsets = [0, 0], sizes = [16, 8], strides = [1, 1]} : vector<128x8xf32> to vector<16x8xf32>
    %76 = vector.extract_strided_slice %65 {offsets = [16, 0], sizes = [16, 8], strides = [1, 1]} : vector<128x8xf32> to vector<16x8xf32>
    %77 = vector.extract_strided_slice %65 {offsets = [32, 0], sizes = [16, 8], strides = [1, 1]} : vector<128x8xf32> to vector<16x8xf32>
    %78 = vector.extract_strided_slice %65 {offsets = [48, 0], sizes = [16, 8], strides = [1, 1]} : vector<128x8xf32> to vector<16x8xf32>
    %79 = vector.extract_strided_slice %42 {offsets = [64, 0], sizes = [16, 8], strides = [1, 1]} : vector<128x8xf32> to vector<16x8xf32>
    %80 = vector.extract_strided_slice %42 {offsets = [80, 0], sizes = [16, 8], strides = [1, 1]} : vector<128x8xf32> to vector<16x8xf32>
    %81 = vector.extract_strided_slice %42 {offsets = [96, 0], sizes = [16, 8], strides = [1, 1]} : vector<128x8xf32> to vector<16x8xf32>
    %82 = vector.extract_strided_slice %42 {offsets = [112, 0], sizes = [16, 8], strides = [1, 1]} : vector<128x8xf32> to vector<16x8xf32>
    %83 = tpu.concatenate %75, %76, %77, %78, %79, %80, %81, %82 in 1 : vector<16x8xf32>, vector<16x8xf32>, vector<16x8xf32>, vector<16x8xf32>, vector<16x8xf32>, vector<16x8xf32>, vector<16x8xf32>, vector<16x8xf32> -> vector<16x64xf32>
    %c0_30 = arith.constant 0 : index
    %c0_31 = arith.constant 0 : index
    %84 = vector.load %arg10[%c0_30, %c0_31] : memref<64x32xf32, #tpu.memory_space<vmem>>, vector<64x32xf32>
    %cst_32 = arith.constant dense<0.000000e+00> : vector<16x32xf32>
    %85 = tpu.matmul %74, %84, %cst_32 {dimension_numbers = #tpu.dot_dimension_numbers<[1], [0], [0], [1], [0, 0, 1, 1], [], []>} : vector<16x64xf32>, vector<64x32xf32>, vector<16x32xf32> -> vector<16x32xf32>
    %c0_33 = arith.constant 0 : index
    %c0_34 = arith.constant 0 : index
    %86 = vector.load %arg11[%c0_33, %c0_34] : memref<1x32xf32, #tpu.memory_space<vmem>>, vector<1x32xf32>
    %87 = vector.broadcast %86 : vector<1x32xf32> to vector<16x32xf32>
    %88 = arith.addf %85, %87 : vector<16x32xf32>
    %c0_35 = arith.constant 0 : index
    %c0_36 = arith.constant 0 : index
    %89 = vector.load %arg12[%c0_35, %c0_36] : memref<64x32xf32, #tpu.memory_space<vmem>>, vector<64x32xf32>
    %cst_37 = arith.constant dense<0.000000e+00> : vector<16x32xf32>
    %90 = tpu.matmul %83, %89, %cst_37 {dimension_numbers = #tpu.dot_dimension_numbers<[1], [0], [0], [1], [0, 0, 1, 1], [], []>} : vector<16x64xf32>, vector<64x32xf32>, vector<16x32xf32> -> vector<16x32xf32>
    %c0_38 = arith.constant 0 : index
    %c0_39 = arith.constant 0 : index
    %91 = vector.load %arg13[%c0_38, %c0_39] : memref<1x32xf32, #tpu.memory_space<vmem>>, vector<1x32xf32>
    %92 = vector.broadcast %91 : vector<1x32xf32> to vector<16x32xf32>
    %93 = arith.addf %90, %92 : vector<16x32xf32>
    %c0_40 = arith.constant 0 : index
    %c0_41 = arith.constant 0 : index
    %c0_42 = arith.constant 0 : index
    %94 = vector.load %arg14[%c0_40, %c0_41, %c0_42] : memref<1x16x32xf32, #tpu.memory_space<vmem>>, vector<1x16x32xf32>
    %95 = vector.shape_cast %94 : vector<1x16x32xf32> to vector<16x32xf32>
    %96 = vector.shape_cast %88 : vector<16x32xf32> to vector<1x16x32xf32>
    tpu.vector_store %arg14[%c0_40, %c0_41, %c0_42], %96 {strides = array<i32>} : memref<1x16x32xf32, #tpu.memory_space<vmem>>, vector<1x16x32xf32>,
    %c0_43 = arith.constant 0 : index
    %c0_44 = arith.constant 0 : index
    %c0_45 = arith.constant 0 : index
    %97 = vector.load %arg15[%c0_43, %c0_44, %c0_45] : memref<1x16x32xf32, #tpu.memory_space<vmem>>, vector<1x16x32xf32>
    %98 = vector.shape_cast %97 : vector<1x16x32xf32> to vector<16x32xf32>
    %99 = vector.shape_cast %93 : vector<16x32xf32> to vector<1x16x32xf32>
    tpu.vector_store %arg15[%c0_43, %c0_44, %c0_45], %99 {strides = array<i32>} : memref<1x16x32xf32, #tpu.memory_space<vmem>>, vector<1x16x32xf32>,
    return
  }
  func.func @transform_0(%arg0: i32, %arg1: i32) -> (i32, i32, i32) {
    %c0_i32 = arith.constant 0 : i32
    %c0_i32_0 = arith.constant 0 : i32
    return %arg0, %arg1, %c0_i32 : i32, i32, i32
  }
  func.func @transform_1(%arg0: i32, %arg1: i32) -> (i32, i32, i32) {
    %c0_i32 = arith.constant 0 : i32
    %c0_i32_0 = arith.constant 0 : i32
    return %arg0, %arg1, %c0_i32 : i32, i32, i32
  }
  func.func @transform_2(%arg0: i32, %arg1: i32) -> (i32, i32, i32) {
    %c0_i32 = arith.constant 0 : i32
    %c0_i32_0 = arith.constant 0 : i32
    %c0_i32_1 = arith.constant 0 : i32
    return %arg0, %c0_i32, %c0_i32_0 : i32, i32, i32
  }
  func.func @transform_3(%arg0: i32, %arg1: i32) -> (i32, i32, i32) {
    %c0_i32 = arith.constant 0 : i32
    %c0_i32_0 = arith.constant 0 : i32
    %c0_i32_1 = arith.constant 0 : i32
    return %arg0, %c0_i32, %c0_i32_0 : i32, i32, i32
  }
  func.func @transform_4(%arg0: i32, %arg1: i32) -> (i32, i32) {
    %c0_i32 = arith.constant 0 : i32
    %c0_i32_0 = arith.constant 0 : i32
    %c0_i32_1 = arith.constant 0 : i32
    return %c0_i32, %c0_i32_0 : i32, i32
  }
  func.func @transform_5(%arg0: i32, %arg1: i32) -> (i32, i32) {
    %c0_i32 = arith.constant 0 : i32
    %c0_i32_0 = arith.constant 0 : i32
    %c0_i32_1 = arith.constant 0 : i32
    return %c0_i32, %c0_i32_0 : i32, i32
  }
  func.func @transform_6(%arg0: i32, %arg1: i32) -> (i32, i32) {
    %c0_i32 = arith.constant 0 : i32
    %c0_i32_0 = arith.constant 0 : i32
    %c0_i32_1 = arith.constant 0 : i32
    return %c0_i32, %c0_i32_0 : i32, i32
  }
  func.func @transform_7(%arg0: i32, %arg1: i32) -> (i32, i32) {
    %c0_i32 = arith.constant 0 : i32
    %c0_i32_0 = arith.constant 0 : i32
    %c0_i32_1 = arith.constant 0 : i32
    return %c0_i32, %c0_i32_0 : i32, i32
  }
  func.func @transform_8(%arg0: i32, %arg1: i32) -> (i32, i32) {
    %c0_i32 = arith.constant 0 : i32
    %c0_i32_0 = arith.constant 0 : i32
    %c0_i32_1 = arith.constant 0 : i32
    return %c0_i32, %c0_i32_0 : i32, i32
  }
  func.func @transform_9(%arg0: i32, %arg1: i32) -> (i32, i32) {
    %c0_i32 = arith.constant 0 : i32
    %c0_i32_0 = arith.constant 0 : i32
    %c0_i32_1 = arith.constant 0 : i32
    return %c0_i32, %c0_i32_0 : i32, i32
  }
  func.func @transform_10(%arg0: i32, %arg1: i32) -> (i32, i32) {
    %c0_i32 = arith.constant 0 : i32
    %c0_i32_0 = arith.constant 0 : i32
    %c0_i32_1 = arith.constant 0 : i32
    return %c0_i32, %c0_i32_0 : i32, i32
  }
  func.func @transform_11(%arg0: i32, %arg1: i32) -> (i32, i32) {
    %c0_i32 = arith.constant 0 : i32
    %c0_i32_0 = arith.constant 0 : i32
    %c0_i32_1 = arith.constant 0 : i32
    return %c0_i32, %c0_i32_0 : i32, i32
  }
  func.func @transform_12(%arg0: i32, %arg1: i32) -> (i32, i32, i32) {
    %c0_i32 = arith.constant 0 : i32
    %c0_i32_0 = arith.constant 0 : i32
    return %arg0, %arg1, %c0_i32 : i32, i32, i32
  }
  func.func @transform_13(%arg0: i32, %arg1: i32) -> (i32, i32, i32) {
    %c0_i32 = arith.constant 0 : i32
    %c0_i32_0 = arith.constant 0 : i32
    return %arg0, %arg1, %c0_i32 : i32, i32, i32
  }
}

</mosaic_0001>

<bundles_post_ra>
// kernel: tpu_custom_call.1
= control target key start
LH: loop header
LB: loop body
LE: loop exit
PB: predicated region body
PF: predicated region fallthrough
CT: control target
= control target key end

     0   :  { %s4376_s0 = inlined_call_operand.vmem [shape: f32[2,16,32], index: 0, kind: input, shape index: {}]   ;;  %s4377_s1 = inlined_call_operand.vmem [shape: f32[2,16,32], index: 1, kind: input, shape index: {}]   ;;  %s4378_s2 = inlined_call_operand.vmem [shape: f32[2,16,32], index: 2, kind: input, shape index: {}]   ;;  %s4379_s3 = inlined_call_operand.vmem [shape: f32[2,16,32], index: 3, kind: input, shape index: {}]   ;;  %s4380_s4 = inlined_call_operand.vmem [shape: f32[32,64], index: 4, kind: input, shape index: {}]   ;;  %s4381_s5 = inlined_call_operand.vmem [shape: f32[32,64], index: 5, kind: input, shape index: {}]   ;;  %s4382_s6 = inlined_call_operand.vmem [shape: f32[32,16], index: 6, kind: input, shape index: {}]   ;;  %s4383_s7 = inlined_call_operand.vmem [shape: f32[32,16], index: 7, kind: input, shape index: {}]   ;;  %s4384_s8 = inlined_call_operand.vmem [shape: f32[64,32], index: 8, kind: input, shape index: {}]   ;;  %s4385_s9 = inlined_call_operand.vmem [shape: f32[1,32], index: 9, kind: input, shape index: {}]   ;;  %s4386_s10 = inlined_call_operand.vmem [shape: f32[64,32], index: 10, kind: input, shape index: {}]   ;;  %s4387_s11 = inlined_call_operand.vmem [shape: f32[1,32], index: 11, kind: input, shape index: {}]   ;;  %s4388_s12 = inlined_call_operand.hbm [shape: f32[2,16,32], index: 12, kind: output, shape index: {0}]   ;;  %s4389_s13 = inlined_call_operand.hbm [shape: f32[2,16,32], index: 13, kind: output, shape index: {1}]  }
   0x1   :  { %4401 = sst [smem:[#allocation12_spill]] %s4376_s0 }
   0x2   :  { %4402 = sst [smem:[#allocation13_spill]] %s4380_s4 }
   0x3   :  { %4403 = sst [smem:[#allocation14_spill]] %s4381_s5 }
   0x4   :  { %19 = vsyncpa [#allocation3], 0 }
   0x5   :  { %21 = vsyncpa [#allocation3 + $0x1], 0 }
   0x6   :  { %22 = vsyncpa [#allocation5], 0 }
   0x7   :  { %24 = vsyncpa [#allocation5 + $0x1], 0  ;;  %s3534_s25 = smov 0   ;;  %s3536_s26 = smov 0  }
   0x8   :  { %s3538_s27 = smov 0   ;;  %s3540_s28 = smov 0  }
   0x9   :  { %s3542_s29 = smov 0   ;;  %s3544_s30 = smov 0  }
   0xa LB: > { %4404 = sst [smem:[#allocation8_spill]] %s3436_s27  ;;  %s2623_s14 = sadd.s32 4294967295, %s3448_s30   ;;  %s3448_s30 = sphi %s3544_s30, %s30_s30   ;;  %s3444_s29 = sphi %s3542_s29, %s4425_s29   ;;  %s3440_s28 = sphi %s3540_s28, %s4421_s28   ;;  %s3436_s27 = sphi %s3538_s27, %s4420_s27   ;;  %s3432_s26 = sphi %s3536_s26, %s4424_s26   ;;  %s3428_s25 = sphi %s3534_s25, %s4423_s25  }
   0xb   : > { %4405 = sst [smem:[#allocation9_spill]] %s3444_s29  ;;  %s2624_s15 = sadd.s32 4294967294, %s3448_s30  }
   0xc   : > { %s42_s16 = sadd.s32 1, %s3444_s29  ;;  %s327_s17 = sadd.s32 1, %s3436_s27 }
   0xd   : > { %p44_p0 = scmp.ge.s32.totalorder %s42_s16, 2  ;;  %p337_p1 = scmp.ne.s32.totalorder %s3436_s27, %s3432_s26 }
   0xe   : > { %p338_p2 = scmp.eq.s32.totalorder %s2623_s14, 1  ;;  %p343_p3 = scmp.ne.s32.totalorder %s3432_s26, %s3428_s25 }
   0xf   : > { %s4427_s16 = smov (%p44_p0, %s42_s16), 0  ;;  %p344_p5 = scmp.eq.s32.totalorder %s2624_s15, 1 }
  0x10   : > { %4406 = sst [smem:[#allocation10_spill]] %s4427_s16  ;;  %p3574_p4 = por %p338_p2, %p337_p1 }
  0x11   : > { %s322_s19 = ssub.s32 %s3444_s29, %s4427_s16  ;;  %p2627_p6 = scmp.ge.s32.totalorder %s3448_s30, 1 }
  0x12   : > { %p325_p7 = scmp.eq.s32.totalorder %s322_s19, 0  ;;  %p3581_p8 = por %p344_p5, %p343_p3 }
  0x13   : > { %p456_p9 = scmp.lt.s32.totalorder %s3448_s30, 3 }
  0x14   : > { %s3587_s21 = scalar_select %p325_p7, %s3436_s27, %s327_s17  }
  0x15   : > { %p457_p10 = pnand %p2627_p6, %p456_p9 }
  0x16   : > { %4409 = sst [smem:[#allocation11_spill]] %s3587_s21  ;;  %s4410_s4 = sld [smem:[#allocation13_spill]] (!%p457_p10)  ;;  %v739_v6 = vld [vmem:[%s4382_s6] sm:$0xff] (!%p457_p10)  ;;  %v740_v7 = vld [vmem:[%s4382_s6 + $0x8] sm:$0xff] (!%p457_p10)  ;;  %vm572_vm0 = vcmask (!%p457_p10), 261120   ;;  %v741_v16 = vld [vmem:[%s4382_s6 + $0x10] sm:$0xff] (!%p457_p10) }
  0x17   : > { %460 = sbr.rel (%p457_p10) target bundleno = 1795 (0x703), region = 68  ;;  %p529_p11 = scmp.lt.s32.totalorder (!%p457_p10), %s3440_s28, 1  ;;  %v3060_v14 = vpack.c.bf16 (!%p457_p10), %v740_v7, %v739_v6  ;;  %v742_v17 = vld [vmem:[%s4382_s6 + $0x18] sm:$0xff] (!%p457_p10)  ;;  %vm937_vm1 = vcmask (!%p457_p10), 64512   ;;  %v824_v33 = vld [vmem:[%s4383_s7] sm:$0xff] (!%p457_p10)  ;;  %v825_v34 = vld [vmem:[%s4383_s7 + $0x8] sm:$0xff] (!%p457_p10) }
  0x18   : > { %s4411_s5 = sld [smem:[#allocation14_spill]] (!%p457_p10)  ;;  %s4412_s0 = sld [smem:[#allocation12_spill]] (!%p457_p10)  ;;  %v3064_v20 = vpack.c.bf16 (!%p457_p10), %v742_v17, %v741_v16  ;;  %vm3669_vm2 = vmpackc.low (!%p457_p10), %vm937_vm1, %vm937_vm1  ;;  %v826_v35 = vld [vmem:[%s4383_s7 + $0x10] sm:$0xff] (!%p457_p10)  ;;  %v3068_v36 = vpack.c.bf16 (!%p457_p10), %v825_v34, %v824_v33  ;;  %v827_v37 = vld [vmem:[%s4383_s7 + $0x18] sm:$0xff] (!%p457_p10)  ;;  %vm1121_vm3 = vcmask (!%p457_p10), 130048   ;;  %vm2147_vm4 = vcmask (!%p457_p10), 195584  }
  0x19   : > { %s4393_s23 = smov (!%p457_p10), 120   ;;  %v3072_v39 = vpack.c.bf16 (!%p457_p10), %v827_v37, %v826_v35  ;;  %s3455_s14 = smov (!%p457_p10), 16   ;;  %vm2152_vm5 = vcmask (!%p457_p10), 326656   ;;  %vm2155_vm6 = vcmask (!%p457_p10), 392192   ;;  %vm2158_vm7 = vcmask (!%p457_p10), 457728  }
  0x1a   : > { %s3456_s15 = smov (!%p457_p10), 24   ;;  %s4397_s19 = smov (!%p457_p10), 48   ;;  %vm2246_vm8 = vcmask (!%p457_p10), 523264  }
  0x1b   : > { %s4395_s16 = smov (!%p457_p10), 56  }
  0x1c   : > { %v568_v0 = vld [vmem:[%s4410_s4] sm:$0xff] (!%p457_p10)  ;;  %v569_v1 = vld [vmem:[%s4410_s4 + $0x8] sm:$0xff] (!%p457_p10)  ;;  %v570_v2 = vld [vmem:[%s4410_s4 + $0x10] sm:$0xff] (!%p457_p10) }
  0x1d   : > { %v3044_v3 = vpack.c.bf16 (!%p457_p10), %v569_v1, %v568_v0  ;;  %v571_v4 = vld [vmem:[%s4410_s4 + $0x18] sm:$0xff] (!%p457_p10)  ;;  %s3457_s4 = smov (!%p457_p10), 32  }
  0x1e   : > { %v3048_v5 = vpack.c.bf16 %v571_v4, %v570_v2  ;;  %s530_s29 = scalar_select %p529_p11, %s3440_s28, 1  ;;  %v654_v8 = vld [vmem:[%s4411_s5] sm:$0xff]  ;;  %v655_v9 = vld [vmem:[%s4411_s5 + $0x8] sm:$0xff]  ;;  %v656_v10 = vld [vmem:[%s4411_s5 + $0x10] sm:$0xff] }
  0x1f   : > { %3045 = vmatprep.subr.bf16.mxu0 %v3044_v3  ;;  %v657_v11 = vld [vmem:[%s4411_s5 + $0x18] sm:$0xff]  ;;  %v3052_v12 = vpack.c.bf16 %v655_v9, %v654_v8  ;;  %s3450_s5 = smov 112  }
  0x20   : > { %3047 = vmatpush3.bf16.msra.mxu0 %v3044_v3  ;;  %s3621_s27 = sshll.u32 %s530_s29, 4  ;;  %v3056_v13 = vpack.c.bf16 %v657_v11, %v656_v10  ;;  %s3458_s29 = smov 40  }
  0x21   : > { %3049 = vmatprep.subr.bf16.mxu0 %v3048_v5  ;;  %s536_s24 = scalar_lea.vmem %s4412_s0, %s3621_s27  ;;  %3053 = vmatprep.subr.bf16.mxu1 %v3052_v12  ;;  %s552_s17 = scalar_lea.vmem %s4378_s2, %s3621_s27 }
  0x22   : > { %v560_v15 = vld [vmem:[%s536_s24] sm:$0xff]  ;;  %s546_s21 = scalar_lea.vmem %s4377_s1, %s3621_s27  ;;  %3055 = vmatpush3.bf16.msra.mxu1 %v3052_v12  ;;  %v561_v19 = vld [vmem:[%s536_s24 + $0x8] sm:$0xff]  ;;  %s3452_s24 = smov 104  }
  0x23   : > { %2858 = vmatprep.mubr.msk.f32.mxu0 %vm572_vm0, %v560_v15  ;;  %v562_v18 = vld [vmem:[%s546_s21] sm:$0xff]  ;;  %3057 = vmatprep.subr.bf16.mxu1 %v3056_v13  ;;  %v563_v22 = vld [vmem:[%s546_s21 + $0x8] sm:$0xff]  ;;  %s557_s21 = scalar_lea.vmem %s4379_s3, %s3621_s27  ;;  %s4415_s27 = smov 120  }
  0x24   : > { %3051 = vmatpush3.bf16.msra.mxu0 %v3048_v5  ;;  %v564_v21 = vld [vmem:[%s552_s17] sm:$0xff]  ;;  %2869 = vmatprep.mubr.msk.f32.mxu1 %vm572_vm0, %v562_v18  ;;  %v565_v23 = vld [vmem:[%s552_s17 + $0x8] sm:$0xff] }
  0x25   : > { %3061 = vmatprep.subr.bf16.mxu0 %v3060_v14  ;;  %v566_v38 = vld [vmem:[%s557_s21] sm:$0xff]  ;;  %v567_v40 = vld [vmem:[%s557_s21 + $0x8] sm:$0xff] }
  0x26   : > { %3059 = vmatpush3.bf16.msra.mxu1 %v3056_v13 }
  0x27   : > { %2859 = vmatmul.mubr.msk.f32.vlgmr.msra.gmra.mrb[0].mxu0 %vm572_vm0, %v561_v19  ;;  %3069 = vmatprep.subr.bf16.mxu1 %v3068_v36 }
  0x28   : > { %3063 = vmatpush3.bf16.msra.mxu0 %v3060_v14  ;;  %2880 = vmatprep.mubr.msk.f32.mxu0 %vm572_vm0, %v564_v21 }
  0x29   : > { %3065 = vmatprep.subr.bf16.mxu0 %v3064_v20  ;;  %2870 = vmatmul.mubr.msk.f32.vlgmr.msra.gmra.mrb[0].mxu1 %vm572_vm0, %v563_v22 }
  0x2a   : > { %2891 = vmatprep.mubr.msk.f32.mxu1 %vm572_vm0, %v566_v38  ;;  %3071 = vmatpush3.bf16.msra.mxu1 %v3068_v36 }
  0x2b   : > { %3073 = vmatprep.subr.bf16.mxu1 %v3072_v39 }
  0x2c   : > { %3067 = vmatpush3.bf16.msra.mxu0 %v3064_v20 }
  0x2e   : > { %3075 = vmatpush3.bf16.msra.mxu1 %v3072_v39 }
  0x2f   : > { %2881 = vmatmul.mubr.msk.f32.vlgmr.msra.gmra.mrb[2].mxu0 %vm572_vm0, %v565_v23 }
  0x31   : > { %2892 = vmatmul.mubr.msk.f32.vlgmr.msra.gmra.mrb[2].mxu1 %vm572_vm0, %v567_v40 }
  0xfa   : > { %v3647_v24 = vpop.f32.mrb[0].mxu0 }
  0xfb   : > { %v3649_v25 = vpop.f32.mrb[1].mxu0 }
  0xfc   : > { %915 = vrot.lane.b32.xlu1 %v3649_v25, %s3450_s5  ;;  %911 = vrot.lane.b32.xlu0 %v3649_v25, %s4393_s23  ;;  %v3656_v26 = vpop.f32.mrb[0].mxu1 }
  0xfd   : > { %2898 = vmatprep.mubr.msk.f32.mxu0 %vm937_vm1, %v3649_v25  ;;  %v3658_v27 = vpop.f32.mrb[1].mxu1 }
 0x100   : > { %917 = vrot.lane.b32.xlu1 %v3647_v24, %s3450_s5  ;;  %913 = vrot.lane.b32.xlu0 %v3647_v24, %s4393_s23 }
 0x102   : > { %v3663_v28 = vpop.f32.mrb[2].mxu0 }
 0x103   : > { %v3665_v29 = vpop.f32.mrb[3].mxu0 }
 0x104   : > { %v3200_v31 = vpack.i.bf16 %v3663_v28, %v3665_v29  ;;  %v3076_v32 = vpack.c.bf16 %v3663_v28, %v3665_v29  ;;  %921 = vrot.lane.b32.xlu1 %v3647_v24, %s3452_s24  ;;  %919 = vrot.lane.b32.xlu0 %v3649_v25, %s3452_s24 }
 0x106   : > { %3078 = vmatprep.subr.msk.bf16.mxu0 %vm3669_vm2, %v3076_v32 }
 0x107   : > { %3081 = vmatpush3.bf16.xpose.msk.msra.mxu0 %vm3669_vm2, %v3076_v32 }
 0x108   : > { %927 = vrot.lane.b32.xlu1 %v3656_v26, %s4393_s23  ;;  %925 = vrot.lane.b32.xlu0 %v3658_v27, %s4393_s23  ;;  %s3453_s23 = smov 96  }
 0x10c   : > { %931 = vrot.lane.b32.xlu1 %v3656_v26, %s3450_s5  ;;  %929 = vrot.lane.b32.xlu0 %v3658_v27, %s3450_s5 }
 0x10e   : > { %2899 = vmatmul.mubr.msk.f32.vlgmr.msra.gmra.mrb[4].mxu0 %vm937_vm1, %v3647_v24 }
 0x110   : > { %935 = vrot.lane.b32.xlu1 %v3656_v26, %s3452_s24  ;;  %933 = vrot.lane.b32.xlu0 %v3658_v27, %s3452_s24  ;;  %s4399_s24 = smov 8  }
 0x16e   : > { %v3710_v41 = vpop.permute.xlu1 %915  ;;  %v3712_v42 = vpop.permute.xlu0 %911 }
 0x16f   : > { %2901 = vmatprep.mubr.msk.f32.mxu0 %vm937_vm1, %v3712_v42 }
 0x172   : > { %v3717_v43 = vpop.permute.xlu0 %913  ;;  %v3721_v44 = vpop.permute.xlu1 %917 }
 0x173   : > { %2902 = vmatmul.mubr.msk.f32.gmra.mrb[6].mxu0 %vm937_vm1, %v3717_v43 }
 0x174   : > { %2904 = vmatprep.mubr.msk.f32.mxu0 %vm937_vm1, %v3710_v41 }
 0x176   : > { %v3725_v45 = vpop.permute.xlu0 %919  ;;  %v3731_v46 = vpop.permute.xlu1 %921 }
 0x177   : > { %2905 = vmatmul.mubr.msk.f32.gmra.mrb[8].mxu0 %vm937_vm1, %v3721_v44 }
 0x178   : > { %2907 = vmatprep.mubr.msk.f32.mxu0 %vm937_vm1, %v3725_v45 }
 0x17a   : > { %v3735_v47 = vpop.permute.xlu0 %925  ;;  %v3739_v48 = vpop.permute.xlu1 %927 }
 0x17b   : > { %2908 = vmatmul.mubr.msk.f32.gmra.mrb[10].mxu0 %vm937_vm1, %v3731_v46 }
 0x17c   : > { %2910 = vmatprep.mubr.msk.f32.mxu0 %vm937_vm1, %v3658_v27 }
 0x17e   : > { %v3745_v49 = vpop.permute.xlu0 %929  ;;  %v3749_v50 = vpop.permute.xlu1 %931 }
 0x17f   : > { %2911 = vmatmul.mubr.msk.f32.gmra.mrb[12].mxu0 %vm937_vm1, %v3656_v26 }
 0x180   : > { %2913 = vmatprep.mubr.msk.f32.mxu0 %vm937_vm1, %v3735_v47 }
 0x182   : > { %v3753_v51 = vpop.permute.xlu0 %933  ;;  %v3759_v52 = vpop.permute.xlu1 %935 }
 0x183   : > { %2914 = vmatmul.mubr.msk.f32.gmra.mrb[14].mxu0 %vm937_vm1, %v3739_v48 }
 0x184   : > { %2916 = vmatprep.mubr.msk.f32.mxu0 %vm937_vm1, %v3745_v49 }
 0x187   : > { %2917 = vmatmul.mubr.msk.f32.gmra.mrb[16].mxu0 %vm937_vm1, %v3749_v50 }
 0x188   : > { %2919 = vmatprep.mubr.msk.f32.mxu0 %vm937_vm1, %v3753_v51 }
 0x18b   : > { %2920 = vmatmul.mubr.msk.f32.gmra.mrb[18].mxu0 %vm937_vm1, %v3759_v52 }
 0x1e1   : > { %v3763_v53 = vpop.f32.mrb[4].mxu0 }
 0x1e2   : > { %v1042_v54 = vpop.f32.mrb[5].mxu0  ;;  %v1125_v55 = vsel %vm1121_vm3, %v3763_v53, -inf }
 0x1e3   : > { %1126 = vmax.xlane.f32.xlu1 %v1125_v55  ;;  %v1122_v56 = vsel %vm1121_vm3, %v1042_v54, -inf }
 0x1e4   : > { %1123 = vmax.xlane.f32.xlu0 %v1122_v56 }
 0x246   : > { %v3768_v57 = vpop.f32.mrb[6].mxu0 }
 0x247   : > { %v3770_v58 = vpop.f32.mrb[7].mxu0  ;;  %v1131_v59 = vsel %vm1121_vm3, %v3768_v57, -inf }
 0x248   : > { %1132 = vmax.xlane.f32.xlu0 %v1131_v59  ;;  %v1128_v62 = vsel %vm1121_vm3, %v3770_v58, -inf }
 0x24a   : > { %v3774_v60 = vpop.f32.mrb[8].mxu0 }
 0x24b   : > { %v3776_v61 = vpop.f32.mrb[9].mxu0  ;;  %v1137_v2 = vsel %vm1121_vm3, %v3774_v60, -inf }
 0x24c   : > { %1129 = vmax.xlane.f32.xlu0 %v1128_v62  ;;  %v1134_v63 = vsel %vm1121_vm3, %v3776_v61, -inf }
 0x24d   : > { %1135 = vmax.xlane.f32.xlu1 %v1134_v63 }
 0x24e   : > { %v3782_v0 = vpop.f32.mrb[10].mxu0 }
 0x24f   : > { %v3784_v1 = vpop.f32.mrb[11].mxu0  ;;  %v1143_v6 = vsel %vm1121_vm3, %v3782_v0, -inf }
 0x250   : > { %1138 = vmax.xlane.f32.xlu0 %v1137_v2  ;;  %v1140_v3 = vsel %vm1121_vm3, %v3784_v1, -inf }
 0x251   : > { %1141 = vmax.xlane.f32.xlu1 %v1140_v3 }
 0x252   : > { %v3790_v4 = vpop.f32.mrb[12].mxu0 }
 0x253   : > { %v3792_v5 = vpop.f32.mrb[13].mxu0  ;;  %v1149_v10 = vsel %vm1121_vm3, %v3790_v4, -inf }
 0x254   : > { %1144 = vmax.xlane.f32.xlu0 %v1143_v6  ;;  %v1146_v7 = vsel %vm1121_vm3, %v3792_v5, -inf }
 0x255   : > { %1147 = vmax.xlane.f32.xlu1 %v1146_v7 }
 0x256   : > { %v3798_v8 = vpop.f32.mrb[14].mxu0 }
 0x257   : > { %v3800_v9 = vpop.f32.mrb[15].mxu0  ;;  %v1155_v14 = vsel %vm1121_vm3, %v3798_v8, -inf }
 0x258   : > { %1150 = vmax.xlane.f32.xlu0 %v1149_v10  ;;  %v1152_v11 = vsel %vm1121_vm3, %v3800_v9, -inf }
 0x259   : > { %1153 = vmax.xlane.f32.xlu1 %v1152_v11 }
 0x25a   : > { %v3806_v12 = vpop.f32.mrb[16].mxu0 }
 0x25b   : > { %v3808_v13 = vpop.f32.mrb[17].mxu0  ;;  %v1161_v15 = vsel %vm1121_vm3, %v3806_v12, -inf }
 0x25c   : > { %1156 = vmax.xlane.f32.xlu0 %v1155_v14  ;;  %v1158_v18 = vsel %vm1121_vm3, %v3808_v13, -inf }
 0x25d   : > { %1162 = vmax.xlane.f32.xlu1 %v1161_v15 }
 0x25e   : > { %v3814_v16 = vpop.f32.mrb[18].mxu0 }
 0x25f   : > { %v3816_v17 = vpop.f32.mrb[19].mxu0  ;;  %v1167_v19 = vsel %vm1121_vm3, %v3814_v16, -inf }
 0x260   : > { %v1164_v20 = vsel %vm1121_vm3, %v3816_v17, -inf }
 0x261   : > { %1159 = vmax.xlane.f32.xlu1 %v1158_v18 }
 0x265   : > { %1168 = vmax.xlane.f32.xlu1 %v1167_v19 }
 0x269   : > { %1165 = vmax.xlane.f32.xlu1 %v1164_v20 }
 0x271   : > { %v1124_v21 = vpop.xlane.xlu0 %1123 }
 0x272   : > { %v1170_v22 = vsub.f32 %v1042_v54, %v1124_v21  ;;  %3201 = vrot.lane.b32.xlu0 %v3200_v31, %s4415_s27  ;;  %v1127_v31 = vpop.xlane.xlu1 %1126 }
 0x273   : > { %v1171_v38 = vsub.f32 %v3763_v53, %v1127_v31 }
 0x274   : > { %v1186_v23 = vmul.f32 1.442695, %v1170_v22 }
 0x276   : > { %3210 = vpow2.f32 %v1186_v23  ;;  %1499 = vrot.lane.b32.xlu0 %v3656_v26, %s3453_s23  ;;  %v3841_v26 = vpop.f32.mrb[2].mxu1 }
 0x27a   : > { %1501 = vrot.lane.b32.xlu0 %v3735_v47, %s3453_s23  ;;  %1497 = vrot.lane.b32.xlu1 %v3658_v27, %s3453_s23  ;;  %v3843_v27 = vpop.f32.mrb[3].mxu1 }
 0x27b   : > { %v3205_v28 = vpack.i.bf16 %v3841_v26, %v3843_v27  ;;  %v3849_v29 = vpack.c.bf16 %v3841_v26, %v3843_v27 }
 0x27e   : > { %1503 = vrot.lane.b32.xlu0 %v3739_v48, %s3453_s23  ;;  %1505 = vrot.lane.b32.xlu1 %v3745_v49, %s3453_s23 }
 0x280   : > { %v3833_v32 = vpop.eup %3210 }
 0x281   : > { %2926 = vmatprep.mubr.msk.f32.mxu1 %vm1121_vm3, %v3833_v32 }
 0x282   : > { %1507 = vrot.lane.b32.xlu0 %v3749_v50, %s3453_s23  ;;  %1509 = vrot.lane.b32.xlu1 %v3753_v51, %s3453_s23 }
 0x286   : > { %1511 = vrot.lane.b32.xlu0 %v3759_v52, %s3453_s23  ;;  %1513 = vrot.lane.b32.xlu1 %v3649_v25, %s3453_s23 }
 0x28a   : > { %1515 = vrot.lane.b32.xlu0 %v3647_v24, %s3453_s23  ;;  %1517 = vrot.lane.b32.xlu1 %v3712_v42, %s3453_s23  ;;  %v1188_v42 = vmul.f32 1.442695, %v1171_v38 }
 0x28c   : > { %3212 = vpow2.f32 %v1188_v42 }
 0x28e   : > { %1519 = vrot.lane.b32.xlu0 %v3717_v43, %s3453_s23  ;;  %1521 = vrot.lane.b32.xlu1 %v3710_v41, %s3453_s23 }
 0x292   : > { %1523 = vrot.lane.b32.xlu0 %v3721_v44, %s3453_s23  ;;  %1525 = vrot.lane.b32.xlu1 %v3725_v45, %s3453_s23 }
 0x296   : > { %1527 = vrot.lane.b32.xlu0 %v3731_v46, %s3453_s23 }
 0x2d5   : > { %v1133_v25 = vpop.xlane.xlu0 %1132 }
 0x2d6   : > { %v1173_v43 = vsub.f32 %v3768_v57, %v1133_v25 }
 0x2d8   : > { %v1192_v48 = vmul.f32 1.442695, %v1173_v43 }
 0x2d9   : > { %v1130_v33 = vpop.xlane.xlu0 %1129 }
 0x2da   : > { %v1136_v34 = vpop.xlane.xlu1 %1135  ;;  %v1172_v39 = vsub.f32 %v3770_v58, %v1130_v33 }
 0x2db   : > { %v1174_v45 = vsub.f32 %v3776_v61, %v1136_v34 }
 0x2dc   : > { %v1190_v44 = vmul.f32 1.442695, %v1172_v39 }
 0x2dd   : > { %v1139_v35 = vpop.xlane.xlu0 %1138  ;;  %v1194_v50 = vmul.f32 1.442695, %v1174_v45 }
 0x2de   : > { %v1142_v36 = vpop.xlane.xlu1 %1141  ;;  %v1175_v49 = vsub.f32 %v3774_v60, %v1139_v35  ;;  %3214 = vpow2.f32 %v1190_v44 }
 0x2df   : > { %v1176_v51 = vsub.f32 %v3784_v1, %v1142_v36  ;;  %3216 = vpow2.f32 %v1192_v48 }
 0x2e0   : > { %v1196_v56 = vmul.f32 1.442695, %v1175_v49  ;;  %3218 = vpow2.f32 %v1194_v50 }
 0x2e1   : > { %v1145_v37 = vpop.xlane.xlu0 %1144  ;;  %v1198_v58 = vmul.f32 1.442695, %v1176_v51 }
 0x2e2   : > { %v1148_v24 = vpop.xlane.xlu1 %1147  ;;  %v1177_v57 = vsub.f32 %v3782_v0, %v1145_v37  ;;  %3220 = vpow2.f32 %v1196_v56  ;;  %v3871_v0 = vpop.eup %3212 }
 0x2e3   : > { %v1178_v59 = vsub.f32 %v3792_v5, %v1148_v24  ;;  %3222 = vpow2.f32 %v1198_v58 }
 0x2e4   : > { %v1200_v60 = vmul.f32 1.442695, %v1177_v57 }
 0x2e5   : > { %v1151_v40 = vpop.xlane.xlu0 %1150  ;;  %v1202_v1 = vmul.f32 1.442695, %v1178_v59 }
 0x2e6   : > { %v1154_v41 = vpop.xlane.xlu1 %1153  ;;  %v1179_v62 = vsub.f32 %v3790_v4, %v1151_v40  ;;  %3224 = vpow2.f32 %v1200_v60 }
 0x2e7   : > { %v1180_v2 = vsub.f32 %v3800_v9, %v1154_v41  ;;  %3226 = vpow2.f32 %v1202_v1 }
 0x2e8   : > { %v3873_v3 = vpop.eup %3214  ;;  %v1204_v5 = vmul.f32 1.442695, %v1179_v62 }
 0x2e9   : > { %v1157_v46 = vpop.xlane.xlu0 %1156  ;;  %v1206_v6 = vmul.f32 1.442695, %v1180_v2  ;;  %v3881_v9 = vpop.eup %3216 }
 0x2ea   : > { %v1163_v47 = vpop.xlane.xlu1 %1162  ;;  %v1181_v4 = vsub.f32 %v3798_v8, %v1157_v46  ;;  %v3883_v11 = vpop.eup %3218  ;;  %3228 = vpow2.f32 %v1204_v5 }
 0x2eb   : > { %v1183_v15 = vsub.f32 %v3806_v12, %v1163_v47  ;;  %3230 = vpow2.f32 %v1206_v6 }
 0x2ec   : > { %v1208_v14 = vmul.f32 1.442695, %v1181_v4 }
 0x2ed   : > { %v3202_v52 = vpop.permute.xlu0 %3201  ;;  %v1212_v12 = vmul.f32 1.442695, %v1183_v15 }
 0x2ee   : > { %v3204_v53 = vunpack.i.h.bf16 %v3202_v52  ;;  %v3203_v54 = vunpack.i.l.bf16 %v3202_v52  ;;  %v1160_v55 = vpop.xlane.xlu1 %1159  ;;  %3232 = vpow2.f32 %v1208_v14 }
 0x2ef   : > { %v1182_v7 = vsub.f32 %v3808_v13, %v1160_v55  ;;  %v3894_v13 = vpop.eup %3220 }
 0x2f0   : > { %v3082_v61 = vpack.c.bf16 %v3204_v53, %v3203_v54  ;;  %v3896_v19 = vpop.eup %3222 }
 0x2f1   : > { %v1210_v8 = vmul.f32 1.442695, %v1182_v7  ;;  %v3903_v21 = vpop.eup %3224  ;;  %v1500_v30 = vpop.permute.xlu0 %1499  ;;  %v1236_v26 = vsel %vm1121_vm3, %v3896_v19, 0.0 }
 0x2f2   : > { %3083 = vmatprep.subr.bf16.mxu1 %v3082_v61  ;;  %v1169_v63 = vpop.xlane.xlu1 %1168  ;;  %v3905_v22 = vpop.eup %3226  ;;  %v1239_v27 = vsel %vm1121_vm3, %v3903_v21, 0.0 }
 0x2f3   : > { %3085 = vmatpush3.bf16.msra.mxu1 %v3082_v61  ;;  %v1185_v20 = vsub.f32 %v3814_v16, %v1169_v63  ;;  %3234 = vpow2.f32 %v1210_v8 }
 0x2f4   : > { %3088 = vmatprep.subr.msk.bf16.mxu1 %vm3669_vm2, %v3849_v29  ;;  %3236 = vpow2.f32 %v1212_v12  ;;  %v3911_v16 = vpop.eup %3228 }
 0x2f5   : > { %v1216_v23 = vmul.f32 1.442695, %v1185_v20  ;;  %v1502_v25 = vpop.permute.xlu0 %1501 }
 0x2f6   : > { %2927 = vmatmul.mubr.msk.f32.vlgmr.msra.gmra.mrb[4].mxu1 %vm1121_vm3, %v3871_v0  ;;  %v1166_v10 = vpop.xlane.xlu1 %1165 }
 0x2f7   : > { %2929 = vmatprep.mubr.msk.f32.mxu1 %vm1121_vm3, %v3873_v3  ;;  %v1184_v18 = vsub.f32 %v3816_v17, %v1166_v10 }
 0x2f9   : > { %v1214_v17 = vmul.f32 1.442695, %v1184_v18  ;;  %v1504_v36 = vpop.permute.xlu0 %1503 }
 0x2fa   : > { %2930 = vmatmul.mubr.msk.f32.gmra.mrb[6].mxu1 %vm1121_vm3, %v3881_v9  ;;  %v1498_v34 = vpop.permute.xlu1 %1497 }
 0x2fb   : > { %2932 = vmatprep.mubr.msk.f32.mxu1 %vm1121_vm3, %v3883_v11  ;;  %3238 = vpow2.f32 %v1214_v17 }
 0x2fc   : > { %3091 = vmatpush3.bf16.xpose.msk.msra.mxu1 %vm3669_vm2, %v3849_v29  ;;  %v3913_v29 = vpop.eup %3230  ;;  %3240 = vpow2.f32 %v1216_v23 }
 0x2fd   : > { %v3919_v31 = vpop.eup %3232  ;;  %v1508_v39 = vpop.permute.xlu0 %1507 }
 0x2fe   : > { %2933 = vmatmul.mubr.msk.f32.gmra.mrb[8].mxu1 %vm1121_vm3, %v3894_v13  ;;  %v3921_v33 = vpop.eup %3234  ;;  %v1506_v24 = vpop.permute.xlu1 %1505 }
 0x2ff   : > { %2935 = vmatprep.mubr.msk.f32.mxu1 %vm1121_vm3, %v3896_v19  ;;  %v3927_v35 = vpop.eup %3236  ;;  %v1248_v19 = vsel %vm1121_vm3, %v3913_v29, 0.0 }
 0x301   : > { %v1512_v41 = vpop.permute.xlu0 %1511 }
 0x302   : > { %2936 = vmatmul.mubr.msk.f32.gmra.mrb[10].mxu1 %vm1121_vm3, %v3903_v21  ;;  %v1510_v40 = vpop.permute.xlu1 %1509  ;;  %v1218_v21 = vsel %vm1121_vm3, %v3833_v32, 0.0 }
 0x303   : > { %2938 = vmatprep.mubr.msk.f32.mxu1 %vm1121_vm3, %v3905_v22 }
 0x305   : > { %v3929_v37 = vpop.eup %3238  ;;  %v1516_v43 = vpop.permute.xlu0 %1515 }
 0x306   : > { %2939 = vmatmul.mubr.msk.f32.gmra.mrb[12].mxu1 %vm1121_vm3, %v3911_v16  ;;  %v3935_v38 = vpop.eup %3240  ;;  %v1514_v42 = vpop.permute.xlu1 %1513 }
 0x307   : > { %2941 = vmatprep.mubr.msk.f32.mxu1 %vm1121_vm3, %v3913_v29 }
 0x309   : > { %v1520_v45 = vpop.permute.xlu0 %1519 }
 0x30a   : > { %2942 = vmatmul.mubr.msk.f32.gmra.mrb[14].mxu1 %vm1121_vm3, %v3919_v31  ;;  %v1518_v44 = vpop.permute.xlu1 %1517 }
 0x30b   : > { %2944 = vmatprep.mubr.msk.f32.mxu1 %vm1121_vm3, %v3921_v33 }
 0x30d   : > { %v1524_v47 = vpop.permute.xlu0 %1523 }
 0x30e   : > { %2945 = vmatmul.mubr.msk.f32.gmra.mrb[16].mxu1 %vm1121_vm3, %v3927_v35  ;;  %v1522_v46 = vpop.permute.xlu1 %1521 }
 0x30f   : > { %2947 = vmatprep.mubr.msk.f32.mxu1 %vm1121_vm3, %v3929_v37 }
 0x311   : > { %v1528_v49 = vpop.permute.xlu0 %1527 }
 0x312   : > { %2948 = vmatmul.mubr.msk.f32.gmra.mrb[18].mxu1 %vm1121_vm3, %v3935_v38  ;;  %v1526_v48 = vpop.permute.xlu1 %1525 }
 0x313   : > { %2954 = vmatprep.mubr.msk.f32.mxu1 %vm937_vm1, %v1498_v34 }
 0x316   : > { %2955 = vmatmul.mubr.msk.f32.vlgmr.msra.gmra.mrb[20].mxu1 %vm937_vm1, %v1500_v30 }
 0x317   : > { %2957 = vmatprep.mubr.msk.f32.mxu1 %vm937_vm1, %v1502_v25 }
 0x31a   : > { %2958 = vmatmul.mubr.msk.f32.gmra.mrb[22].mxu1 %vm937_vm1, %v1504_v36 }
 0x31b   : > { %2960 = vmatprep.mubr.msk.f32.mxu1 %vm937_vm1, %v1506_v24 }
 0x31e   : > { %2961 = vmatmul.mubr.msk.f32.gmra.mrb[24].mxu1 %vm937_vm1, %v1508_v39 }
 0x31f   : > { %2963 = vmatprep.mubr.msk.f32.mxu1 %vm937_vm1, %v1510_v40 }
 0x322   : > { %2964 = vmatmul.mubr.msk.f32.gmra.mrb[26].mxu1 %vm937_vm1, %v1512_v41 }
 0x323   : > { %2966 = vmatprep.mubr.msk.f32.mxu1 %vm937_vm1, %v1514_v42 }
 0x326   : > { %2967 = vmatmul.mubr.msk.f32.gmra.mrb[28].mxu1 %vm937_vm1, %v1516_v43 }
 0x327   : > { %2969 = vmatprep.mubr.msk.f32.mxu1 %vm937_vm1, %v1518_v44 }
 0x32a   : > { %2970 = vmatmul.mubr.msk.f32.gmra.mrb[30].mxu1 %vm937_vm1, %v1520_v45 }
 0x32b   : > { %2972 = vmatprep.mubr.msk.f32.mxu1 %vm937_vm1, %v1522_v46 }
 0x32e   : > { %2973 = vmatmul.mubr.msk.f32.gmra.mrb[32].mxu1 %vm937_vm1, %v1524_v47 }
 0x32f   : > { %2975 = vmatprep.mubr.msk.f32.mxu1 %vm937_vm1, %v1526_v48 }
 0x332   : > { %2976 = vmatmul.mubr.msk.f32.gmra.mrb[34].mxu1 %vm937_vm1, %v1528_v49 }
 0x3c9   : > { %v3955_v50 = vpop.f32.mrb[4].mxu1 }
 0x3ca   : > { %v3957_v51 = vpop.f32.mrb[5].mxu1 }
 0x3cd   : > { %v3959_v52 = vpop.f32.mrb[6].mxu1 }
 0x3ce   : > { %v3961_v53 = vpop.f32.mrb[7].mxu1 }
 0x3d1   : > { %v3963_v54 = vpop.f32.mrb[8].mxu1 }
 0x3d2   : > { %v3965_v55 = vpop.f32.mrb[9].mxu1 }
 0x3d5   : > { %v3967_v56 = vpop.f32.mrb[10].mxu1 }
 0x3d6   : > { %v3969_v57 = vpop.f32.mrb[11].mxu1 }
 0x3d9   : > { %v3971_v58 = vpop.f32.mrb[12].mxu1 }
 0x3da   : > { %v3973_v59 = vpop.f32.mrb[13].mxu1 }
 0x3dd   : > { %v3975_v61 = vpop.f32.mrb[14].mxu1 }
 0x3de   : > { %v3977_v60 = vpop.f32.mrb[15].mxu1 }
 0x3e1   : > { %v3979_v62 = vpop.f32.mrb[16].mxu1 }
 0x3e2   : > { %v3981_v63 = vpop.f32.mrb[17].mxu1 }
 0x3e5   : > { %v3983_v1 = vpop.f32.mrb[18].mxu1 }
 0x3e6   : > { %v3985_v2 = vpop.f32.mrb[19].mxu1 }
 0x3e9   : > { %v3987_v5 = vpop.f32.mrb[20].mxu1 }
 0x3ea   : > { %v3989_v4 = vpop.f32.mrb[21].mxu1  ;;  %v1715_v6 = vsel %vm1121_vm3, %v3987_v5, -inf }
 0x3eb   : > { %1716 = vmax.xlane.f32.xlu0 %v1715_v6  ;;  %v1712_v7 = vsel %vm1121_vm3, %v3989_v4, -inf }
 0x3ec   : > { %1713 = vmax.xlane.f32.xlu1 %v1712_v7 }
 0x3ed   : > { %v3995_v10 = vpop.f32.mrb[22].mxu1 }
 0x3ee   : > { %v3997_v14 = vpop.f32.mrb[23].mxu1  ;;  %v1721_v15 = vsel %vm1121_vm3, %v3995_v10, -inf }
 0x3ef   : > { %v1718_v8 = vsel %vm1121_vm3, %v3997_v14, -inf }
 0x3f0   : > { %1722 = vmax.xlane.f32.xlu1 %v1721_v15  ;;  %1719 = vmax.xlane.f32.xlu0 %v1718_v8  ;;  %v1224_v8 = vsel %vm1121_vm3, %v3873_v3, 0.0  ;;  %v1251_v3 = vsel %vm1121_vm3, %v3919_v31, 0.0 }
 0x3f1   : > { %v4003_v18 = vpop.f32.mrb[24].mxu1 }
 0x3f2   : > { %v4005_v12 = vpop.f32.mrb[25].mxu1  ;;  %v1727_v20 = vsel %vm1121_vm3, %v4003_v18, -inf }
 0x3f3   : > { %v1724_v17 = vsel %vm1121_vm3, %v4005_v12, -inf }
 0x3f4   : > { %1728 = vmax.xlane.f32.xlu1 %v1727_v20  ;;  %1725 = vmax.xlane.f32.xlu0 %v1724_v17  ;;  %v1227_v20 = vsel %vm1121_vm3, %v3881_v9, 0.0  ;;  %v1230_v17 = vsel %vm1121_vm3, %v3883_v11, 0.0  ;;  %v1257_v9 = vsel %vm1121_vm3, %v3927_v35, 0.0  ;;  %v1242_v11 = vsel %vm1121_vm3, %v3905_v22, 0.0 }
 0x3f5   : > { %v4011_v30 = vpop.f32.mrb[26].mxu1  ;;  %v1260_v22 = vsel %vm1121_vm3, %v3929_v37, 0.0 }
 0x3f6   : > { %v4013_v23 = vpop.f32.mrb[27].mxu1  ;;  %v1733_v25 = vsel %vm1121_vm3, %v4011_v30, -inf }
 0x3f7   : > { %v1730_v34 = vsel %vm1121_vm3, %v4013_v23, -inf }
 0x3f8   : > { %1734 = vmax.xlane.f32.xlu1 %v1733_v25  ;;  %1731 = vmax.xlane.f32.xlu0 %v1730_v34  ;;  %v1233_v25 = vsel %vm1121_vm3, %v3894_v13, 0.0  ;;  %v1263_v13 = vsel %vm1121_vm3, %v3935_v38, 0.0 }
 0x3f9   : > { %v4019_v36 = vpop.f32.mrb[28].mxu1 }
 0x3fa   : > { %v4021_v24 = vpop.f32.mrb[29].mxu1  ;;  %v1739_v39 = vsel %vm1121_vm3, %v4019_v36, -inf }
 0x3fb   : > { %v1736_v40 = vsel %vm1121_vm3, %v4021_v24, -inf }
 0x3fc   : > { %1740 = vmax.xlane.f32.xlu1 %v1739_v39  ;;  %1737 = vmax.xlane.f32.xlu0 %v1736_v40 }
 0x3fd   : > { %v4027_v41 = vpop.f32.mrb[30].mxu1 }
 0x3fe   : > { %v4029_v42 = vpop.f32.mrb[31].mxu1  ;;  %v1745_v43 = vsel %vm1121_vm3, %v4027_v41, -inf }
 0x3ff   : > { %v1742_v44 = vsel %vm1121_vm3, %v4029_v42, -inf }
 0x400   : > { %1746 = vmax.xlane.f32.xlu1 %v1745_v43  ;;  %1743 = vmax.xlane.f32.xlu0 %v1742_v44 }
 0x401   : > { %v4035_v45 = vpop.f32.mrb[32].mxu1 }
 0x402   : > { %v4037_v46 = vpop.f32.mrb[33].mxu1  ;;  %v1751_v47 = vsel %vm1121_vm3, %v4035_v45, -inf }
 0x403   : > { %v1748_v6 = vsel %vm1121_vm3, %v4037_v46, -inf }
 0x404   : > { %1752 = vmax.xlane.f32.xlu0 %v1751_v47 }
 0x405   : > { %v4041_v48 = vpop.f32.mrb[34].mxu1 }
 0x406   : > { %v4043_v49 = vpop.f32.mrb[35].mxu1  ;;  %v1757_v15 = vsel %vm1121_vm3, %v4041_v48, -inf }
 0x407   : > { %v1754_v7 = vsel %vm1121_vm3, %v4043_v49, -inf }
 0x408   : > { %1749 = vmax.xlane.f32.xlu0 %v1748_v6 }
 0x40c   : > { %1755 = vmax.xlane.f32.xlu0 %v1754_v7 }
 0x410   : > { %1758 = vmax.xlane.f32.xlu0 %v1757_v15 }
 0x411   : > { %3206 = vrot.lane.b32.xlu1 %v3205_v28, %s4415_s27  ;;  %v1245_v28 = vsel %vm1121_vm3, %v3911_v16, 0.0  ;;  %v1254_v16 = vsel %vm1121_vm3, %v3921_v33, 0.0 }
 0x414   : > { %1225 = vadd.xlane.f32.xlu0 %v1224_v8 }
 0x418   : > { %1228 = vadd.xlane.f32.xlu0 %v1227_v20 }
 0x41c   : > { %1231 = vadd.xlane.f32.xlu0 %v1230_v17 }
 0x420   : > { %1234 = vadd.xlane.f32.xlu0 %v1233_v25 }
 0x424   : > { %1237 = vadd.xlane.f32.xlu0 %v1236_v26 }
 0x428   : > { %1240 = vadd.xlane.f32.xlu0 %v1239_v27 }
 0x42c   : > { %1246 = vadd.xlane.f32.xlu0 %v1245_v28 }
 0x430   : > { %1252 = vadd.xlane.f32.xlu0 %v1251_v3 }
 0x434   : > { %1258 = vadd.xlane.f32.xlu0 %v1257_v9 }
 0x435   : > { %1243 = vadd.xlane.f32.xlu1 %v1242_v11 }
 0x438   : > { %1264 = vadd.xlane.f32.xlu0 %v1263_v13 }
 0x439   : > { %1249 = vadd.xlane.f32.xlu1 %v1248_v19 }
 0x43c   : > { %1219 = vadd.xlane.f32.xlu0 %v1218_v21 }
 0x43d   : > { %1255 = vadd.xlane.f32.xlu1 %v1254_v16 }
 0x441   : > { %1261 = vadd.xlane.f32.xlu1 %v1260_v22 }
 0x478   : > { %v1717_v31 = vpop.xlane.xlu0 %1716 }
 0x479   : > { %v1714_v35 = vpop.xlane.xlu1 %1713 }
 0x47a   : > { %v1760_v38 = vsub.f32 %v3989_v4, %v1714_v35 }
 0x47c   : > { %v1776_v34 = vmul.f32 1.442695, %v1760_v38 }
 0x47d   : > { %v1720_v39 = vpop.xlane.xlu0 %1719  ;;  %v1723_v29 = vpop.xlane.xlu1 %1722 }
 0x47e   : > { %3242 = vpow2.f32 %v1776_v34  ;;  %v1762_v40 = vsub.f32 %v3997_v14, %v1720_v39  ;;  %v1763_v32 = vsub.f32 %v3995_v10, %v1723_v29  ;;  %v1761_v14 = vsub.f32 %v3987_v5, %v1717_v31 }
 0x480   : > { %v1780_v43 = vmul.f32 1.442695, %v1762_v40  ;;  %v1782_v44 = vmul.f32 1.442695, %v1763_v32  ;;  %v1778_v28 = vmul.f32 1.442695, %v1761_v14 }
 0x481   : > { %v1726_v33 = vpop.xlane.xlu0 %1725  ;;  %v1729_v47 = vpop.xlane.xlu1 %1728 }
 0x482   : > { %3244 = vpow2.f32 %v1780_v43  ;;  %v1764_v37 = vsub.f32 %v4005_v12, %v1726_v33  ;;  %v1765_v6 = vsub.f32 %v4003_v18, %v1729_v47 }
 0x483   : > { %3246 = vpow2.f32 %v1782_v44 }
 0x484   : > { %v1786_v7 = vmul.f32 1.442695, %v1765_v6  ;;  %v1784_v8 = vmul.f32 1.442695, %v1764_v37 }
 0x485   : > { %v1732_v4 = vpop.xlane.xlu0 %1731  ;;  %v1735_v15 = vpop.xlane.xlu1 %1734 }
 0x486   : > { %v1767_v20 = vsub.f32 %v4011_v30, %v1735_v15  ;;  %3248 = vpow2.f32 %v1786_v7  ;;  %v1766_v17 = vsub.f32 %v4013_v23, %v1732_v4 }
 0x487   : > { %3250 = vpow2.f32 %v1784_v8 }
 0x488   : > { %v3243_v10 = vpop.eup %3242  ;;  %v1790_v25 = vmul.f32 1.442695, %v1767_v20  ;;  %v1788_v5 = vmul.f32 1.442695, %v1766_v17 }
 0x489   : > { %v1738_v26 = vpop.xlane.xlu0 %1737  ;;  %2982 = vmatprep.mubr.msk.f32.mxu0 %vm1121_vm3, %v3243_v10  ;;  %v1741_v12 = vpop.xlane.xlu1 %1740  ;;  %v1808_v18 = vsel %vm1121_vm3, %v3243_v10, 0.0 }
 0x48a   : > { %v1768_v27 = vsub.f32 %v4021_v24, %v1738_v26  ;;  %1809 = vadd.xlane.f32.xlu1 %v1808_v18  ;;  %3252 = vpow2.f32 %v1790_v25  ;;  %v1769_v19 = vsub.f32 %v4019_v36, %v1741_v12 }
 0x48c   : > { %v3245_v3 = vpop.eup %3244  ;;  %v1792_v30 = vmul.f32 1.442695, %v1768_v27  ;;  %v1794_v34 = vmul.f32 1.442695, %v1769_v19 }
 0x48d   : > { %v3247_v9 = vpop.eup %3246  ;;  %v1744_v11 = vpop.xlane.xlu0 %1743  ;;  %v1814_v23 = vsel %vm1121_vm3, %v3245_v3, 0.0 }
 0x48e   : > { %v1747_v13 = vpop.xlane.xlu1 %1746  ;;  %3254 = vpow2.f32 %v1792_v30  ;;  %v1770_v21 = vsub.f32 %v4029_v42, %v1744_v11  ;;  %1815 = vadd.xlane.f32.xlu1 %v1814_v23  ;;  %v1817_v16 = vsel %vm1121_vm3, %v3247_v9, 0.0 }
 0x48f   : > { %3256 = vpow2.f32 %v1778_v28  ;;  %1818 = vadd.xlane.f32.xlu0 %v1817_v16  ;;  %v1771_v31 = vsub.f32 %v4027_v41, %v1747_v13 }
 0x490   : > { %v1796_v24 = vmul.f32 1.442695, %v1770_v21  ;;  %v3249_v22 = vpop.eup %3248  ;;  %3258 = vpow2.f32 %v1788_v5 }
 0x491   : > { %v1753_v35 = vpop.xlane.xlu0 %1752  ;;  %v1823_v36 = vsel %vm1121_vm3, %v3249_v22, 0.0  ;;  %v3251_v40 = vpop.eup %3250  ;;  %v1798_v32 = vmul.f32 1.442695, %v1771_v31  ;;  %v1221_v31 = vsel %vm1121_vm3, %v3871_v0, 0.0 }
 0x492   : > { %v3207_v38 = vpop.permute.xlu1 %3206  ;;  %3260 = vpow2.f32 %v1796_v24  ;;  %v1773_v44 = vsub.f32 %v4035_v45, %v1753_v35  ;;  %v1820_v47 = vsel %vm1121_vm3, %v3251_v40, 0.0 }
 0x493   : > { %v3209_v39 = vunpack.i.h.bf16 %v3207_v38  ;;  %v3208_v29 = vunpack.i.l.bf16 %v3207_v38  ;;  %1824 = vadd.xlane.f32.xlu0 %v1823_v36  ;;  %3262 = vpow2.f32 %v1794_v34 }
 0x494   : > { %v3253_v41 = vpop.eup %3252  ;;  %3264 = vpow2.f32 %v1798_v32  ;;  %v1802_v8 = vmul.f32 1.442695, %v1773_v44 }
 0x495   : > { %v3092_v42 = vpack.c.bf16 %v3209_v39, %v3208_v29  ;;  %v1750_v43 = vpop.xlane.xlu0 %1749 }
 0x496   : > { %v1772_v33 = vsub.f32 %v4037_v46, %v1750_v43  ;;  %v1829_v46 = vsel %vm1121_vm3, %v3253_v41, 0.0 }
 0x497   : > { %3093 = vmatprep.subr.bf16.mxu0 %v3092_v42  ;;  %1821 = vadd.xlane.f32.xlu0 %v1820_v47 }
 0x498   : > { %3095 = vmatpush3.bf16.msra.mxu0 %v3092_v42  ;;  %v3255_v37 = vpop.eup %3254  ;;  %v1800_v6 = vmul.f32 1.442695, %v1772_v33 }
 0x499   : > { %v3257_v7 = vpop.eup %3256  ;;  %v1756_v4 = vpop.xlane.xlu0 %1755  ;;  %v1832_v15 = vsel %vm1121_vm3, %v3255_v37, 0.0 }
 0x49a   : > { %3266 = vpow2.f32 %v1800_v6  ;;  %1833 = vadd.xlane.f32.xlu1 %v1832_v15  ;;  %v3259_v45 = vpop.eup %3258  ;;  %v1774_v14 = vsub.f32 %v4043_v49, %v1756_v4  ;;  %v1811_v49 = vsel %vm1121_vm3, %v3257_v7, 0.0 }
 0x49b   : > { %2983 = vmatmul.mubr.msk.f32.vlgmr.msra.gmra.mrb[20].mxu0 %vm1121_vm3, %v3257_v7  ;;  %1830 = vadd.xlane.f32.xlu0 %v1829_v46  ;;  %3268 = vpow2.f32 %v1802_v8  ;;  %v1826_v26 = vsel %vm1121_vm3, %v3259_v45, 0.0 }
 0x49c   : > { %2985 = vmatprep.mubr.msk.f32.mxu0 %vm1121_vm3, %v3245_v3  ;;  %v3261_v20 = vpop.eup %3260  ;;  %v1804_v18 = vmul.f32 1.442695, %v1774_v14 }
 0x49d   : > { %v1759_v10 = vpop.xlane.xlu0 %1758  ;;  %v1838_v17 = vsel %vm1121_vm3, %v3261_v20, 0.0  ;;  %v3263_v12 = vpop.eup %3262 }
 0x49e   : > { %v1775_v25 = vsub.f32 %v4041_v48, %v1759_v10  ;;  %1839 = vadd.xlane.f32.xlu1 %v1838_v17  ;;  %v3265_v3 = vpop.eup %3264  ;;  %v1835_v48 = vsel %vm1121_vm3, %v3263_v12, 0.0 }
 0x49f   : > { %2986 = vmatmul.mubr.msk.f32.gmra.mrb[22].mxu0 %vm1121_vm3, %v3247_v9  ;;  %1827 = vadd.xlane.f32.xlu0 %v1826_v26  ;;  %v1841_v11 = vsel %vm1121_vm3, %v3265_v3, 0.0 }
 0x4a0   : > { %2988 = vmatprep.mubr.msk.f32.mxu0 %vm1121_vm3, %v3251_v40  ;;  %v1806_v27 = vmul.f32 1.442695, %v1775_v25 }
 0x4a1   : > { %v1226_v28 = vpop.xlane.xlu0 %1225 }
 0x4a2   : > { %3270 = vpow2.f32 %v1806_v27  ;;  %1812 = vadd.xlane.f32.xlu1 %v1811_v49 }
 0x4a3   : > { %2989 = vmatmul.mubr.msk.f32.gmra.mrb[24].mxu0 %vm1121_vm3, %v3249_v22  ;;  %3272 = vpow2.f32 %v1804_v18  ;;  %1836 = vadd.xlane.f32.xlu0 %v1835_v48 }
 0x4a4   : > { %2991 = vmatprep.mubr.msk.f32.mxu0 %vm1121_vm3, %v3259_v45  ;;  %v3267_v30 = vpop.eup %3266 }
 0x4a5   : > { %v1229_v9 = vpop.xlane.xlu0 %1228  ;;  %v1844_v5 = vsel %vm1121_vm3, %v3267_v30, 0.0  ;;  %v3269_v13 = vpop.eup %3268 }
 0x4a6   : > { %1845 = vadd.xlane.f32.xlu1 %v1844_v5  ;;  %v1847_v19 = vsel %vm1121_vm3, %v3269_v13, 0.0  ;;  %3274 = vrcp.f32 %v1229_v9 }
 0x4a7   : > { %2992 = vmatmul.mubr.msk.f32.gmra.mrb[26].mxu0 %vm1121_vm3, %v3253_v41  ;;  %1842 = vadd.xlane.f32.xlu0 %v1841_v11  ;;  %3276 = vrcp.f32 %v1226_v28 }
 0x4a8   : > { %2994 = vmatprep.mubr.msk.f32.mxu0 %vm1121_vm3, %v3255_v37 }
 0x4a9   : > { %v1232_v23 = vpop.xlane.xlu0 %1231 }
 0x4ab   : > { %2995 = vmatmul.mubr.msk.f32.gmra.mrb[28].mxu0 %vm1121_vm3, %v3263_v12  ;;  %1848 = vadd.xlane.f32.xlu0 %v1847_v19 }
 0x4ac   : > { %2997 = vmatprep.mubr.msk.f32.mxu0 %vm1121_vm3, %v3261_v20  ;;  %v3271_v21 = vpop.eup %3270 }
 0x4ad   : > { %v1235_v16 = vpop.xlane.xlu0 %1234  ;;  %v1853_v24 = vsel %vm1121_vm3, %v3271_v21, 0.0  ;;  %v3273_v22 = vpop.eup %3272 }
 0x4ae   : > { %1854 = vadd.xlane.f32.xlu1 %v1853_v24  ;;  %v1850_v38 = vsel %vm1121_vm3, %v3273_v22, 0.0  ;;  %3278 = vrcp.f32 %v1235_v16 }
 0x4af   : > { %2998 = vmatmul.mubr.msk.f32.gmra.mrb[30].mxu0 %vm1121_vm3, %v3265_v3  ;;  %1222 = vadd.xlane.f32.xlu0 %v1221_v31  ;;  %3280 = vrcp.f32 %v1232_v23  ;;  %v2231_v31 = vld [vmem:[%s4384_s8] sm:$0xff] }
 0x4b0   : > { %3000 = vmatprep.mubr.msk.f32.mxu0 %vm1121_vm3, %v3267_v30  ;;  %v3275_v0 = vpop.eup %3274 }
 0x4b1   : > { %v1238_v35 = vpop.xlane.xlu0 %1237  ;;  %v3277_v36 = vpop.eup %3276  ;;  %v1484_v40 = vmul.f32 %v3275_v0, %v3959_v52 }
 0x4b2   : > { %1851 = vadd.xlane.f32.xlu1 %v1850_v38  ;;  %v1483_v43 = vmul.f32 %v3277_v36, %v3961_v53 }
 0x4b3   : > { %3001 = vmatmul.mubr.msk.f32.gmra.mrb[32].mxu0 %vm1121_vm3, %v3269_v13 }
 0x4b4   : > { %3003 = vmatprep.mubr.msk.f32.mxu0 %vm1121_vm3, %v3273_v22 }
 0x4b5   : > { %v1241_v34 = vpop.xlane.xlu0 %1240 }
 0x4b6   : > { %3282 = vrcp.f32 %v1241_v34  ;;  %v2328_v34 = vld [vmem:[%s4386_s10] sm:$0xff] }
 0x4b7   : > { %3004 = vmatmul.mubr.msk.f32.gmra.mrb[34].mxu0 %vm1121_vm3, %v3271_v21  ;;  %3284 = vrcp.f32 %v1238_v35  ;;  %v2232_v35 = vld [vmem:[%s4384_s8 + $0x8] sm:$0xff] }
 0x4b8   : > { %v3279_v42 = vpop.eup %3278  ;;  %v3096_v38 = vpack.c.bf16 %v2232_v35, %v2231_v31 }
 0x4b9   : > { %v1247_v39 = vpop.xlane.xlu0 %1246  ;;  %v3281_v44 = vpop.eup %3280  ;;  %v1486_v41 = vmul.f32 %v3279_v42, %v3963_v54 }
 0x4ba   : > { %3286 = vrcp.f32 %v1247_v39  ;;  %v1485_v52 = vmul.f32 %v3281_v44, %v3965_v55  ;;  %v2329_v39 = vld [vmem:[%s4386_s10 + $0x8] sm:$0xff]  ;;  %3097 = vmatprep.subr.bf16.mxu1 %v3096_v38 }
 0x4bb   : > { %v3112_v36 = vpack.c.bf16 %v2329_v39, %v2328_v34  ;;  %3099 = vmatpush3.bf16.msra.mxu1 %v3096_v38 }
 0x4bd   : > { %v1253_v29 = vpop.xlane.xlu0 %1252  ;;  %3113 = vmatprep.subr.bf16.mxu0 %v3112_v36 }
 0x4be   : > { %3115 = vmatpush3.bf16.msra.mxu0 %v3112_v36 }
 0x4c0   : > { %v3283_v47 = vpop.eup %3282 }
 0x4c1   : > { %v1259_v33 = vpop.xlane.xlu0 %1258  ;;  %v3285_v6 = vpop.eup %3284  ;;  %v1488_v7 = vmul.f32 %v3283_v47, %v3967_v56  ;;  %v2234_v47 = vld [vmem:[%s4384_s8 + $0x18] sm:$0xff] }
 0x4c2   : > { %v1244_v32 = vpop.xlane.xlu1 %1243  ;;  %v1487_v54 = vmul.f32 %v3285_v6, %v3969_v57  ;;  %v2331_v6 = vld [vmem:[%s4386_s10 + $0x18] sm:$0xff] }
 0x4c3   : > { %3288 = vrcp.f32 %v1244_v32  ;;  %2091 = vrot.lane.b32.xlu1 %v1484_v40, %s4399_s24 }
 0x4c4   : > { %3290 = vrcp.f32 %v1253_v29  ;;  %v3287_v4 = vpop.eup %3286 }
 0x4c5   : > { %2089 = vrot.lane.b32.xlu0 %v1483_v43, %s4399_s24  ;;  %v1490_v8 = vmul.f32 %v3287_v4, %v3971_v58 }
 0x4c6   : > { %v1250_v37 = vpop.xlane.xlu1 %1249 }
 0x4c7   : > { %3292 = vrcp.f32 %v1250_v37  ;;  %2099 = vrot.lane.b32.xlu1 %v1486_v41, %s3455_s14  ;;  %v2233_v41 = vld [vmem:[%s4384_s8 + $0x10] sm:$0xff] }
 0x4c8   : > { %3294 = vrcp.f32 %v1259_v33  ;;  %v3100_v37 = vpack.c.bf16 %v2234_v47, %v2233_v41 }
 0x4c9   : > { %2097 = vrot.lane.b32.xlu0 %v1485_v52, %s3455_s14  ;;  %v2330_v52 = vld [vmem:[%s4386_s10 + $0x10] sm:$0xff] }
 0x4ca   : > { %v1256_v53 = vpop.xlane.xlu1 %1255  ;;  %3101 = vmatprep.subr.bf16.mxu1 %v3100_v37 }
 0x4cb   : > { %3296 = vrcp.f32 %v1256_v53  ;;  %2107 = vrot.lane.b32.xlu1 %v1488_v7, %s3456_s15  ;;  %v3116_v53 = vpack.c.bf16 %v2331_v6, %v2330_v52  ;;  %3103 = vmatpush3.bf16.msra.mxu1 %v3100_v37 }
 0x4cd   : > { %v3289_v15 = vpop.eup %3288  ;;  %2105 = vrot.lane.b32.xlu0 %v1487_v54, %s3456_s15  ;;  %3117 = vmatprep.subr.bf16.mxu0 %v3116_v53 }
 0x4ce   : > { %v3291_v45 = vpop.eup %3290  ;;  %v1262_v55 = vpop.xlane.xlu1 %1261  ;;  %v1489_v46 = vmul.f32 %v3289_v15, %v3973_v59  ;;  %3119 = vmatpush3.bf16.msra.mxu0 %v3116_v53 }
 0x4cf   : > { %3298 = vrcp.f32 %v1262_v55  ;;  %2189 = vrot.lane.b32.xlu1 %v1490_v8, %s3457_s4  ;;  %v1492_v20 = vmul.f32 %v3291_v45, %v3975_v61  ;;  %v2235_v55 = vld [vmem:[%s4384_s8 + $0x20] sm:$0xff] }
 0x4d1   : > { %v3293_v56 = vpop.eup %3292  ;;  %2187 = vrot.lane.b32.xlu0 %v1489_v46, %s3457_s4  ;;  %v2236_v46 = vld [vmem:[%s4384_s8 + $0x28] sm:$0xff] }
 0x4d2   : > { %v3295_v14 = vpop.eup %3294  ;;  %v1491_v57 = vmul.f32 %v3293_v56, %v3977_v60  ;;  %v4161_v60 = vpop.xlane.xlu0 %1264 }
 0x4d3   : > { %2197 = vrot.lane.b32.xlu1 %v1492_v20, %s3458_s29  ;;  %v1494_v10 = vmul.f32 %v3295_v14, %v3979_v62  ;;  %v3104_v20 = vpack.c.bf16 %v2236_v46, %v2235_v55  ;;  %v2332_v14 = vld [vmem:[%s4386_s10 + $0x20] sm:$0xff] }
 0x4d5   : > { %v3297_v58 = vpop.eup %3296  ;;  %2195 = vrot.lane.b32.xlu0 %v1491_v57, %s3458_s29  ;;  %v2333_v57 = vld [vmem:[%s4386_s10 + $0x28] sm:$0xff]  ;;  %3105 = vmatprep.subr.bf16.mxu1 %v3104_v20 }
 0x4d6   : > { %v1493_v59 = vmul.f32 %v3297_v58, %v3981_v63  ;;  %v4163_v26 = vpop.xlane.xlu0 %1219  ;;  %3107 = vmatpush3.bf16.msra.mxu1 %v3104_v20 }
 0x4d7   : > { %2205 = vrot.lane.b32.xlu1 %v1494_v10, %s4397_s19 }
 0x4d9   : > { %v3299_v17 = vpop.eup %3298  ;;  %2203 = vrot.lane.b32.xlu0 %v1493_v59, %s4397_s19 }
 0x4da   : > { %v1495_v61 = vmul.f32 %v3299_v17, %v3985_v2  ;;  %v3120_v17 = vpack.c.bf16 %v2333_v57, %v2332_v14 }
 0x4dc   : > { %3121 = vmatprep.subr.bf16.mxu0 %v3120_v17 }
 0x4dd   : > { %2211 = vrot.lane.b32.xlu0 %v1495_v61, %s4395_s16  ;;  %3123 = vmatpush3.bf16.msra.mxu0 %v3120_v17 }
 0x517   : > { %v1810_v25 = vpop.xlane.xlu1 %1809 }
 0x51b   : > { %v1816_v62 = vpop.xlane.xlu1 %1815 }
 0x51c   : > { %v1819_v12 = vpop.xlane.xlu0 %1818 }
 0x520   : > { %v1825_v63 = vpop.xlane.xlu0 %1824 }
 0x524   : > { %v1822_v28 = vpop.xlane.xlu0 %1821 }
 0x527   : > { %v1834_v18 = vpop.xlane.xlu1 %1833 }
 0x528   : > { %v1831_v3 = vpop.xlane.xlu0 %1830 }
 0x52b   : > { %v1840_v27 = vpop.xlane.xlu1 %1839 }
 0x52c   : > { %v1828_v2 = vpop.xlane.xlu0 %1827 }
 0x52f   : > { %v1813_v49 = vpop.xlane.xlu1 %1812 }
 0x530   : > { %3300 = vrcp.f32 %v1813_v49  ;;  %v1837_v23 = vpop.xlane.xlu0 %1836  ;;  %v2335_v49 = vld [vmem:[%s4386_s10 + $0x38] sm:$0xff] }
 0x531   : > { %3302 = vrcp.f32 %v1810_v25 }
 0x532   : > { %3304 = vrcp.f32 %v1819_v12 }
 0x533   : > { %3306 = vrcp.f32 %v1816_v62  ;;  %v1846_v22 = vpop.xlane.xlu1 %1845 }
 0x534   : > { %3308 = vrcp.f32 %v1822_v28  ;;  %v1843_v42 = vpop.xlane.xlu0 %1842  ;;  %v2334_v28 = vld [vmem:[%s4386_s10 + $0x30] sm:$0xff] }
 0x535   : > { %3310 = vrcp.f32 %v1825_v63  ;;  %v2238_v63 = vld [vmem:[%s4384_s8 + $0x38] sm:$0xff] }
 0x536   : > { %3312 = vrcp.f32 %v1828_v2 }
 0x537   : > { %3314 = vrcp.f32 %v1831_v3 }
 0x538   : > { %3316 = vrcp.f32 %v1834_v18  ;;  %v1849_v56 = vpop.xlane.xlu0 %1848  ;;  %v2237_v18 = vld [vmem:[%s4384_s8 + $0x30] sm:$0xff] }
 0x539   : > { %3318 = vrcp.f32 %v1837_v23 }
 0x53a   : > { %v3301_v48 = vpop.eup %3300  ;;  %3320 = vrcp.f32 %v1840_v27  ;;  %v3108_v27 = vpack.c.bf16 %v2238_v63, %v2237_v18 }
 0x53b   : > { %v3303_v9 = vpop.eup %3302  ;;  %v1855_v44 = vpop.xlane.xlu1 %1854  ;;  %3322 = vrcp.f32 %v1843_v42 }
 0x53c   : > { %v3305_v19 = vpop.eup %3304  ;;  %3324 = vrcp.f32 %v1846_v22  ;;  %3109 = vmatprep.subr.bf16.mxu1 %v3108_v27 }
 0x53d   : > { %v3307_v0 = vpop.eup %3306  ;;  %3326 = vrcp.f32 %v1849_v56  ;;  %3111 = vmatpush3.bf16.msra.mxu1 %v3108_v27 }
 0x53e   : > { %v3309_v40 = vpop.eup %3308 }
 0x53f   : > { %v3311_v7 = vpop.eup %3310  ;;  %v1852_v10 = vpop.xlane.xlu1 %1851 }
 0x540   : > { %v3313_v54 = vpop.eup %3312  ;;  %3328 = vrcp.f32 %v1852_v10 }
 0x541   : > { %v3315_v58 = vpop.eup %3314  ;;  %3330 = vrcp.f32 %v4161_v60 }
 0x542   : > { %v3317_v61 = vpop.eup %3316  ;;  %3332 = vrcp.f32 %v1855_v44 }
 0x543   : > { %v3319_v3 = vpop.eup %3318  ;;  %v2092_v44 = vpop.permute.xlu1 %2091 }
 0x547   : > { %v2100_v41 = vpop.permute.xlu1 %2099 }
 0x54b   : > { %v2108_v37 = vpop.permute.xlu1 %2107 }
 0x54f   : > { %v2190_v6 = vpop.permute.xlu1 %2189 }
 0x56e   : > { %v2984_v30 = vpop.f32.mrb[20].mxu0 }
 0x56f   : > { %v4165_v5 = vmul.f32 %v3301_v48, %v2984_v30  ;;  %v1976_v11 = vpop.f32.mrb[21].mxu0  ;;  %v3124_v48 = vpack.c.bf16 %v2335_v49, %v2334_v28  ;;  %v3321_v30 = vpop.eup %3320 }
 0x570   : > { %v4167_v13 = vmul.f32 %v3303_v9, %v1976_v11 }
 0x571   : > { %3125 = vmatprep.subr.bf16.mxu0 %v3124_v48 }
 0x572   : > { %v2987_v21 = vpop.f32.mrb[22].mxu0  ;;  %3127 = vmatpush3.bf16.msra.mxu0 %v3124_v48 }
 0x573   : > { %v2074_v16 = vmul.f32 %v3305_v19, %v2987_v21  ;;  %v1986_v24 = vpop.f32.mrb[23].mxu0  ;;  %v3323_v19 = vpop.eup %3322 }
 0x574   : > { %v2073_v32 = vmul.f32 %v3307_v0, %v1986_v24 }
 0x575   : > { %2165 = vrot.lane.b32.xlu1 %v2074_v16, %s4399_s24  ;;  %v3325_v16 = vpop.eup %3324 }
 0x576   : > { %v2990_v29 = vpop.f32.mrb[24].mxu0  ;;  %v3327_v60 = vpop.eup %3326 }
 0x577   : > { %v1996_v43 = vpop.f32.mrb[25].mxu0  ;;  %v2076_v15 = vmul.f32 %v3311_v7, %v2990_v29  ;;  %v3329_v38 = vpop.eup %3328 }
 0x578   : > { %v2075_v33 = vmul.f32 %v3309_v40, %v1996_v43  ;;  %v3331_v29 = vpop.eup %3330 }
 0x579   : > { %2163 = vrot.lane.b32.xlu1 %v2073_v32, %s4399_s24  ;;  %v3333_v36 = vpop.eup %3332  ;;  %v1496_v42 = vmul.f32 %v3331_v29, %v3983_v1  ;;  %v1223_v32 = vpop.xlane.xlu0 %1222 }
 0x57a   : > { %2171 = vrot.lane.b32.xlu0 %v2075_v33, %s3455_s14  ;;  %v2993_v4 = vpop.f32.mrb[26].mxu0  ;;  %3334 = vrcp.f32 %v1223_v32 }
 0x57b   : > { %v2006_v8 = vpop.f32.mrb[27].mxu0  ;;  %v2078_v25 = vmul.f32 %v3315_v58, %v2993_v4  ;;  %v2198_v4 = vpop.permute.xlu1 %2197  ;;  %3336 = vrcp.f32 %v4163_v26 }
 0x57c   : > { %v2077_v45 = vmul.f32 %v3313_v54, %v2006_v8 }
 0x57d   : > { %2173 = vrot.lane.b32.xlu1 %v2076_v15, %s3455_s14  ;;  %v2090_v43 = vpop.permute.xlu0 %2089 }
 0x57e   : > { %2179 = vrot.lane.b32.xlu0 %v2077_v45, %s3456_s15  ;;  %v2996_v59 = vpop.f32.mrb[28].mxu0 }
 0x57f   : > { %v2016_v62 = vpop.f32.mrb[29].mxu0  ;;  %v2080_v9 = vmul.f32 %v3319_v3, %v2996_v59  ;;  %v2206_v54 = vpop.permute.xlu1 %2205 }
 0x580   : > { %v2079_v12 = vmul.f32 %v3317_v61, %v2016_v62 }
 0x581   : > { %2181 = vrot.lane.b32.xlu1 %v2078_v25, %s3456_s15  ;;  %s4416_s15 = smov 48   ;;  %v2098_v33 = vpop.permute.xlu0 %2097 }
 0x582   : > { %2113 = vrot.lane.b32.xlu0 %v2079_v12, %s3457_s4  ;;  %v2999_v2 = vpop.f32.mrb[30].mxu0 }
 0x583   : > { %v2026_v11 = vpop.f32.mrb[31].mxu0  ;;  %v2082_v24 = vmul.f32 %v3323_v19, %v2999_v2 }
 0x584   : > { %v2081_v23 = vmul.f32 %v3321_v30, %v2026_v11  ;;  %v3335_v58 = vpop.eup %3334 }
 0x585   : > { %2115 = vrot.lane.b32.xlu1 %v2080_v9, %s3457_s4  ;;  %s4417_s4 = smov 56   ;;  %v2106_v47 = vpop.permute.xlu0 %2105  ;;  %v3337_v61 = vpop.eup %3336  ;;  %v1482_v25 = vmul.f32 %v3335_v58, %v3955_v50 }
 0x586   : > { %2121 = vrot.lane.b32.xlu0 %v2081_v23, %s3458_s29  ;;  %v3002_v21 = vpop.f32.mrb[32].mxu0  ;;  %v1481_v18 = vmul.f32 %v3337_v61, %v3957_v51 }
 0x587   : > { %v2036_v22 = vpop.f32.mrb[33].mxu0  ;;  %v2084_v34 = vmul.f32 %v3327_v60, %v3002_v21  ;;  %v2144_v27 = vsel %vm937_vm1, %v1482_v25, %v2092_v44 }
 0x588   : > { %v2083_v31 = vmul.f32 %v3325_v16, %v2036_v22  ;;  %v2143_v49 = vsel %vm937_vm1, %v1481_v18, %v2090_v43  ;;  %v2146_v9 = vsel %vm1121_vm3, %v2144_v27, %v2100_v41 }
 0x589   : > { %2123 = vrot.lane.b32.xlu1 %v2082_v24, %s3458_s29  ;;  %v2188_v52 = vpop.permute.xlu0 %2187  ;;  %v2145_v50 = vsel %vm1121_vm3, %v2143_v49, %v2098_v33  ;;  %v2149_v19 = vsel %vm2147_vm4, %v2146_v9, %v2108_v37  ;;  %s4272_s29 = sand.u32 1, %s3432_s26  }
 0x58a   : > { %2129 = vrot.lane.b32.xlu0 %v2083_v31, %s4416_s15  ;;  %v3005_v35 = vpop.f32.mrb[34].mxu0  ;;  %v2148_v30 = vsel %vm2147_vm4, %v2145_v50, %v2106_v47  ;;  %s2628_s23 = sshll.u32 %s4272_s29, 4  ;;  %s2429_s27 = scalar_lea.sflag [#allocation3], %s4272_s29 }
 0x58b   : > { %v2046_v39 = vpop.f32.mrb[35].mxu0  ;;  %v2086_v40 = vmul.f32 %v3333_v36, %v3005_v35  ;;  %s520_s14 = scalar_lea.vmem [#allocation2], %s2628_s23  ;;  %v2714_v36 = vld [vmem:[%s4385_s9] ss:$0 sm:$0xff]  ;;  %s527_s19 = scalar_lea.vmem [#allocation4], %s2628_s23 }
 0x58c   : > { %v2085_v0 = vmul.f32 %v3329_v38, %v2046_v39  ;;  %s2449_s17 = sshll.u32 %s520_s14, 4  ;;  %s2467_s16 = sshll.u32 %s527_s19, 4  ;;  %s4282_s17 = int_to_ptr.vmem [resolvable:$true] %s2449_s17  ;;  %s4284_s16 = int_to_ptr.vmem [resolvable:$true] %s2467_s16 }
 0x58d   : > { %2131 = vrot.lane.b32.xlu1 %v2084_v34, %s4416_s15  ;;  %v2196_v7 = vpop.permute.xlu0 %2195  ;;  %s2732_s15 = sshll.u32 %s3440_s28, 8  ;;  %s3338_s24 = scalar_lea.vmem %s4282_s17, 256 }
 0x58e   : > { %2137 = vrot.lane.b32.xlu0 %v2085_v0, %s4417_s4  ;;  %s4289_s22 = scalar_lea.hbm %s4388_s12, %s2732_s15  ;;  %s4295_s5 = scalar_lea.hbm %s4389_s13, %s2732_s15 }
 0x58f   : > { %p3339_p12 = scmp.ne.s32.totalorder %s4282_s17, %s3338_s24 }
 0x591   : > { %2139 = vrot.lane.b32.xlu1 %v2086_v40, %s4417_s4  ;;  %v2204_v53 = vpop.permute.xlu0 %2203  ;;  %v2717_v40 = vld [vmem:[%s4387_s11] ss:$0 sm:$0xff]  ;;  %p3340_p13 = pnand %p3339_p12, %p3574_p4 }
 0x592   : > { %2213 = vrot.lane.b32.xlu0 %v1496_v42, %s4417_s4  ;;  %s3461_s4 = smov [#allocation2]  }
 0x593   : > { %p3341_p0 = pneg %p3340_p13  ;;  %s3342_s23 = sshll.u32 %s3461_s4, 4  ;;  %s3343_s23 = int_to_ptr.vmem [resolvable:$false] %s3342_s23 }
 0x594   : > { %s3344_s0 = scalar_lea.vmem %s3343_s23, 512  ;;  %p3345_p1 = scmp.lt.s32.totalorder %s4282_s17, %s3343_s23 }
 0x595   : > { %v2212_v8 = vpop.permute.xlu0 %2211  ;;  %p3346_p2 = scmp.lt.s32.totalorder %s3344_s0, %s3338_s24 }
 0x597   : > { %p3347_p3 = por %p3346_p2, %p3345_p1 }
 0x599   : > { %p3348_p5 = pnand %p3347_p3, %p3341_p0 }
 0x5e7   : > { %v2166_v15 = vpop.permute.xlu1 %2165 }
 0x5e8   : > { %v2218_v63 = vsel %vm937_vm1, %v4165_v5, %v2166_v15 }
 0x5eb   : > { %v2164_v1 = vpop.permute.xlu1 %2163 }
 0x5ec   : > { %v2172_v45 = vpop.permute.xlu0 %2171  ;;  %v2217_v55 = vsel %vm937_vm1, %v4167_v13, %v2164_v1 }
 0x5ed   : > { %v2219_v56 = vsel %vm1121_vm3, %v2217_v55, %v2172_v45 }
 0x5ef   : > { %v2174_v46 = vpop.permute.xlu1 %2173 }
 0x5f0   : > { %v2180_v20 = vpop.permute.xlu0 %2179  ;;  %v2220_v28 = vsel %vm1121_vm3, %v2218_v63, %v2174_v46 }
 0x5f1   : > { %v2221_v14 = vsel %vm2147_vm4, %v2219_v56, %v2180_v20 }
 0x5f2   : > { %v2223_v57 = vsel %vm572_vm0, %v2221_v14, %v2188_v52 }
 0x5f3   : > { %v2225_v10 = vsel %vm2152_vm5, %v2223_v57, %v2196_v7  ;;  %v2182_v26 = vpop.permute.xlu1 %2181 }
 0x5f4   : > { %v2114_v59 = vpop.permute.xlu0 %2113  ;;  %v2227_v13 = vsel %vm2155_vm6, %v2225_v10, %v2204_v53  ;;  %v2222_v3 = vsel %vm2147_vm4, %v2220_v28, %v2182_v26 }
 0x5f5   : > { %v2229_v17 = vsel %vm2158_vm7, %v2227_v13, %v2212_v8  ;;  %v2224_v51 = vsel %vm572_vm0, %v2222_v3, %v2190_v6  ;;  %v2150_v5 = vsel %vm572_vm0, %v2148_v30, %v2114_v59 }
 0x5f6   : > { %3041 = vmatprep.mubr.msk.f32.mxu0 %vm2246_vm8, %v2229_v17  ;;  %v2226_v31 = vsel %vm2152_vm5, %v2224_v51, %v2198_v4 }
 0x5f7   : > { %v2116_v62 = vpop.permute.xlu1 %2115  ;;  %v2228_v39 = vsel %vm2155_vm6, %v2226_v31, %v2206_v54 }
 0x5f8   : > { %v2122_v12 = vpop.permute.xlu0 %2121  ;;  %v2151_v24 = vsel %vm572_vm0, %v2149_v19, %v2116_v62 }
 0x5f9   : > { %v2153_v11 = vsel %vm2152_vm5, %v2150_v5, %v2122_v12 }
 0x5fb   : > { %v2124_v2 = vpop.permute.xlu1 %2123 }
 0x5fc   : > { %v2130_v48 = vpop.permute.xlu0 %2129  ;;  %v2154_v60 = vsel %vm2152_vm5, %v2151_v24, %v2124_v2 }
 0x5fd   : > { %v2156_v21 = vsel %vm2155_vm6, %v2153_v11, %v2130_v48 }
 0x5ff   : > { %v2132_v23 = vpop.permute.xlu1 %2131 }
 0x600   : > { %v2138_v16 = vpop.permute.xlu0 %2137  ;;  %v2157_v35 = vsel %vm2155_vm6, %v2154_v60, %v2132_v23 }
 0x601   : > { %v2159_v22 = vsel %vm2158_vm7, %v2156_v21, %v2138_v16 }
 0x602   : > { %3022 = vmatprep.mubr.msk.f32.mxu1 %vm2246_vm8, %v2159_v22 }
 0x603   : > { %v2140_v38 = vpop.permute.xlu1 %2139 }
 0x604   : > { %v2160_v34 = vsel %vm2158_vm7, %v2157_v35, %v2140_v38  ;;  %v2214_v0 = vpop.permute.xlu0 %2213 }
 0x605   : > { %v2230_v29 = vsel %vm2158_vm7, %v2228_v39, %v2214_v0  ;;  %3023 = vmatmul.mubr.msk.f32.vlgmr.msra.gmra.mrb[36].mxu1 %vm2246_vm8, %v2160_v34 }
 0x606   : > { %3042 = vmatmul.mubr.msk.f32.vlgmr.msra.gmra.mrb[36].mxu0 %vm2246_vm8, %v2230_v29 }
 0x6d8   : > { %v3024_v42 = vpop.f32.mrb[36].mxu1 }
 0x6d9   : > { %v2325_v32 = vadd.f32 %v3024_v42, %v2714_v36  ;;  %v2319_v43 = vpop.f32.mrb[37].mxu1  ;;  %v3043_v44 = vpop.f32.mrb[36].mxu0 }
 0x6da   : > { %v2320_v33 = vadd.f32 %v2714_v36, %v2319_v43  ;;  %v2421_v41 = vadd.f32 %v3043_v44, %v2717_v40  ;;  %v2415_v47 = vpop.f32.mrb[37].mxu0 }
 0x6db   : > { %2425 = vst.msk [vmem:[%s520_s14 + $0x8] sm:$0xff] %vm572_vm0, %v2325_v32  ;;  %v2416_v37 = vadd.f32 %v2717_v40, %v2415_v47 }
 0x6dc   : > { %2424 = vst.msk [vmem:[%s520_s14] sm:$0xff] %vm572_vm0, %v2320_v33  ;;  %2427 = vst.msk [vmem:[%s527_s19 + $0x8] sm:$0xff] %vm572_vm0, %v2421_v41 }
 0x6dd   : > { %2426 = vst.msk [vmem:[%s527_s19] sm:$0xff] %vm572_vm0, %v2416_v37 }
 0x6de   : > { %3351 = shalt.err (!%p3348_p5)
}
 0x6df   : > { %s3352_s14 = scalar_lea.hbm %s4289_s22, 256  ;;  %s3356_s28 = scalar_lea.hbm %s4388_s12, 512 }
 0x6e0   : > { %p3353_p6 = scmp.ne.s32.totalorder %s4289_s22, %s3352_s14  ;;  %p3357_p10 = scmp.lt.u32.totalorder %s4289_s22, %s4388_s12 }
 0x6e1   : > { %p3358_p11 = scmp.lt.u32.totalorder %s3356_s28, %s3352_s14  ;;  %p3360_p13 = scmp.lt.u32.totalorder %s3352_s14, %s4289_s22 }
 0x6e2   : > { %p3354_p7 = pnand %p3353_p6, %p3574_p4 }
 0x6e3   : > { %p3359_p12 = por %p3358_p11, %p3357_p10 }
 0x6e4   : > { %p3355_p9 = pneg %p3354_p7 }
 0x6e5   : > { %p3361_p0 = por %p3360_p13, %p3359_p12 }
 0x6e7   : > { %p3362_p1 = pnand %p3361_p0, %p3355_p9 }
 0x6e9   : > { %3365 = shalt.err (!%p3362_p1)
}
 0x6ea   : > { %s3462_s0 = smov 128   ;;  %s4418_s24 = smov 8  }
 0x6eb   : > { %3128 = dma.vmem_to_hbm [thread:$0]  (%p3574_p4), %s4282_s17, 256, %s4289_s22, %s2429_s27, %s3462_s0, %s3462_s0, %s4418_s24  }
 0x6ec   : > { %s2434_s23 = scalar_lea.sflag [#allocation5], %s4272_s29  ;;  %s3366_s14 = scalar_lea.vmem %s4284_s16, 256 }
 0x6ed   : > { %p3367_p2 = scmp.ne.s32.totalorder %s4284_s16, %s3366_s14  ;;  %s3463_s19 = smov [#allocation4]  }
 0x6ee   : > { %s3370_s15 = sshll.u32 %s3463_s19, 4  ;;  %s3371_s15 = int_to_ptr.vmem [resolvable:$false] %s3370_s15 }
 0x6ef   : > { %p3368_p3 = pnand %p3367_p2, %p3574_p4  ;;  %s3372_s28 = scalar_lea.vmem %s3371_s15, 512 }
 0x6f0   : > { %p3373_p6 = scmp.lt.s32.totalorder %s4284_s16, %s3371_s15  ;;  %p3374_p7 = scmp.lt.s32.totalorder %s3372_s28, %s3366_s14 }
 0x6f1   : > { %p3369_p5 = pneg %p3368_p3 }
 0x6f2   : > { %p3375_p9 = por %p3374_p7, %p3373_p6 }
 0x6f4   : > { %p3376_p10 = pnand %p3375_p9, %p3369_p5 }
 0x6f6   : > { %3379 = shalt.err (!%p3376_p10)
}
 0x6f7   : > { %s3380_s17 = scalar_lea.hbm %s4295_s5, 256  ;;  %s3384_s21 = scalar_lea.hbm %s4389_s13, 512 }
 0x6f8   : > { %p3381_p11 = scmp.ne.s32.totalorder %s4295_s5, %s3380_s17  ;;  %p3385_p0 = scmp.lt.u32.totalorder %s4295_s5, %s4389_s13 }
 0x6f9   : > { %p3386_p1 = scmp.lt.u32.totalorder %s3384_s21, %s3380_s17  ;;  %p3388_p3 = scmp.lt.u32.totalorder %s3380_s17, %s4295_s5 }
 0x6fa   : > { %p3382_p12 = pnand %p3381_p11, %p3574_p4 }
 0x6fb   : > { %p3387_p2 = por %p3386_p1, %p3385_p0 }
 0x6fc   : > { %p3383_p13 = pneg %p3382_p12 }
 0x6fd   : > { %p3389_p5 = por %p3388_p3, %p3387_p2 }
 0x6ff   : > { %p3390_p6 = pnand %p3389_p5, %p3383_p13 }
 0x701   : > { %3393 = shalt.err (!%p3390_p6)
}
 0x702   : > { %3129 = dma.vmem_to_hbm [thread:$0]  (%p3574_p4), %s4284_s16, 256, %s4295_s5, %s2434_s23, %s3462_s0, %s3462_s0, %s4418_s24  }
 0x703 PF: > { %p3139_p7 = scmp.ge.s32.totalorder %s3448_s30, 2  ;;  %s2482_s14 = sand.u32 1, %s3428_s25  }
 0x704   : > { %s2483_s15 = scalar_lea.sflag [#allocation3], %s2482_s14 }
 0x705   : > { %p3133_p9 = pnand %p3139_p7, %p3581_p8 }
 0x707   : > { %3419 = dma.done.wait (!%p3133_p9), %s2483_s15, 256  }
 0x708   : > { %3421 = vsyncadd (!%p3133_p9), %s2483_s15, 4294967040  ;;  %s2492_s18 = scalar_lea.sflag [#allocation5], %s2482_s14 }
 0x709   : > { %3423 = dma.done.wait (!%p3133_p9), %s2492_s18, 256  }
 0x70a   : > { %3425 = vsyncadd (!%p3133_p9), %s2492_s18, 4294967040  ;;  %s30_s30 = sadd.s32 1, %s3448_s30   ;;  %s4419_s29 = sld [smem:[#allocation8_spill]] }
 0x70b   : > { %p27_p10 = scmp.ge.s32.totalorder %s30_s30, 4   ;;  %s4420_s27 = sld [smem:[#allocation11_spill]] }
 0x70c   : > { %s4421_s28 = sld [smem:[#allocation9_spill]]  ;;  %s4422_s16 = sld [smem:[#allocation10_spill]] }
 0x70d   : > { %s4423_s25 = smov %s3432_s26  ;;  %29 = sbr.rel (!%p27_p10) target bundleno = 10 (0xa), region = 129 }
 0x710   : > { %s4424_s26 = smov %s4419_s29 }
 0x712   : > { %s4425_s29 = smov %s4422_s16 }
 0x714   :  { %2497 = vsyncpa [#allocation3], 1 }
 0x715   :  { %2499 = vsyncpa [#allocation3 + $0x1], 1 }
 0x716   :  { %2500 = vsyncpa [#allocation5], 1 }
 0x717   :  { %2502 = vsyncpa [#allocation5 + $0x1], 1 }

// kernel: tpu_custom_call.1
= control target key start
LH: loop header
LB: loop body
LE: loop exit
PB: predicated region body
PF: predicated region fallthrough
CT: control target
= control target key end

     0   :  { %s4376_s0 = inlined_call_operand.vmem [shape: f32[2,16,32], index: 0, kind: input, shape index: {}]   ;;  %s4377_s1 = inlined_call_operand.vmem [shape: f32[2,16,32], index: 1, kind: input, shape index: {}]   ;;  %s4378_s2 = inlined_call_operand.vmem [shape: f32[2,16,32], index: 2, kind: input, shape index: {}]   ;;  %s4379_s3 = inlined_call_operand.vmem [shape: f32[2,16,32], index: 3, kind: input, shape index: {}]   ;;  %s4380_s4 = inlined_call_operand.vmem [shape: f32[32,64], index: 4, kind: input, shape index: {}]   ;;  %s4381_s5 = inlined_call_operand.vmem [shape: f32[32,64], index: 5, kind: input, shape index: {}]   ;;  %s4382_s6 = inlined_call_operand.vmem [shape: f32[32,16], index: 6, kind: input, shape index: {}]   ;;  %s4383_s7 = inlined_call_operand.vmem [shape: f32[32,16], index: 7, kind: input, shape index: {}]   ;;  %s4384_s8 = inlined_call_operand.vmem [shape: f32[64,32], index: 8, kind: input, shape index: {}]   ;;  %s4385_s9 = inlined_call_operand.vmem [shape: f32[1,32], index: 9, kind: input, shape index: {}]   ;;  %s4386_s10 = inlined_call_operand.vmem [shape: f32[64,32], index: 10, kind: input, shape index: {}]   ;;  %s4387_s11 = inlined_call_operand.vmem [shape: f32[1,32], index: 11, kind: input, shape index: {}]   ;;  %s4388_s12 = inlined_call_operand.hbm [shape: f32[2,16,32], index: 12, kind: output, shape index: {0}]   ;;  %s4389_s13 = inlined_call_operand.hbm [shape: f32[2,16,32], index: 13, kind: output, shape index: {1}]  }
   0x1   :  { %4401 = sst [smem:[#allocation12_spill]] %s4376_s0 }
   0x2   :  { %4402 = sst [smem:[#allocation13_spill]] %s4380_s4 }
   0x3   :  { %4403 = sst [smem:[#allocation14_spill]] %s4381_s5 }
   0x4   :  { %19 = vsyncpa [#allocation3], 0 }
   0x5   :  { %21 = vsyncpa [#allocation3 + $0x1], 0 }
   0x6   :  { %22 = vsyncpa [#allocation5], 0 }
   0x7   :  { %24 = vsyncpa [#allocation5 + $0x1], 0  ;;  %s3534_s25 = smov 0   ;;  %s3536_s26 = smov 0  }
   0x8   :  { %s3538_s27 = smov 0   ;;  %s3540_s28 = smov 0  }
   0x9   :  { %s3542_s29 = smov 0   ;;  %s3544_s30 = smov 0  }
   0xa LB: > { %4404 = sst [smem:[#allocation8_spill]] %s3436_s27  ;;  %s2623_s14 = sadd.s32 4294967295, %s3448_s30   ;;  %s3448_s30 = sphi %s3544_s30, %s30_s30   ;;  %s3444_s29 = sphi %s3542_s29, %s4425_s29   ;;  %s3440_s28 = sphi %s3540_s28, %s4421_s28   ;;  %s3436_s27 = sphi %s3538_s27, %s4420_s27   ;;  %s3432_s26 = sphi %s3536_s26, %s4424_s26   ;;  %s3428_s25 = sphi %s3534_s25, %s4423_s25  }
   0xb   : > { %4405 = sst [smem:[#allocation9_spill]] %s3444_s29  ;;  %s2624_s15 = sadd.s32 4294967294, %s3448_s30  }
   0xc   : > { %s42_s16 = sadd.s32 1, %s3444_s29  ;;  %s327_s17 = sadd.s32 1, %s3436_s27 }
   0xd   : > { %p44_p0 = scmp.ge.s32.totalorder %s42_s16, 2  ;;  %p337_p1 = scmp.ne.s32.totalorder %s3436_s27, %s3432_s26 }
   0xe   : > { %p338_p2 = scmp.eq.s32.totalorder %s2623_s14, 1  ;;  %p343_p3 = scmp.ne.s32.totalorder %s3432_s26, %s3428_s25 }
   0xf   : > { %s4427_s16 = smov (%p44_p0, %s42_s16), 0  ;;  %p344_p5 = scmp.eq.s32.totalorder %s2624_s15, 1 }
  0x10   : > { %4406 = sst [smem:[#allocation10_spill]] %s4427_s16  ;;  %p3574_p4 = por %p338_p2, %p337_p1 }
  0x11   : > { %s322_s19 = ssub.s32 %s3444_s29, %s4427_s16  ;;  %p2627_p6 = scmp.ge.s32.totalorder %s3448_s30, 1 }
  0x12   : > { %p325_p7 = scmp.eq.s32.totalorder %s322_s19, 0  ;;  %p3581_p8 = por %p344_p5, %p343_p3 }
  0x13   : > { %p456_p9 = scmp.lt.s32.totalorder %s3448_s30, 3 }
  0x14   : > { %s3587_s21 = scalar_select %p325_p7, %s3436_s27, %s327_s17  }
  0x15   : > { %p457_p10 = pnand %p2627_p6, %p456_p9 }
  0x16   : > { %4409 = sst [smem:[#allocation11_spill]] %s3587_s21  ;;  %s4410_s4 = sld [smem:[#allocation13_spill]] (!%p457_p10)  ;;  %v739_v6 = vld [vmem:[%s4382_s6] sm:$0xff] (!%p457_p10)  ;;  %v740_v7 = vld [vmem:[%s4382_s6 + $0x8] sm:$0xff] (!%p457_p10)  ;;  %vm572_vm0 = vcmask (!%p457_p10), 261120   ;;  %v741_v16 = vld [vmem:[%s4382_s6 + $0x10] sm:$0xff] (!%p457_p10) }
  0x17   : > { %460 = sbr.rel (%p457_p10) target bundleno = 1795 (0x703), region = 68  ;;  %p529_p11 = scmp.lt.s32.totalorder (!%p457_p10), %s3440_s28, 1  ;;  %v3060_v14 = vpack.c.bf16 (!%p457_p10), %v740_v7, %v739_v6  ;;  %v742_v17 = vld [vmem:[%s4382_s6 + $0x18] sm:$0xff] (!%p457_p10)  ;;  %vm937_vm1 = vcmask (!%p457_p10), 64512   ;;  %v824_v33 = vld [vmem:[%s4383_s7] sm:$0xff] (!%p457_p10)  ;;  %v825_v34 = vld [vmem:[%s4383_s7 + $0x8] sm:$0xff] (!%p457_p10) }
  0x18   : > { %s4411_s5 = sld [smem:[#allocation14_spill]] (!%p457_p10)  ;;  %s4412_s0 = sld [smem:[#allocation12_spill]] (!%p457_p10)  ;;  %v3064_v20 = vpack.c.bf16 (!%p457_p10), %v742_v17, %v741_v16  ;;  %vm3669_vm2 = vmpackc.low (!%p457_p10), %vm937_vm1, %vm937_vm1  ;;  %v826_v35 = vld [vmem:[%s4383_s7 + $0x10] sm:$0xff] (!%p457_p10)  ;;  %v3068_v36 = vpack.c.bf16 (!%p457_p10), %v825_v34, %v824_v33  ;;  %v827_v37 = vld [vmem:[%s4383_s7 + $0x18] sm:$0xff] (!%p457_p10)  ;;  %vm1121_vm3 = vcmask (!%p457_p10), 130048   ;;  %vm2147_vm4 = vcmask (!%p457_p10), 195584  }
  0x19   : > { %s4393_s23 = smov (!%p457_p10), 120   ;;  %v3072_v39 = vpack.c.bf16 (!%p457_p10), %v827_v37, %v826_v35  ;;  %s3455_s14 = smov (!%p457_p10), 16   ;;  %vm2152_vm5 = vcmask (!%p457_p10), 326656   ;;  %vm2155_vm6 = vcmask (!%p457_p10), 392192   ;;  %vm2158_vm7 = vcmask (!%p457_p10), 457728  }
  0x1a   : > { %s3456_s15 = smov (!%p457_p10), 24   ;;  %s4397_s19 = smov (!%p457_p10), 48   ;;  %vm2246_vm8 = vcmask (!%p457_p10), 523264  }
  0x1b   : > { %s4395_s16 = smov (!%p457_p10), 56  }
  0x1c   : > { %v568_v0 = vld [vmem:[%s4410_s4] sm:$0xff] (!%p457_p10)  ;;  %v569_v1 = vld [vmem:[%s4410_s4 + $0x8] sm:$0xff] (!%p457_p10)  ;;  %v570_v2 = vld [vmem:[%s4410_s4 + $0x10] sm:$0xff] (!%p457_p10) }
  0x1d   : > { %v3044_v3 = vpack.c.bf16 (!%p457_p10), %v569_v1, %v568_v0  ;;  %v571_v4 = vld [vmem:[%s4410_s4 + $0x18] sm:$0xff] (!%p457_p10)  ;;  %s3457_s4 = smov (!%p457_p10), 32  }
  0x1e   : > { %v3048_v5 = vpack.c.bf16 %v571_v4, %v570_v2  ;;  %s530_s29 = scalar_select %p529_p11, %s3440_s28, 1  ;;  %v654_v8 = vld [vmem:[%s4411_s5] sm:$0xff]  ;;  %v655_v9 = vld [vmem:[%s4411_s5 + $0x8] sm:$0xff]  ;;  %v656_v10 = vld [vmem:[%s4411_s5 + $0x10] sm:$0xff] }
  0x1f   : > { %3045 = vmatprep.subr.bf16.mxu0 %v3044_v3  ;;  %v657_v11 = vld [vmem:[%s4411_s5 + $0x18] sm:$0xff]  ;;  %v3052_v12 = vpack.c.bf16 %v655_v9, %v654_v8  ;;  %s3450_s5 = smov 112  }
  0x20   : > { %3047 = vmatpush3.bf16.msra.mxu0 %v3044_v3  ;;  %s3621_s27 = sshll.u32 %s530_s29, 4  ;;  %v3056_v13 = vpack.c.bf16 %v657_v11, %v656_v10  ;;  %s3458_s29 = smov 40  }
  0x21   : > { %3049 = vmatprep.subr.bf16.mxu0 %v3048_v5  ;;  %s536_s24 = scalar_lea.vmem %s4412_s0, %s3621_s27  ;;  %3053 = vmatprep.subr.bf16.mxu1 %v3052_v12  ;;  %s552_s17 = scalar_lea.vmem %s4378_s2, %s3621_s27 }
  0x22   : > { %v560_v15 = vld [vmem:[%s536_s24] sm:$0xff]  ;;  %s546_s21 = scalar_lea.vmem %s4377_s1, %s3621_s27  ;;  %3055 = vmatpush3.bf16.msra.mxu1 %v3052_v12  ;;  %v561_v19 = vld [vmem:[%s536_s24 + $0x8] sm:$0xff]  ;;  %s3452_s24 = smov 104  }
  0x23   : > { %2858 = vmatprep.mubr.msk.f32.mxu0 %vm572_vm0, %v560_v15  ;;  %v562_v18 = vld [vmem:[%s546_s21] sm:$0xff]  ;;  %3057 = vmatprep.subr.bf16.mxu1 %v3056_v13  ;;  %v563_v22 = vld [vmem:[%s546_s21 + $0x8] sm:$0xff]  ;;  %s557_s21 = scalar_lea.vmem %s4379_s3, %s3621_s27  ;;  %s4415_s27 = smov 120  }
  0x24   : > { %3051 = vmatpush3.bf16.msra.mxu0 %v3048_v5  ;;  %v564_v21 = vld [vmem:[%s552_s17] sm:$0xff]  ;;  %2869 = vmatprep.mubr.msk.f32.mxu1 %vm572_vm0, %v562_v18  ;;  %v565_v23 = vld [vmem:[%s552_s17 + $0x8] sm:$0xff] }
  0x25   : > { %3061 = vmatprep.subr.bf16.mxu0 %v3060_v14  ;;  %v566_v38 = vld [vmem:[%s557_s21] sm:$0xff]  ;;  %v567_v40 = vld [vmem:[%s557_s21 + $0x8] sm:$0xff] }
  0x26   : > { %3059 = vmatpush3.bf16.msra.mxu1 %v3056_v13 }
  0x27   : > { %2859 = vmatmul.mubr.msk.f32.vlgmr.msra.gmra.mrb[0].mxu0 %vm572_vm0, %v561_v19  ;;  %3069 = vmatprep.subr.bf16.mxu1 %v3068_v36 }
  0x28   : > { %3063 = vmatpush3.bf16.msra.mxu0 %v3060_v14  ;;  %2880 = vmatprep.mubr.msk.f32.mxu0 %vm572_vm0, %v564_v21 }
  0x29   : > { %3065 = vmatprep.subr.bf16.mxu0 %v3064_v20  ;;  %2870 = vmatmul.mubr.msk.f32.vlgmr.msra.gmra.mrb[0].mxu1 %vm572_vm0, %v563_v22 }
  0x2a   : > { %2891 = vmatprep.mubr.msk.f32.mxu1 %vm572_vm0, %v566_v38  ;;  %3071 = vmatpush3.bf16.msra.mxu1 %v3068_v36 }
  0x2b   : > { %3073 = vmatprep.subr.bf16.mxu1 %v3072_v39 }
  0x2c   : > { %3067 = vmatpush3.bf16.msra.mxu0 %v3064_v20 }
  0x2e   : > { %3075 = vmatpush3.bf16.msra.mxu1 %v3072_v39 }
  0x2f   : > { %2881 = vmatmul.mubr.msk.f32.vlgmr.msra.gmra.mrb[2].mxu0 %vm572_vm0, %v565_v23 }
  0x31   : > { %2892 = vmatmul.mubr.msk.f32.vlgmr.msra.gmra.mrb[2].mxu1 %vm572_vm0, %v567_v40 }
  0xfa   : > { %v3647_v24 = vpop.f32.mrb[0].mxu0 }
  0xfb   : > { %v3649_v25 = vpop.f32.mrb[1].mxu0 }
  0xfc   : > { %915 = vrot.lane.b32.xlu1 %v3649_v25, %s3450_s5  ;;  %911 = vrot.lane.b32.xlu0 %v3649_v25, %s4393_s23  ;;  %v3656_v26 = vpop.f32.mrb[0].mxu1 }
  0xfd   : > { %2898 = vmatprep.mubr.msk.f32.mxu0 %vm937_vm1, %v3649_v25  ;;  %v3658_v27 = vpop.f32.mrb[1].mxu1 }
 0x100   : > { %917 = vrot.lane.b32.xlu1 %v3647_v24, %s3450_s5  ;;  %913 = vrot.lane.b32.xlu0 %v3647_v24, %s4393_s23 }
 0x102   : > { %v3663_v28 = vpop.f32.mrb[2].mxu0 }
 0x103   : > { %v3665_v29 = vpop.f32.mrb[3].mxu0 }
 0x104   : > { %v3200_v31 = vpack.i.bf16 %v3663_v28, %v3665_v29  ;;  %v3076_v32 = vpack.c.bf16 %v3663_v28, %v3665_v29  ;;  %921 = vrot.lane.b32.xlu1 %v3647_v24, %s3452_s24  ;;  %919 = vrot.lane.b32.xlu0 %v3649_v25, %s3452_s24 }
 0x106   : > { %3078 = vmatprep.subr.msk.bf16.mxu0 %vm3669_vm2, %v3076_v32 }
 0x107   : > { %3081 = vmatpush3.bf16.xpose.msk.msra.mxu0 %vm3669_vm2, %v3076_v32 }
 0x108   : > { %927 = vrot.lane.b32.xlu1 %v3656_v26, %s4393_s23  ;;  %925 = vrot.lane.b32.xlu0 %v3658_v27, %s4393_s23  ;;  %s3453_s23 = smov 96  }
 0x10c   : > { %931 = vrot.lane.b32.xlu1 %v3656_v26, %s3450_s5  ;;  %929 = vrot.lane.b32.xlu0 %v3658_v27, %s3450_s5 }
 0x10e   : > { %2899 = vmatmul.mubr.msk.f32.vlgmr.msra.gmra.mrb[4].mxu0 %vm937_vm1, %v3647_v24 }
 0x110   : > { %935 = vrot.lane.b32.xlu1 %v3656_v26, %s3452_s24  ;;  %933 = vrot.lane.b32.xlu0 %v3658_v27, %s3452_s24  ;;  %s4399_s24 = smov 8  }
 0x16e   : > { %v3710_v41 = vpop.permute.xlu1 %915  ;;  %v3712_v42 = vpop.permute.xlu0 %911 }
 0x16f   : > { %2901 = vmatprep.mubr.msk.f32.mxu0 %vm937_vm1, %v3712_v42 }
 0x172   : > { %v3717_v43 = vpop.permute.xlu0 %913  ;;  %v3721_v44 = vpop.permute.xlu1 %917 }
 0x173   : > { %2902 = vmatmul.mubr.msk.f32.gmra.mrb[6].mxu0 %vm937_vm1, %v3717_v43 }
 0x174   : > { %2904 = vmatprep.mubr.msk.f32.mxu0 %vm937_vm1, %v3710_v41 }
 0x176   : > { %v3725_v45 = vpop.permute.xlu0 %919  ;;  %v3731_v46 = vpop.permute.xlu1 %921 }
 0x177   : > { %2905 = vmatmul.mubr.msk.f32.gmra.mrb[8].mxu0 %vm937_vm1, %v3721_v44 }
 0x178   : > { %2907 = vmatprep.mubr.msk.f32.mxu0 %vm937_vm1, %v3725_v45 }
 0x17a   : > { %v3735_v47 = vpop.permute.xlu0 %925  ;;  %v3739_v48 = vpop.permute.xlu1 %927 }
 0x17b   : > { %2908 = vmatmul.mubr.msk.f32.gmra.mrb[10].mxu0 %vm937_vm1, %v3731_v46 }
 0x17c   : > { %2910 = vmatprep.mubr.msk.f32.mxu0 %vm937_vm1, %v3658_v27 }
 0x17e   : > { %v3745_v49 = vpop.permute.xlu0 %929  ;;  %v3749_v50 = vpop.permute.xlu1 %931 }
 0x17f   : > { %2911 = vmatmul.mubr.msk.f32.gmra.mrb[12].mxu0 %vm937_vm1, %v3656_v26 }
 0x180   : > { %2913 = vmatprep.mubr.msk.f32.mxu0 %vm937_vm1, %v3735_v47 }
 0x182   : > { %v3753_v51 = vpop.permute.xlu0 %933  ;;  %v3759_v52 = vpop.permute.xlu1 %935 }
 0x183   : > { %2914 = vmatmul.mubr.msk.f32.gmra.mrb[14].mxu0 %vm937_vm1, %v3739_v48 }
 0x184   : > { %2916 = vmatprep.mubr.msk.f32.mxu0 %vm937_vm1, %v3745_v49 }
 0x187   : > { %2917 = vmatmul.mubr.msk.f32.gmra.mrb[16].mxu0 %vm937_vm1, %v3749_v50 }
 0x188   : > { %2919 = vmatprep.mubr.msk.f32.mxu0 %vm937_vm1, %v3753_v51 }
 0x18b   : > { %2920 = vmatmul.mubr.msk.f32.gmra.mrb[18].mxu0 %vm937_vm1, %v3759_v52 }
 0x1e1   : > { %v3763_v53 = vpop.f32.mrb[4].mxu0 }
 0x1e2   : > { %v1042_v54 = vpop.f32.mrb[5].mxu0  ;;  %v1125_v55 = vsel %vm1121_vm3, %v3763_v53, -inf }
 0x1e3   : > { %1126 = vmax.xlane.f32.xlu1 %v1125_v55  ;;  %v1122_v56 = vsel %vm1121_vm3, %v1042_v54, -inf }
 0x1e4   : > { %1123 = vmax.xlane.f32.xlu0 %v1122_v56 }
 0x246   : > { %v3768_v57 = vpop.f32.mrb[6].mxu0 }
 0x247   : > { %v3770_v58 = vpop.f32.mrb[7].mxu0  ;;  %v1131_v59 = vsel %vm1121_vm3, %v3768_v57, -inf }
 0x248   : > { %1132 = vmax.xlane.f32.xlu0 %v1131_v59  ;;  %v1128_v62 = vsel %vm1121_vm3, %v3770_v58, -inf }
 0x24a   : > { %v3774_v60 = vpop.f32.mrb[8].mxu0 }
 0x24b   : > { %v3776_v61 = vpop.f32.mrb[9].mxu0  ;;  %v1137_v2 = vsel %vm1121_vm3, %v3774_v60, -inf }
 0x24c   : > { %1129 = vmax.xlane.f32.xlu0 %v1128_v62  ;;  %v1134_v63 = vsel %vm1121_vm3, %v3776_v61, -inf }
 0x24d   : > { %1135 = vmax.xlane.f32.xlu1 %v1134_v63 }
 0x24e   : > { %v3782_v0 = vpop.f32.mrb[10].mxu0 }
 0x24f   : > { %v3784_v1 = vpop.f32.mrb[11].mxu0  ;;  %v1143_v6 = vsel %vm1121_vm3, %v3782_v0, -inf }
 0x250   : > { %1138 = vmax.xlane.f32.xlu0 %v1137_v2  ;;  %v1140_v3 = vsel %vm1121_vm3, %v3784_v1, -inf }
 0x251   : > { %1141 = vmax.xlane.f32.xlu1 %v1140_v3 }
 0x252   : > { %v3790_v4 = vpop.f32.mrb[12].mxu0 }
 0x253   : > { %v3792_v5 = vpop.f32.mrb[13].mxu0  ;;  %v1149_v10 = vsel %vm1121_vm3, %v3790_v4, -inf }
 0x254   : > { %1144 = vmax.xlane.f32.xlu0 %v1143_v6  ;;  %v1146_v7 = vsel %vm1121_vm3, %v3792_v5, -inf }
 0x255   : > { %1147 = vmax.xlane.f32.xlu1 %v1146_v7 }
 0x256   : > { %v3798_v8 = vpop.f32.mrb[14].mxu0 }
 0x257   : > { %v3800_v9 = vpop.f32.mrb[15].mxu0  ;;  %v1155_v14 = vsel %vm1121_vm3, %v3798_v8, -inf }
 0x258   : > { %1150 = vmax.xlane.f32.xlu0 %v1149_v10  ;;  %v1152_v11 = vsel %vm1121_vm3, %v3800_v9, -inf }
 0x259   : > { %1153 = vmax.xlane.f32.xlu1 %v1152_v11 }
 0x25a   : > { %v3806_v12 = vpop.f32.mrb[16].mxu0 }
 0x25b   : > { %v3808_v13 = vpop.f32.mrb[17].mxu0  ;;  %v1161_v15 = vsel %vm1121_vm3, %v3806_v12, -inf }
 0x25c   : > { %1156 = vmax.xlane.f32.xlu0 %v1155_v14  ;;  %v1158_v18 = vsel %vm1121_vm3, %v3808_v13, -inf }
 0x25d   : > { %1162 = vmax.xlane.f32.xlu1 %v1161_v15 }
 0x25e   : > { %v3814_v16 = vpop.f32.mrb[18].mxu0 }
 0x25f   : > { %v3816_v17 = vpop.f32.mrb[19].mxu0  ;;  %v1167_v19 = vsel %vm1121_vm3, %v3814_v16, -inf }
 0x260   : > { %v1164_v20 = vsel %vm1121_vm3, %v3816_v17, -inf }
 0x261   : > { %1159 = vmax.xlane.f32.xlu1 %v1158_v18 }
 0x265   : > { %1168 = vmax.xlane.f32.xlu1 %v1167_v19 }
 0x269   : > { %1165 = vmax.xlane.f32.xlu1 %v1164_v20 }
 0x271   : > { %v1124_v21 = vpop.xlane.xlu0 %1123 }
 0x272   : > { %v1170_v22 = vsub.f32 %v1042_v54, %v1124_v21  ;;  %3201 = vrot.lane.b32.xlu0 %v3200_v31, %s4415_s27  ;;  %v1127_v31 = vpop.xlane.xlu1 %1126 }
 0x273   : > { %v1171_v38 = vsub.f32 %v3763_v53, %v1127_v31 }
 0x274   : > { %v1186_v23 = vmul.f32 1.442695, %v1170_v22 }
 0x276   : > { %3210 = vpow2.f32 %v1186_v23  ;;  %1499 = vrot.lane.b32.xlu0 %v3656_v26, %s3453_s23  ;;  %v3841_v26 = vpop.f32.mrb[2].mxu1 }
 0x27a   : > { %1501 = vrot.lane.b32.xlu0 %v3735_v47, %s3453_s23  ;;  %1497 = vrot.lane.b32.xlu1 %v3658_v27, %s3453_s23  ;;  %v3843_v27 = vpop.f32.mrb[3].mxu1 }
 0x27b   : > { %v3205_v28 = vpack.i.bf16 %v3841_v26, %v3843_v27  ;;  %v3849_v29 = vpack.c.bf16 %v3841_v26, %v3843_v27 }
 0x27e   : > { %1503 = vrot.lane.b32.xlu0 %v3739_v48, %s3453_s23  ;;  %1505 = vrot.lane.b32.xlu1 %v3745_v49, %s3453_s23 }
 0x280   : > { %v3833_v32 = vpop.eup %3210 }
 0x281   : > { %2926 = vmatprep.mubr.msk.f32.mxu1 %vm1121_vm3, %v3833_v32 }
 0x282   : > { %1507 = vrot.lane.b32.xlu0 %v3749_v50, %s3453_s23  ;;  %1509 = vrot.lane.b32.xlu1 %v3753_v51, %s3453_s23 }
 0x286   : > { %1511 = vrot.lane.b32.xlu0 %v3759_v52, %s3453_s23  ;;  %1513 = vrot.lane.b32.xlu1 %v3649_v25, %s3453_s23 }
 0x28a   : > { %1515 = vrot.lane.b32.xlu0 %v3647_v24, %s3453_s23  ;;  %1517 = vrot.lane.b32.xlu1 %v3712_v42, %s3453_s23  ;;  %v1188_v42 = vmul.f32 1.442695, %v1171_v38 }
 0x28c   : > { %3212 = vpow2.f32 %v1188_v42 }
 0x28e   : > { %1519 = vrot.lane.b32.xlu0 %v3717_v43, %s3453_s23  ;;  %1521 = vrot.lane.b32.xlu1 %v3710_v41, %s3453_s23 }
 0x292   : > { %1523 = vrot.lane.b32.xlu0 %v3721_v44, %s3453_s23  ;;  %1525 = vrot.lane.b32.xlu1 %v3725_v45, %s3453_s23 }
 0x296   : > { %1527 = vrot.lane.b32.xlu0 %v3731_v46, %s3453_s23 }
 0x2d5   : > { %v1133_v25 = vpop.xlane.xlu0 %1132 }
 0x2d6   : > { %v1173_v43 = vsub.f32 %v3768_v57, %v1133_v25 }
 0x2d8   : > { %v1192_v48 = vmul.f32 1.442695, %v1173_v43 }
 0x2d9   : > { %v1130_v33 = vpop.xlane.xlu0 %1129 }
 0x2da   : > { %v1136_v34 = vpop.xlane.xlu1 %1135  ;;  %v1172_v39 = vsub.f32 %v3770_v58, %v1130_v33 }
 0x2db   : > { %v1174_v45 = vsub.f32 %v3776_v61, %v1136_v34 }
 0x2dc   : > { %v1190_v44 = vmul.f32 1.442695, %v1172_v39 }
 0x2dd   : > { %v1139_v35 = vpop.xlane.xlu0 %1138  ;;  %v1194_v50 = vmul.f32 1.442695, %v1174_v45 }
 0x2de   : > { %v1142_v36 = vpop.xlane.xlu1 %1141  ;;  %v1175_v49 = vsub.f32 %v3774_v60, %v1139_v35  ;;  %3214 = vpow2.f32 %v1190_v44 }
 0x2df   : > { %v1176_v51 = vsub.f32 %v3784_v1, %v1142_v36  ;;  %3216 = vpow2.f32 %v1192_v48 }
 0x2e0   : > { %v1196_v56 = vmul.f32 1.442695, %v1175_v49  ;;  %3218 = vpow2.f32 %v1194_v50 }
 0x2e1   : > { %v1145_v37 = vpop.xlane.xlu0 %1144  ;;  %v1198_v58 = vmul.f32 1.442695, %v1176_v51 }
 0x2e2   : > { %v1148_v24 = vpop.xlane.xlu1 %1147  ;;  %v1177_v57 = vsub.f32 %v3782_v0, %v1145_v37  ;;  %3220 = vpow2.f32 %v1196_v56  ;;  %v3871_v0 = vpop.eup %3212 }
 0x2e3   : > { %v1178_v59 = vsub.f32 %v3792_v5, %v1148_v24  ;;  %3222 = vpow2.f32 %v1198_v58 }
 0x2e4   : > { %v1200_v60 = vmul.f32 1.442695, %v1177_v57 }
 0x2e5   : > { %v1151_v40 = vpop.xlane.xlu0 %1150  ;;  %v1202_v1 = vmul.f32 1.442695, %v1178_v59 }
 0x2e6   : > { %v1154_v41 = vpop.xlane.xlu1 %1153  ;;  %v1179_v62 = vsub.f32 %v3790_v4, %v1151_v40  ;;  %3224 = vpow2.f32 %v1200_v60 }
 0x2e7   : > { %v1180_v2 = vsub.f32 %v3800_v9, %v1154_v41  ;;  %3226 = vpow2.f32 %v1202_v1 }
 0x2e8   : > { %v3873_v3 = vpop.eup %3214  ;;  %v1204_v5 = vmul.f32 1.442695, %v1179_v62 }
 0x2e9   : > { %v1157_v46 = vpop.xlane.xlu0 %1156  ;;  %v1206_v6 = vmul.f32 1.442695, %v1180_v2  ;;  %v3881_v9 = vpop.eup %3216 }
 0x2ea   : > { %v1163_v47 = vpop.xlane.xlu1 %1162  ;;  %v1181_v4 = vsub.f32 %v3798_v8, %v1157_v46  ;;  %v3883_v11 = vpop.eup %3218  ;;  %3228 = vpow2.f32 %v1204_v5 }
 0x2eb   : > { %v1183_v15 = vsub.f32 %v3806_v12, %v1163_v47  ;;  %3230 = vpow2.f32 %v1206_v6 }
 0x2ec   : > { %v1208_v14 = vmul.f32 1.442695, %v1181_v4 }
 0x2ed   : > { %v3202_v52 = vpop.permute.xlu0 %3201  ;;  %v1212_v12 = vmul.f32 1.442695, %v1183_v15 }
 0x2ee   : > { %v3204_v53 = vunpack.i.h.bf16 %v3202_v52  ;;  %v3203_v54 = vunpack.i.l.bf16 %v3202_v52  ;;  %v1160_v55 = vpop.xlane.xlu1 %1159  ;;  %3232 = vpow2.f32 %v1208_v14 }
 0x2ef   : > { %v1182_v7 = vsub.f32 %v3808_v13, %v1160_v55  ;;  %v3894_v13 = vpop.eup %3220 }
 0x2f0   : > { %v3082_v61 = vpack.c.bf16 %v3204_v53, %v3203_v54  ;;  %v3896_v19 = vpop.eup %3222 }
 0x2f1   : > { %v1210_v8 = vmul.f32 1.442695, %v1182_v7  ;;  %v3903_v21 = vpop.eup %3224  ;;  %v1500_v30 = vpop.permute.xlu0 %1499  ;;  %v1236_v26 = vsel %vm1121_vm3, %v3896_v19, 0.0 }
 0x2f2   : > { %3083 = vmatprep.subr.bf16.mxu1 %v3082_v61  ;;  %v1169_v63 = vpop.xlane.xlu1 %1168  ;;  %v3905_v22 = vpop.eup %3226  ;;  %v1239_v27 = vsel %vm1121_vm3, %v3903_v21, 0.0 }
 0x2f3   : > { %3085 = vmatpush3.bf16.msra.mxu1 %v3082_v61  ;;  %v1185_v20 = vsub.f32 %v3814_v16, %v1169_v63  ;;  %3234 = vpow2.f32 %v1210_v8 }
 0x2f4   : > { %3088 = vmatprep.subr.msk.bf16.mxu1 %vm3669_vm2, %v3849_v29  ;;  %3236 = vpow2.f32 %v1212_v12  ;;  %v3911_v16 = vpop.eup %3228 }
 0x2f5   : > { %v1216_v23 = vmul.f32 1.442695, %v1185_v20  ;;  %v1502_v25 = vpop.permute.xlu0 %1501 }
 0x2f6   : > { %2927 = vmatmul.mubr.msk.f32.vlgmr.msra.gmra.mrb[4].mxu1 %vm1121_vm3, %v3871_v0  ;;  %v1166_v10 = vpop.xlane.xlu1 %1165 }
 0x2f7   : > { %2929 = vmatprep.mubr.msk.f32.mxu1 %vm1121_vm3, %v3873_v3  ;;  %v1184_v18 = vsub.f32 %v3816_v17, %v1166_v10 }
 0x2f9   : > { %v1214_v17 = vmul.f32 1.442695, %v1184_v18  ;;  %v1504_v36 = vpop.permute.xlu0 %1503 }
 0x2fa   : > { %2930 = vmatmul.mubr.msk.f32.gmra.mrb[6].mxu1 %vm1121_vm3, %v3881_v9  ;;  %v1498_v34 = vpop.permute.xlu1 %1497 }
 0x2fb   : > { %2932 = vmatprep.mubr.msk.f32.mxu1 %vm1121_vm3, %v3883_v11  ;;  %3238 = vpow2.f32 %v1214_v17 }
 0x2fc   : > { %3091 = vmatpush3.bf16.xpose.msk.msra.mxu1 %vm3669_vm2, %v3849_v29  ;;  %v3913_v29 = vpop.eup %3230  ;;  %3240 = vpow2.f32 %v1216_v23 }
 0x2fd   : > { %v3919_v31 = vpop.eup %3232  ;;  %v1508_v39 = vpop.permute.xlu0 %1507 }
 0x2fe   : > { %2933 = vmatmul.mubr.msk.f32.gmra.mrb[8].mxu1 %vm1121_vm3, %v3894_v13  ;;  %v3921_v33 = vpop.eup %3234  ;;  %v1506_v24 = vpop.permute.xlu1 %1505 }
 0x2ff   : > { %2935 = vmatprep.mubr.msk.f32.mxu1 %vm1121_vm3, %v3896_v19  ;;  %v3927_v35 = vpop.eup %3236  ;;  %v1248_v19 = vsel %vm1121_vm3, %v3913_v29, 0.0 }
 0x301   : > { %v1512_v41 = vpop.permute.xlu0 %1511 }
 0x302   : > { %2936 = vmatmul.mubr.msk.f32.gmra.mrb[10].mxu1 %vm1121_vm3, %v3903_v21  ;;  %v1510_v40 = vpop.permute.xlu1 %1509  ;;  %v1218_v21 = vsel %vm1121_vm3, %v3833_v32, 0.0 }
 0x303   : > { %2938 = vmatprep.mubr.msk.f32.mxu1 %vm1121_vm3, %v3905_v22 }
 0x305   : > { %v3929_v37 = vpop.eup %3238  ;;  %v1516_v43 = vpop.permute.xlu0 %1515 }
 0x306   : > { %2939 = vmatmul.mubr.msk.f32.gmra.mrb[12].mxu1 %vm1121_vm3, %v3911_v16  ;;  %v3935_v38 = vpop.eup %3240  ;;  %v1514_v42 = vpop.permute.xlu1 %1513 }
 0x307   : > { %2941 = vmatprep.mubr.msk.f32.mxu1 %vm1121_vm3, %v3913_v29 }
 0x309   : > { %v1520_v45 = vpop.permute.xlu0 %1519 }
 0x30a   : > { %2942 = vmatmul.mubr.msk.f32.gmra.mrb[14].mxu1 %vm1121_vm3, %v3919_v31  ;;  %v1518_v44 = vpop.permute.xlu1 %1517 }
 0x30b   : > { %2944 = vmatprep.mubr.msk.f32.mxu1 %vm1121_vm3, %v3921_v33 }
 0x30d   : > { %v1524_v47 = vpop.permute.xlu0 %1523 }
 0x30e   : > { %2945 = vmatmul.mubr.msk.f32.gmra.mrb[16].mxu1 %vm1121_vm3, %v3927_v35  ;;  %v1522_v46 = vpop.permute.xlu1 %1521 }
 0x30f   : > { %2947 = vmatprep.mubr.msk.f32.mxu1 %vm1121_vm3, %v3929_v37 }
 0x311   : > { %v1528_v49 = vpop.permute.xlu0 %1527 }
 0x312   : > { %2948 = vmatmul.mubr.msk.f32.gmra.mrb[18].mxu1 %vm1121_vm3, %v3935_v38  ;;  %v1526_v48 = vpop.permute.xlu1 %1525 }
 0x313   : > { %2954 = vmatprep.mubr.msk.f32.mxu1 %vm937_vm1, %v1498_v34 }
 0x316   : > { %2955 = vmatmul.mubr.msk.f32.vlgmr.msra.gmra.mrb[20].mxu1 %vm937_vm1, %v1500_v30 }
 0x317   : > { %2957 = vmatprep.mubr.msk.f32.mxu1 %vm937_vm1, %v1502_v25 }
 0x31a   : > { %2958 = vmatmul.mubr.msk.f32.gmra.mrb[22].mxu1 %vm937_vm1, %v1504_v36 }
 0x31b   : > { %2960 = vmatprep.mubr.msk.f32.mxu1 %vm937_vm1, %v1506_v24 }
 0x31e   : > { %2961 = vmatmul.mubr.msk.f32.gmra.mrb[24].mxu1 %vm937_vm1, %v1508_v39 }
 0x31f   : > { %2963 = vmatprep.mubr.msk.f32.mxu1 %vm937_vm1, %v1510_v40 }
 0x322   : > { %2964 = vmatmul.mubr.msk.f32.gmra.mrb[26].mxu1 %vm937_vm1, %v1512_v41 }
 0x323   : > { %2966 = vmatprep.mubr.msk.f32.mxu1 %vm937_vm1, %v1514_v42 }
 0x326   : > { %2967 = vmatmul.mubr.msk.f32.gmra.mrb[28].mxu1 %vm937_vm1, %v1516_v43 }
 0x327   : > { %2969 = vmatprep.mubr.msk.f32.mxu1 %vm937_vm1, %v1518_v44 }
 0x32a   : > { %2970 = vmatmul.mubr.msk.f32.gmra.mrb[30].mxu1 %vm937_vm1, %v1520_v45 }
 0x32b   : > { %2972 = vmatprep.mubr.msk.f32.mxu1 %vm937_vm1, %v1522_v46 }
 0x32e   : > { %2973 = vmatmul.mubr.msk.f32.gmra.mrb[32].mxu1 %vm937_vm1, %v1524_v47 }
 0x32f   : > { %2975 = vmatprep.mubr.msk.f32.mxu1 %vm937_vm1, %v1526_v48 }
 0x332   : > { %2976 = vmatmul.mubr.msk.f32.gmra.mrb[34].mxu1 %vm937_vm1, %v1528_v49 }
 0x3c9   : > { %v3955_v50 = vpop.f32.mrb[4].mxu1 }
 0x3ca   : > { %v3957_v51 = vpop.f32.mrb[5].mxu1 }
 0x3cd   : > { %v3959_v52 = vpop.f32.mrb[6].mxu1 }
 0x3ce   : > { %v3961_v53 = vpop.f32.mrb[7].mxu1 }
 0x3d1   : > { %v3963_v54 = vpop.f32.mrb[8].mxu1 }
 0x3d2   : > { %v3965_v55 = vpop.f32.mrb[9].mxu1 }
 0x3d5   : > { %v3967_v56 = vpop.f32.mrb[10].mxu1 }
 0x3d6   : > { %v3969_v57 = vpop.f32.mrb[11].mxu1 }
 0x3d9   : > { %v3971_v58 = vpop.f32.mrb[12].mxu1 }
 0x3da   : > { %v3973_v59 = vpop.f32.mrb[13].mxu1 }
 0x3dd   : > { %v3975_v61 = vpop.f32.mrb[14].mxu1 }
 0x3de   : > { %v3977_v60 = vpop.f32.mrb[15].mxu1 }
 0x3e1   : > { %v3979_v62 = vpop.f32.mrb[16].mxu1 }
 0x3e2   : > { %v3981_v63 = vpop.f32.mrb[17].mxu1 }
 0x3e5   : > { %v3983_v1 = vpop.f32.mrb[18].mxu1 }
 0x3e6   : > { %v3985_v2 = vpop.f32.mrb[19].mxu1 }
 0x3e9   : > { %v3987_v5 = vpop.f32.mrb[20].mxu1 }
 0x3ea   : > { %v3989_v4 = vpop.f32.mrb[21].mxu1  ;;  %v1715_v6 = vsel %vm1121_vm3, %v3987_v5, -inf }
 0x3eb   : > { %1716 = vmax.xlane.f32.xlu0 %v1715_v6  ;;  %v1712_v7 = vsel %vm1121_vm3, %v3989_v4, -inf }
 0x3ec   : > { %1713 = vmax.xlane.f32.xlu1 %v1712_v7 }
 0x3ed   : > { %v3995_v10 = vpop.f32.mrb[22].mxu1 }
 0x3ee   : > { %v3997_v14 = vpop.f32.mrb[23].mxu1  ;;  %v1721_v15 = vsel %vm1121_vm3, %v3995_v10, -inf }
 0x3ef   : > { %v1718_v8 = vsel %vm1121_vm3, %v3997_v14, -inf }
 0x3f0   : > { %1722 = vmax.xlane.f32.xlu1 %v1721_v15  ;;  %1719 = vmax.xlane.f32.xlu0 %v1718_v8  ;;  %v1224_v8 = vsel %vm1121_vm3, %v3873_v3, 0.0  ;;  %v1251_v3 = vsel %vm1121_vm3, %v3919_v31, 0.0 }
 0x3f1   : > { %v4003_v18 = vpop.f32.mrb[24].mxu1 }
 0x3f2   : > { %v4005_v12 = vpop.f32.mrb[25].mxu1  ;;  %v1727_v20 = vsel %vm1121_vm3, %v4003_v18, -inf }
 0x3f3   : > { %v1724_v17 = vsel %vm1121_vm3, %v4005_v12, -inf }
 0x3f4   : > { %1728 = vmax.xlane.f32.xlu1 %v1727_v20  ;;  %1725 = vmax.xlane.f32.xlu0 %v1724_v17  ;;  %v1227_v20 = vsel %vm1121_vm3, %v3881_v9, 0.0  ;;  %v1230_v17 = vsel %vm1121_vm3, %v3883_v11, 0.0  ;;  %v1257_v9 = vsel %vm1121_vm3, %v3927_v35, 0.0  ;;  %v1242_v11 = vsel %vm1121_vm3, %v3905_v22, 0.0 }
 0x3f5   : > { %v4011_v30 = vpop.f32.mrb[26].mxu1  ;;  %v1260_v22 = vsel %vm1121_vm3, %v3929_v37, 0.0 }
 0x3f6   : > { %v4013_v23 = vpop.f32.mrb[27].mxu1  ;;  %v1733_v25 = vsel %vm1121_vm3, %v4011_v30, -inf }
 0x3f7   : > { %v1730_v34 = vsel %vm1121_vm3, %v4013_v23, -inf }
 0x3f8   : > { %1734 = vmax.xlane.f32.xlu1 %v1733_v25  ;;  %1731 = vmax.xlane.f32.xlu0 %v1730_v34  ;;  %v1233_v25 = vsel %vm1121_vm3, %v3894_v13, 0.0  ;;  %v1263_v13 = vsel %vm1121_vm3, %v3935_v38, 0.0 }
 0x3f9   : > { %v4019_v36 = vpop.f32.mrb[28].mxu1 }
 0x3fa   : > { %v4021_v24 = vpop.f32.mrb[29].mxu1  ;;  %v1739_v39 = vsel %vm1121_vm3, %v4019_v36, -inf }
 0x3fb   : > { %v1736_v40 = vsel %vm1121_vm3, %v4021_v24, -inf }
 0x3fc   : > { %1740 = vmax.xlane.f32.xlu1 %v1739_v39  ;;  %1737 = vmax.xlane.f32.xlu0 %v1736_v40 }
 0x3fd   : > { %v4027_v41 = vpop.f32.mrb[30].mxu1 }
 0x3fe   : > { %v4029_v42 = vpop.f32.mrb[31].mxu1  ;;  %v1745_v43 = vsel %vm1121_vm3, %v4027_v41, -inf }
 0x3ff   : > { %v1742_v44 = vsel %vm1121_vm3, %v4029_v42, -inf }
 0x400   : > { %1746 = vmax.xlane.f32.xlu1 %v1745_v43  ;;  %1743 = vmax.xlane.f32.xlu0 %v1742_v44 }
 0x401   : > { %v4035_v45 = vpop.f32.mrb[32].mxu1 }
 0x402   : > { %v4037_v46 = vpop.f32.mrb[33].mxu1  ;;  %v1751_v47 = vsel %vm1121_vm3, %v4035_v45, -inf }
 0x403   : > { %v1748_v6 = vsel %vm1121_vm3, %v4037_v46, -inf }
 0x404   : > { %1752 = vmax.xlane.f32.xlu0 %v1751_v47 }
 0x405   : > { %v4041_v48 = vpop.f32.mrb[34].mxu1 }
 0x406   : > { %v4043_v49 = vpop.f32.mrb[35].mxu1  ;;  %v1757_v15 = vsel %vm1121_vm3, %v4041_v48, -inf }
 0x407   : > { %v1754_v7 = vsel %vm1121_vm3, %v4043_v49, -inf }
 0x408   : > { %1749 = vmax.xlane.f32.xlu0 %v1748_v6 }
 0x40c   : > { %1755 = vmax.xlane.f32.xlu0 %v1754_v7 }
 0x410   : > { %1758 = vmax.xlane.f32.xlu0 %v1757_v15 }
 0x411   : > { %3206 = vrot.lane.b32.xlu1 %v3205_v28, %s4415_s27  ;;  %v1245_v28 = vsel %vm1121_vm3, %v3911_v16, 0.0  ;;  %v1254_v16 = vsel %vm1121_vm3, %v3921_v33, 0.0 }
 0x414   : > { %1225 = vadd.xlane.f32.xlu0 %v1224_v8 }
 0x418   : > { %1228 = vadd.xlane.f32.xlu0 %v1227_v20 }
 0x41c   : > { %1231 = vadd.xlane.f32.xlu0 %v1230_v17 }
 0x420   : > { %1234 = vadd.xlane.f32.xlu0 %v1233_v25 }
 0x424   : > { %1237 = vadd.xlane.f32.xlu0 %v1236_v26 }
 0x428   : > { %1240 = vadd.xlane.f32.xlu0 %v1239_v27 }
 0x42c   : > { %1246 = vadd.xlane.f32.xlu0 %v1245_v28 }
 0x430   : > { %1252 = vadd.xlane.f32.xlu0 %v1251_v3 }
 0x434   : > { %1258 = vadd.xlane.f32.xlu0 %v1257_v9 }
 0x435   : > { %1243 = vadd.xlane.f32.xlu1 %v1242_v11 }
 0x438   : > { %1264 = vadd.xlane.f32.xlu0 %v1263_v13 }
 0x439   : > { %1249 = vadd.xlane.f32.xlu1 %v1248_v19 }
 0x43c   : > { %1219 = vadd.xlane.f32.xlu0 %v1218_v21 }
 0x43d   : > { %1255 = vadd.xlane.f32.xlu1 %v1254_v16 }
 0x441   : > { %1261 = vadd.xlane.f32.xlu1 %v1260_v22 }
 0x478   : > { %v1717_v31 = vpop.xlane.xlu0 %1716 }
 0x479   : > { %v1714_v35 = vpop.xlane.xlu1 %1713 }
 0x47a   : > { %v1760_v38 = vsub.f32 %v3989_v4, %v1714_v35 }
 0x47c   : > { %v1776_v34 = vmul.f32 1.442695, %v1760_v38 }
 0x47d   : > { %v1720_v39 = vpop.xlane.xlu0 %1719  ;;  %v1723_v29 = vpop.xlane.xlu1 %1722 }
 0x47e   : > { %3242 = vpow2.f32 %v1776_v34  ;;  %v1762_v40 = vsub.f32 %v3997_v14, %v1720_v39  ;;  %v1763_v32 = vsub.f32 %v3995_v10, %v1723_v29  ;;  %v1761_v14 = vsub.f32 %v3987_v5, %v1717_v31 }
 0x480   : > { %v1780_v43 = vmul.f32 1.442695, %v1762_v40  ;;  %v1782_v44 = vmul.f32 1.442695, %v1763_v32  ;;  %v1778_v28 = vmul.f32 1.442695, %v1761_v14 }
 0x481   : > { %v1726_v33 = vpop.xlane.xlu0 %1725  ;;  %v1729_v47 = vpop.xlane.xlu1 %1728 }
 0x482   : > { %3244 = vpow2.f32 %v1780_v43  ;;  %v1764_v37 = vsub.f32 %v4005_v12, %v1726_v33  ;;  %v1765_v6 = vsub.f32 %v4003_v18, %v1729_v47 }
 0x483   : > { %3246 = vpow2.f32 %v1782_v44 }
 0x484   : > { %v1786_v7 = vmul.f32 1.442695, %v1765_v6  ;;  %v1784_v8 = vmul.f32 1.442695, %v1764_v37 }
 0x485   : > { %v1732_v4 = vpop.xlane.xlu0 %1731  ;;  %v1735_v15 = vpop.xlane.xlu1 %1734 }
 0x486   : > { %v1767_v20 = vsub.f32 %v4011_v30, %v1735_v15  ;;  %3248 = vpow2.f32 %v1786_v7  ;;  %v1766_v17 = vsub.f32 %v4013_v23, %v1732_v4 }
 0x487   : > { %3250 = vpow2.f32 %v1784_v8 }
 0x488   : > { %v3243_v10 = vpop.eup %3242  ;;  %v1790_v25 = vmul.f32 1.442695, %v1767_v20  ;;  %v1788_v5 = vmul.f32 1.442695, %v1766_v17 }
 0x489   : > { %v1738_v26 = vpop.xlane.xlu0 %1737  ;;  %2982 = vmatprep.mubr.msk.f32.mxu0 %vm1121_vm3, %v3243_v10  ;;  %v1741_v12 = vpop.xlane.xlu1 %1740  ;;  %v1808_v18 = vsel %vm1121_vm3, %v3243_v10, 0.0 }
 0x48a   : > { %v1768_v27 = vsub.f32 %v4021_v24, %v1738_v26  ;;  %1809 = vadd.xlane.f32.xlu1 %v1808_v18  ;;  %3252 = vpow2.f32 %v1790_v25  ;;  %v1769_v19 = vsub.f32 %v4019_v36, %v1741_v12 }
 0x48c   : > { %v3245_v3 = vpop.eup %3244  ;;  %v1792_v30 = vmul.f32 1.442695, %v1768_v27  ;;  %v1794_v34 = vmul.f32 1.442695, %v1769_v19 }
 0x48d   : > { %v3247_v9 = vpop.eup %3246  ;;  %v1744_v11 = vpop.xlane.xlu0 %1743  ;;  %v1814_v23 = vsel %vm1121_vm3, %v3245_v3, 0.0 }
 0x48e   : > { %v1747_v13 = vpop.xlane.xlu1 %1746  ;;  %3254 = vpow2.f32 %v1792_v30  ;;  %v1770_v21 = vsub.f32 %v4029_v42, %v1744_v11  ;;  %1815 = vadd.xlane.f32.xlu1 %v1814_v23  ;;  %v1817_v16 = vsel %vm1121_vm3, %v3247_v9, 0.0 }
 0x48f   : > { %3256 = vpow2.f32 %v1778_v28  ;;  %1818 = vadd.xlane.f32.xlu0 %v1817_v16  ;;  %v1771_v31 = vsub.f32 %v4027_v41, %v1747_v13 }
 0x490   : > { %v1796_v24 = vmul.f32 1.442695, %v1770_v21  ;;  %v3249_v22 = vpop.eup %3248  ;;  %3258 = vpow2.f32 %v1788_v5 }
 0x491   : > { %v1753_v35 = vpop.xlane.xlu0 %1752  ;;  %v1823_v36 = vsel %vm1121_vm3, %v3249_v22, 0.0  ;;  %v3251_v40 = vpop.eup %3250  ;;  %v1798_v32 = vmul.f32 1.442695, %v1771_v31  ;;  %v1221_v31 = vsel %vm1121_vm3, %v3871_v0, 0.0 }
 0x492   : > { %v3207_v38 = vpop.permute.xlu1 %3206  ;;  %3260 = vpow2.f32 %v1796_v24  ;;  %v1773_v44 = vsub.f32 %v4035_v45, %v1753_v35  ;;  %v1820_v47 = vsel %vm1121_vm3, %v3251_v40, 0.0 }
 0x493   : > { %v3209_v39 = vunpack.i.h.bf16 %v3207_v38  ;;  %v3208_v29 = vunpack.i.l.bf16 %v3207_v38  ;;  %1824 = vadd.xlane.f32.xlu0 %v1823_v36  ;;  %3262 = vpow2.f32 %v1794_v34 }
 0x494   : > { %v3253_v41 = vpop.eup %3252  ;;  %3264 = vpow2.f32 %v1798_v32  ;;  %v1802_v8 = vmul.f32 1.442695, %v1773_v44 }
 0x495   : > { %v3092_v42 = vpack.c.bf16 %v3209_v39, %v3208_v29  ;;  %v1750_v43 = vpop.xlane.xlu0 %1749 }
 0x496   : > { %v1772_v33 = vsub.f32 %v4037_v46, %v1750_v43  ;;  %v1829_v46 = vsel %vm1121_vm3, %v3253_v41, 0.0 }
 0x497   : > { %3093 = vmatprep.subr.bf16.mxu0 %v3092_v42  ;;  %1821 = vadd.xlane.f32.xlu0 %v1820_v47 }
 0x498   : > { %3095 = vmatpush3.bf16.msra.mxu0 %v3092_v42  ;;  %v3255_v37 = vpop.eup %3254  ;;  %v1800_v6 = vmul.f32 1.442695, %v1772_v33 }
 0x499   : > { %v3257_v7 = vpop.eup %3256  ;;  %v1756_v4 = vpop.xlane.xlu0 %1755  ;;  %v1832_v15 = vsel %vm1121_vm3, %v3255_v37, 0.0 }
 0x49a   : > { %3266 = vpow2.f32 %v1800_v6  ;;  %1833 = vadd.xlane.f32.xlu1 %v1832_v15  ;;  %v3259_v45 = vpop.eup %3258  ;;  %v1774_v14 = vsub.f32 %v4043_v49, %v1756_v4  ;;  %v1811_v49 = vsel %vm1121_vm3, %v3257_v7, 0.0 }
 0x49b   : > { %2983 = vmatmul.mubr.msk.f32.vlgmr.msra.gmra.mrb[20].mxu0 %vm1121_vm3, %v3257_v7  ;;  %1830 = vadd.xlane.f32.xlu0 %v1829_v46  ;;  %3268 = vpow2.f32 %v1802_v8  ;;  %v1826_v26 = vsel %vm1121_vm3, %v3259_v45, 0.0 }
 0x49c   : > { %2985 = vmatprep.mubr.msk.f32.mxu0 %vm1121_vm3, %v3245_v3  ;;  %v3261_v20 = vpop.eup %3260  ;;  %v1804_v18 = vmul.f32 1.442695, %v1774_v14 }
 0x49d   : > { %v1759_v10 = vpop.xlane.xlu0 %1758  ;;  %v1838_v17 = vsel %vm1121_vm3, %v3261_v20, 0.0  ;;  %v3263_v12 = vpop.eup %3262 }
 0x49e   : > { %v1775_v25 = vsub.f32 %v4041_v48, %v1759_v10  ;;  %1839 = vadd.xlane.f32.xlu1 %v1838_v17  ;;  %v3265_v3 = vpop.eup %3264  ;;  %v1835_v48 = vsel %vm1121_vm3, %v3263_v12, 0.0 }
 0x49f   : > { %2986 = vmatmul.mubr.msk.f32.gmra.mrb[22].mxu0 %vm1121_vm3, %v3247_v9  ;;  %1827 = vadd.xlane.f32.xlu0 %v1826_v26  ;;  %v1841_v11 = vsel %vm1121_vm3, %v3265_v3, 0.0 }
 0x4a0   : > { %2988 = vmatprep.mubr.msk.f32.mxu0 %vm1121_vm3, %v3251_v40  ;;  %v1806_v27 = vmul.f32 1.442695, %v1775_v25 }
 0x4a1   : > { %v1226_v28 = vpop.xlane.xlu0 %1225 }
 0x4a2   : > { %3270 = vpow2.f32 %v1806_v27  ;;  %1812 = vadd.xlane.f32.xlu1 %v1811_v49 }
 0x4a3   : > { %2989 = vmatmul.mubr.msk.f32.gmra.mrb[24].mxu0 %vm1121_vm3, %v3249_v22  ;;  %3272 = vpow2.f32 %v1804_v18  ;;  %1836 = vadd.xlane.f32.xlu0 %v1835_v48 }
 0x4a4   : > { %2991 = vmatprep.mubr.msk.f32.mxu0 %vm1121_vm3, %v3259_v45  ;;  %v3267_v30 = vpop.eup %3266 }
 0x4a5   : > { %v1229_v9 = vpop.xlane.xlu0 %1228  ;;  %v1844_v5 = vsel %vm1121_vm3, %v3267_v30, 0.0  ;;  %v3269_v13 = vpop.eup %3268 }
 0x4a6   : > { %1845 = vadd.xlane.f32.xlu1 %v1844_v5  ;;  %v1847_v19 = vsel %vm1121_vm3, %v3269_v13, 0.0  ;;  %3274 = vrcp.f32 %v1229_v9 }
 0x4a7   : > { %2992 = vmatmul.mubr.msk.f32.gmra.mrb[26].mxu0 %vm1121_vm3, %v3253_v41  ;;  %1842 = vadd.xlane.f32.xlu0 %v1841_v11  ;;  %3276 = vrcp.f32 %v1226_v28 }
 0x4a8   : > { %2994 = vmatprep.mubr.msk.f32.mxu0 %vm1121_vm3, %v3255_v37 }
 0x4a9   : > { %v1232_v23 = vpop.xlane.xlu0 %1231 }
 0x4ab   : > { %2995 = vmatmul.mubr.msk.f32.gmra.mrb[28].mxu0 %vm1121_vm3, %v3263_v12  ;;  %1848 = vadd.xlane.f32.xlu0 %v1847_v19 }
 0x4ac   : > { %2997 = vmatprep.mubr.msk.f32.mxu0 %vm1121_vm3, %v3261_v20  ;;  %v3271_v21 = vpop.eup %3270 }
 0x4ad   : > { %v1235_v16 = vpop.xlane.xlu0 %1234  ;;  %v1853_v24 = vsel %vm1121_vm3, %v3271_v21, 0.0  ;;  %v3273_v22 = vpop.eup %3272 }
 0x4ae   : > { %1854 = vadd.xlane.f32.xlu1 %v1853_v24  ;;  %v1850_v38 = vsel %vm1121_vm3, %v3273_v22, 0.0  ;;  %3278 = vrcp.f32 %v1235_v16 }
 0x4af   : > { %2998 = vmatmul.mubr.msk.f32.gmra.mrb[30].mxu0 %vm1121_vm3, %v3265_v3  ;;  %1222 = vadd.xlane.f32.xlu0 %v1221_v31  ;;  %3280 = vrcp.f32 %v1232_v23  ;;  %v2231_v31 = vld [vmem:[%s4384_s8] sm:$0xff] }
 0x4b0   : > { %3000 = vmatprep.mubr.msk.f32.mxu0 %vm1121_vm3, %v3267_v30  ;;  %v3275_v0 = vpop.eup %3274 }
 0x4b1   : > { %v1238_v35 = vpop.xlane.xlu0 %1237  ;;  %v3277_v36 = vpop.eup %3276  ;;  %v1484_v40 = vmul.f32 %v3275_v0, %v3959_v52 }
 0x4b2   : > { %1851 = vadd.xlane.f32.xlu1 %v1850_v38  ;;  %v1483_v43 = vmul.f32 %v3277_v36, %v3961_v53 }
 0x4b3   : > { %3001 = vmatmul.mubr.msk.f32.gmra.mrb[32].mxu0 %vm1121_vm3, %v3269_v13 }
 0x4b4   : > { %3003 = vmatprep.mubr.msk.f32.mxu0 %vm1121_vm3, %v3273_v22 }
 0x4b5   : > { %v1241_v34 = vpop.xlane.xlu0 %1240 }
 0x4b6   : > { %3282 = vrcp.f32 %v1241_v34  ;;  %v2328_v34 = vld [vmem:[%s4386_s10] sm:$0xff] }
 0x4b7   : > { %3004 = vmatmul.mubr.msk.f32.gmra.mrb[34].mxu0 %vm1121_vm3, %v3271_v21  ;;  %3284 = vrcp.f32 %v1238_v35  ;;  %v2232_v35 = vld [vmem:[%s4384_s8 + $0x8] sm:$0xff] }
 0x4b8   : > { %v3279_v42 = vpop.eup %3278  ;;  %v3096_v38 = vpack.c.bf16 %v2232_v35, %v2231_v31 }
 0x4b9   : > { %v1247_v39 = vpop.xlane.xlu0 %1246  ;;  %v3281_v44 = vpop.eup %3280  ;;  %v1486_v41 = vmul.f32 %v3279_v42, %v3963_v54 }
 0x4ba   : > { %3286 = vrcp.f32 %v1247_v39  ;;  %v1485_v52 = vmul.f32 %v3281_v44, %v3965_v55  ;;  %v2329_v39 = vld [vmem:[%s4386_s10 + $0x8] sm:$0xff]  ;;  %3097 = vmatprep.subr.bf16.mxu1 %v3096_v38 }
 0x4bb   : > { %v3112_v36 = vpack.c.bf16 %v2329_v39, %v2328_v34  ;;  %3099 = vmatpush3.bf16.msra.mxu1 %v3096_v38 }
 0x4bd   : > { %v1253_v29 = vpop.xlane.xlu0 %1252  ;;  %3113 = vmatprep.subr.bf16.mxu0 %v3112_v36 }
 0x4be   : > { %3115 = vmatpush3.bf16.msra.mxu0 %v3112_v36 }
 0x4c0   : > { %v3283_v47 = vpop.eup %3282 }
 0x4c1   : > { %v1259_v33 = vpop.xlane.xlu0 %1258  ;;  %v3285_v6 = vpop.eup %3284  ;;  %v1488_v7 = vmul.f32 %v3283_v47, %v3967_v56  ;;  %v2234_v47 = vld [vmem:[%s4384_s8 + $0x18] sm:$0xff] }
 0x4c2   : > { %v1244_v32 = vpop.xlane.xlu1 %1243  ;;  %v1487_v54 = vmul.f32 %v3285_v6, %v3969_v57  ;;  %v2331_v6 = vld [vmem:[%s4386_s10 + $0x18] sm:$0xff] }
 0x4c3   : > { %3288 = vrcp.f32 %v1244_v32  ;;  %2091 = vrot.lane.b32.xlu1 %v1484_v40, %s4399_s24 }
 0x4c4   : > { %3290 = vrcp.f32 %v1253_v29  ;;  %v3287_v4 = vpop.eup %3286 }
 0x4c5   : > { %2089 = vrot.lane.b32.xlu0 %v1483_v43, %s4399_s24  ;;  %v1490_v8 = vmul.f32 %v3287_v4, %v3971_v58 }
 0x4c6   : > { %v1250_v37 = vpop.xlane.xlu1 %1249 }
 0x4c7   : > { %3292 = vrcp.f32 %v1250_v37  ;;  %2099 = vrot.lane.b32.xlu1 %v1486_v41, %s3455_s14  ;;  %v2233_v41 = vld [vmem:[%s4384_s8 + $0x10] sm:$0xff] }
 0x4c8   : > { %3294 = vrcp.f32 %v1259_v33  ;;  %v3100_v37 = vpack.c.bf16 %v2234_v47, %v2233_v41 }
 0x4c9   : > { %2097 = vrot.lane.b32.xlu0 %v1485_v52, %s3455_s14  ;;  %v2330_v52 = vld [vmem:[%s4386_s10 + $0x10] sm:$0xff] }
 0x4ca   : > { %v1256_v53 = vpop.xlane.xlu1 %1255  ;;  %3101 = vmatprep.subr.bf16.mxu1 %v3100_v37 }
 0x4cb   : > { %3296 = vrcp.f32 %v1256_v53  ;;  %2107 = vrot.lane.b32.xlu1 %v1488_v7, %s3456_s15  ;;  %v3116_v53 = vpack.c.bf16 %v2331_v6, %v2330_v52  ;;  %3103 = vmatpush3.bf16.msra.mxu1 %v3100_v37 }
 0x4cd   : > { %v3289_v15 = vpop.eup %3288  ;;  %2105 = vrot.lane.b32.xlu0 %v1487_v54, %s3456_s15  ;;  %3117 = vmatprep.subr.bf16.mxu0 %v3116_v53 }
 0x4ce   : > { %v3291_v45 = vpop.eup %3290  ;;  %v1262_v55 = vpop.xlane.xlu1 %1261  ;;  %v1489_v46 = vmul.f32 %v3289_v15, %v3973_v59  ;;  %3119 = vmatpush3.bf16.msra.mxu0 %v3116_v53 }
 0x4cf   : > { %3298 = vrcp.f32 %v1262_v55  ;;  %2189 = vrot.lane.b32.xlu1 %v1490_v8, %s3457_s4  ;;  %v1492_v20 = vmul.f32 %v3291_v45, %v3975_v61  ;;  %v2235_v55 = vld [vmem:[%s4384_s8 + $0x20] sm:$0xff] }
 0x4d1   : > { %v3293_v56 = vpop.eup %3292  ;;  %2187 = vrot.lane.b32.xlu0 %v1489_v46, %s3457_s4  ;;  %v2236_v46 = vld [vmem:[%s4384_s8 + $0x28] sm:$0xff] }
 0x4d2   : > { %v3295_v14 = vpop.eup %3294  ;;  %v1491_v57 = vmul.f32 %v3293_v56, %v3977_v60  ;;  %v4161_v60 = vpop.xlane.xlu0 %1264 }
 0x4d3   : > { %2197 = vrot.lane.b32.xlu1 %v1492_v20, %s3458_s29  ;;  %v1494_v10 = vmul.f32 %v3295_v14, %v3979_v62  ;;  %v3104_v20 = vpack.c.bf16 %v2236_v46, %v2235_v55  ;;  %v2332_v14 = vld [vmem:[%s4386_s10 + $0x20] sm:$0xff] }
 0x4d5   : > { %v3297_v58 = vpop.eup %3296  ;;  %2195 = vrot.lane.b32.xlu0 %v1491_v57, %s3458_s29  ;;  %v2333_v57 = vld [vmem:[%s4386_s10 + $0x28] sm:$0xff]  ;;  %3105 = vmatprep.subr.bf16.mxu1 %v3104_v20 }
 0x4d6   : > { %v1493_v59 = vmul.f32 %v3297_v58, %v3981_v63  ;;  %v4163_v26 = vpop.xlane.xlu0 %1219  ;;  %3107 = vmatpush3.bf16.msra.mxu1 %v3104_v20 }
 0x4d7   : > { %2205 = vrot.lane.b32.xlu1 %v1494_v10, %s4397_s19 }
 0x4d9   : > { %v3299_v17 = vpop.eup %3298  ;;  %2203 = vrot.lane.b32.xlu0 %v1493_v59, %s4397_s19 }
 0x4da   : > { %v1495_v61 = vmul.f32 %v3299_v17, %v3985_v2  ;;  %v3120_v17 = vpack.c.bf16 %v2333_v57, %v2332_v14 }
 0x4dc   : > { %3121 = vmatprep.subr.bf16.mxu0 %v3120_v17 }
 0x4dd   : > { %2211 = vrot.lane.b32.xlu0 %v1495_v61, %s4395_s16  ;;  %3123 = vmatpush3.bf16.msra.mxu0 %v3120_v17 }
 0x517   : > { %v1810_v25 = vpop.xlane.xlu1 %1809 }
 0x51b   : > { %v1816_v62 = vpop.xlane.xlu1 %1815 }
 0x51c   : > { %v1819_v12 = vpop.xlane.xlu0 %1818 }
 0x520   : > { %v1825_v63 = vpop.xlane.xlu0 %1824 }
 0x524   : > { %v1822_v28 = vpop.xlane.xlu0 %1821 }
 0x527   : > { %v1834_v18 = vpop.xlane.xlu1 %1833 }
 0x528   : > { %v1831_v3 = vpop.xlane.xlu0 %1830 }
 0x52b   : > { %v1840_v27 = vpop.xlane.xlu1 %1839 }
 0x52c   : > { %v1828_v2 = vpop.xlane.xlu0 %1827 }
 0x52f   : > { %v1813_v49 = vpop.xlane.xlu1 %1812 }
 0x530   : > { %3300 = vrcp.f32 %v1813_v49  ;;  %v1837_v23 = vpop.xlane.xlu0 %1836  ;;  %v2335_v49 = vld [vmem:[%s4386_s10 + $0x38] sm:$0xff] }
 0x531   : > { %3302 = vrcp.f32 %v1810_v25 }
 0x532   : > { %3304 = vrcp.f32 %v1819_v12 }
 0x533   : > { %3306 = vrcp.f32 %v1816_v62  ;;  %v1846_v22 = vpop.xlane.xlu1 %1845 }
 0x534   : > { %3308 = vrcp.f32 %v1822_v28  ;;  %v1843_v42 = vpop.xlane.xlu0 %1842  ;;  %v2334_v28 = vld [vmem:[%s4386_s10 + $0x30] sm:$0xff] }
 0x535   : > { %3310 = vrcp.f32 %v1825_v63  ;;  %v2238_v63 = vld [vmem:[%s4384_s8 + $0x38] sm:$0xff] }
 0x536   : > { %3312 = vrcp.f32 %v1828_v2 }
 0x537   : > { %3314 = vrcp.f32 %v1831_v3 }
 0x538   : > { %3316 = vrcp.f32 %v1834_v18  ;;  %v1849_v56 = vpop.xlane.xlu0 %1848  ;;  %v2237_v18 = vld [vmem:[%s4384_s8 + $0x30] sm:$0xff] }
 0x539   : > { %3318 = vrcp.f32 %v1837_v23 }
 0x53a   : > { %v3301_v48 = vpop.eup %3300  ;;  %3320 = vrcp.f32 %v1840_v27  ;;  %v3108_v27 = vpack.c.bf16 %v2238_v63, %v2237_v18 }
 0x53b   : > { %v3303_v9 = vpop.eup %3302  ;;  %v1855_v44 = vpop.xlane.xlu1 %1854  ;;  %3322 = vrcp.f32 %v1843_v42 }
 0x53c   : > { %v3305_v19 = vpop.eup %3304  ;;  %3324 = vrcp.f32 %v1846_v22  ;;  %3109 = vmatprep.subr.bf16.mxu1 %v3108_v27 }
 0x53d   : > { %v3307_v0 = vpop.eup %3306  ;;  %3326 = vrcp.f32 %v1849_v56  ;;  %3111 = vmatpush3.bf16.msra.mxu1 %v3108_v27 }
 0x53e   : > { %v3309_v40 = vpop.eup %3308 }
 0x53f   : > { %v3311_v7 = vpop.eup %3310  ;;  %v1852_v10 = vpop.xlane.xlu1 %1851 }
 0x540   : > { %v3313_v54 = vpop.eup %3312  ;;  %3328 = vrcp.f32 %v1852_v10 }
 0x541   : > { %v3315_v58 = vpop.eup %3314  ;;  %3330 = vrcp.f32 %v4161_v60 }
 0x542   : > { %v3317_v61 = vpop.eup %3316  ;;  %3332 = vrcp.f32 %v1855_v44 }
 0x543   : > { %v3319_v3 = vpop.eup %3318  ;;  %v2092_v44 = vpop.permute.xlu1 %2091 }
 0x547   : > { %v2100_v41 = vpop.permute.xlu1 %2099 }
 0x54b   : > { %v2108_v37 = vpop.permute.xlu1 %2107 }
 0x54f   : > { %v2190_v6 = vpop.permute.xlu1 %2189 }
 0x56e   : > { %v2984_v30 = vpop.f32.mrb[20].mxu0 }
 0x56f   : > { %v4165_v5 = vmul.f32 %v3301_v48, %v2984_v30  ;;  %v1976_v11 = vpop.f32.mrb[21].mxu0  ;;  %v3124_v48 = vpack.c.bf16 %v2335_v49, %v2334_v28  ;;  %v3321_v30 = vpop.eup %3320 }
 0x570   : > { %v4167_v13 = vmul.f32 %v3303_v9, %v1976_v11 }
 0x571   : > { %3125 = vmatprep.subr.bf16.mxu0 %v3124_v48 }
 0x572   : > { %v2987_v21 = vpop.f32.mrb[22].mxu0  ;;  %3127 = vmatpush3.bf16.msra.mxu0 %v3124_v48 }
 0x573   : > { %v2074_v16 = vmul.f32 %v3305_v19, %v2987_v21  ;;  %v1986_v24 = vpop.f32.mrb[23].mxu0  ;;  %v3323_v19 = vpop.eup %3322 }
 0x574   : > { %v2073_v32 = vmul.f32 %v3307_v0, %v1986_v24 }
 0x575   : > { %2165 = vrot.lane.b32.xlu1 %v2074_v16, %s4399_s24  ;;  %v3325_v16 = vpop.eup %3324 }
 0x576   : > { %v2990_v29 = vpop.f32.mrb[24].mxu0  ;;  %v3327_v60 = vpop.eup %3326 }
 0x577   : > { %v1996_v43 = vpop.f32.mrb[25].mxu0  ;;  %v2076_v15 = vmul.f32 %v3311_v7, %v2990_v29  ;;  %v3329_v38 = vpop.eup %3328 }
 0x578   : > { %v2075_v33 = vmul.f32 %v3309_v40, %v1996_v43  ;;  %v3331_v29 = vpop.eup %3330 }
 0x579   : > { %2163 = vrot.lane.b32.xlu1 %v2073_v32, %s4399_s24  ;;  %v3333_v36 = vpop.eup %3332  ;;  %v1496_v42 = vmul.f32 %v3331_v29, %v3983_v1  ;;  %v1223_v32 = vpop.xlane.xlu0 %1222 }
 0x57a   : > { %2171 = vrot.lane.b32.xlu0 %v2075_v33, %s3455_s14  ;;  %v2993_v4 = vpop.f32.mrb[26].mxu0  ;;  %3334 = vrcp.f32 %v1223_v32 }
 0x57b   : > { %v2006_v8 = vpop.f32.mrb[27].mxu0  ;;  %v2078_v25 = vmul.f32 %v3315_v58, %v2993_v4  ;;  %v2198_v4 = vpop.permute.xlu1 %2197  ;;  %3336 = vrcp.f32 %v4163_v26 }
 0x57c   : > { %v2077_v45 = vmul.f32 %v3313_v54, %v2006_v8 }
 0x57d   : > { %2173 = vrot.lane.b32.xlu1 %v2076_v15, %s3455_s14  ;;  %v2090_v43 = vpop.permute.xlu0 %2089 }
 0x57e   : > { %2179 = vrot.lane.b32.xlu0 %v2077_v45, %s3456_s15  ;;  %v2996_v59 = vpop.f32.mrb[28].mxu0 }
 0x57f   : > { %v2016_v62 = vpop.f32.mrb[29].mxu0  ;;  %v2080_v9 = vmul.f32 %v3319_v3, %v2996_v59  ;;  %v2206_v54 = vpop.permute.xlu1 %2205 }
 0x580   : > { %v2079_v12 = vmul.f32 %v3317_v61, %v2016_v62 }
 0x581   : > { %2181 = vrot.lane.b32.xlu1 %v2078_v25, %s3456_s15  ;;  %s4416_s15 = smov 48   ;;  %v2098_v33 = vpop.permute.xlu0 %2097 }
 0x582   : > { %2113 = vrot.lane.b32.xlu0 %v2079_v12, %s3457_s4  ;;  %v2999_v2 = vpop.f32.mrb[30].mxu0 }
 0x583   : > { %v2026_v11 = vpop.f32.mrb[31].mxu0  ;;  %v2082_v24 = vmul.f32 %v3323_v19, %v2999_v2 }
 0x584   : > { %v2081_v23 = vmul.f32 %v3321_v30, %v2026_v11  ;;  %v3335_v58 = vpop.eup %3334 }
 0x585   : > { %2115 = vrot.lane.b32.xlu1 %v2080_v9, %s3457_s4  ;;  %s4417_s4 = smov 56   ;;  %v2106_v47 = vpop.permute.xlu0 %2105  ;;  %v3337_v61 = vpop.eup %3336  ;;  %v1482_v25 = vmul.f32 %v3335_v58, %v3955_v50 }
 0x586   : > { %2121 = vrot.lane.b32.xlu0 %v2081_v23, %s3458_s29  ;;  %v3002_v21 = vpop.f32.mrb[32].mxu0  ;;  %v1481_v18 = vmul.f32 %v3337_v61, %v3957_v51 }
 0x587   : > { %v2036_v22 = vpop.f32.mrb[33].mxu0  ;;  %v2084_v34 = vmul.f32 %v3327_v60, %v3002_v21  ;;  %v2144_v27 = vsel %vm937_vm1, %v1482_v25, %v2092_v44 }
 0x588   : > { %v2083_v31 = vmul.f32 %v3325_v16, %v2036_v22  ;;  %v2143_v49 = vsel %vm937_vm1, %v1481_v18, %v2090_v43  ;;  %v2146_v9 = vsel %vm1121_vm3, %v2144_v27, %v2100_v41 }
 0x589   : > { %2123 = vrot.lane.b32.xlu1 %v2082_v24, %s3458_s29  ;;  %v2188_v52 = vpop.permute.xlu0 %2187  ;;  %v2145_v50 = vsel %vm1121_vm3, %v2143_v49, %v2098_v33  ;;  %v2149_v19 = vsel %vm2147_vm4, %v2146_v9, %v2108_v37  ;;  %s4272_s29 = sand.u32 1, %s3432_s26  }
 0x58a   : > { %2129 = vrot.lane.b32.xlu0 %v2083_v31, %s4416_s15  ;;  %v3005_v35 = vpop.f32.mrb[34].mxu0  ;;  %v2148_v30 = vsel %vm2147_vm4, %v2145_v50, %v2106_v47  ;;  %s2628_s23 = sshll.u32 %s4272_s29, 4  ;;  %s2429_s27 = scalar_lea.sflag [#allocation3], %s4272_s29 }
 0x58b   : > { %v2046_v39 = vpop.f32.mrb[35].mxu0  ;;  %v2086_v40 = vmul.f32 %v3333_v36, %v3005_v35  ;;  %s520_s14 = scalar_lea.vmem [#allocation2], %s2628_s23  ;;  %v2714_v36 = vld [vmem:[%s4385_s9] ss:$0 sm:$0xff]  ;;  %s527_s19 = scalar_lea.vmem [#allocation4], %s2628_s23 }
 0x58c   : > { %v2085_v0 = vmul.f32 %v3329_v38, %v2046_v39  ;;  %s2449_s17 = sshll.u32 %s520_s14, 4  ;;  %s2467_s16 = sshll.u32 %s527_s19, 4  ;;  %s4282_s17 = int_to_ptr.vmem [resolvable:$true] %s2449_s17  ;;  %s4284_s16 = int_to_ptr.vmem [resolvable:$true] %s2467_s16 }
 0x58d   : > { %2131 = vrot.lane.b32.xlu1 %v2084_v34, %s4416_s15  ;;  %v2196_v7 = vpop.permute.xlu0 %2195  ;;  %s2732_s15 = sshll.u32 %s3440_s28, 8  ;;  %s3338_s24 = scalar_lea.vmem %s4282_s17, 256 }
 0x58e   : > { %2137 = vrot.lane.b32.xlu0 %v2085_v0, %s4417_s4  ;;  %s4289_s22 = scalar_lea.hbm %s4388_s12, %s2732_s15  ;;  %s4295_s5 = scalar_lea.hbm %s4389_s13, %s2732_s15 }
 0x58f   : > { %p3339_p12 = scmp.ne.s32.totalorder %s4282_s17, %s3338_s24 }
 0x591   : > { %2139 = vrot.lane.b32.xlu1 %v2086_v40, %s4417_s4  ;;  %v2204_v53 = vpop.permute.xlu0 %2203  ;;  %v2717_v40 = vld [vmem:[%s4387_s11] ss:$0 sm:$0xff]  ;;  %p3340_p13 = pnand %p3339_p12, %p3574_p4 }
 0x592   : > { %2213 = vrot.lane.b32.xlu0 %v1496_v42, %s4417_s4  ;;  %s3461_s4 = smov [#allocation2]  }
 0x593   : > { %p3341_p0 = pneg %p3340_p13  ;;  %s3342_s23 = sshll.u32 %s3461_s4, 4  ;;  %s3343_s23 = int_to_ptr.vmem [resolvable:$false] %s3342_s23 }
 0x594   : > { %s3344_s0 = scalar_lea.vmem %s3343_s23, 512  ;;  %p3345_p1 = scmp.lt.s32.totalorder %s4282_s17, %s3343_s23 }
 0x595   : > { %v2212_v8 = vpop.permute.xlu0 %2211  ;;  %p3346_p2 = scmp.lt.s32.totalorder %s3344_s0, %s3338_s24 }
 0x597   : > { %p3347_p3 = por %p3346_p2, %p3345_p1 }
 0x599   : > { %p3348_p5 = pnand %p3347_p3, %p3341_p0 }
 0x5e7   : > { %v2166_v15 = vpop.permute.xlu1 %2165 }
 0x5e8   : > { %v2218_v63 = vsel %vm937_vm1, %v4165_v5, %v2166_v15 }
 0x5eb   : > { %v2164_v1 = vpop.permute.xlu1 %2163 }
 0x5ec   : > { %v2172_v45 = vpop.permute.xlu0 %2171  ;;  %v2217_v55 = vsel %vm937_vm1, %v4167_v13, %v2164_v1 }
 0x5ed   : > { %v2219_v56 = vsel %vm1121_vm3, %v2217_v55, %v2172_v45 }
 0x5ef   : > { %v2174_v46 = vpop.permute.xlu1 %2173 }
 0x5f0   : > { %v2180_v20 = vpop.permute.xlu0 %2179  ;;  %v2220_v28 = vsel %vm1121_vm3, %v2218_v63, %v2174_v46 }
 0x5f1   : > { %v2221_v14 = vsel %vm2147_vm4, %v2219_v56, %v2180_v20 }
 0x5f2   : > { %v2223_v57 = vsel %vm572_vm0, %v2221_v14, %v2188_v52 }
 0x5f3   : > { %v2225_v10 = vsel %vm2152_vm5, %v2223_v57, %v2196_v7  ;;  %v2182_v26 = vpop.permute.xlu1 %2181 }
 0x5f4   : > { %v2114_v59 = vpop.permute.xlu0 %2113  ;;  %v2227_v13 = vsel %vm2155_vm6, %v2225_v10, %v2204_v53  ;;  %v2222_v3 = vsel %vm2147_vm4, %v2220_v28, %v2182_v26 }
 0x5f5   : > { %v2229_v17 = vsel %vm2158_vm7, %v2227_v13, %v2212_v8  ;;  %v2224_v51 = vsel %vm572_vm0, %v2222_v3, %v2190_v6  ;;  %v2150_v5 = vsel %vm572_vm0, %v2148_v30, %v2114_v59 }
 0x5f6   : > { %3041 = vmatprep.mubr.msk.f32.mxu0 %vm2246_vm8, %v2229_v17  ;;  %v2226_v31 = vsel %vm2152_vm5, %v2224_v51, %v2198_v4 }
 0x5f7   : > { %v2116_v62 = vpop.permute.xlu1 %2115  ;;  %v2228_v39 = vsel %vm2155_vm6, %v2226_v31, %v2206_v54 }
 0x5f8   : > { %v2122_v12 = vpop.permute.xlu0 %2121  ;;  %v2151_v24 = vsel %vm572_vm0, %v2149_v19, %v2116_v62 }
 0x5f9   : > { %v2153_v11 = vsel %vm2152_vm5, %v2150_v5, %v2122_v12 }
 0x5fb   : > { %v2124_v2 = vpop.permute.xlu1 %2123 }
 0x5fc   : > { %v2130_v48 = vpop.permute.xlu0 %2129  ;;  %v2154_v60 = vsel %vm2152_vm5, %v2151_v24, %v2124_v2 }
 0x5fd   : > { %v2156_v21 = vsel %vm2155_vm6, %v2153_v11, %v2130_v48 }
 0x5ff   : > { %v2132_v23 = vpop.permute.xlu1 %2131 }
 0x600   : > { %v2138_v16 = vpop.permute.xlu0 %2137  ;;  %v2157_v35 = vsel %vm2155_vm6, %v2154_v60, %v2132_v23 }
 0x601   : > { %v2159_v22 = vsel %vm2158_vm7, %v2156_v21, %v2138_v16 }
 0x602   : > { %3022 = vmatprep.mubr.msk.f32.mxu1 %vm2246_vm8, %v2159_v22 }
 0x603   : > { %v2140_v38 = vpop.permute.xlu1 %2139 }
 0x604   : > { %v2160_v34 = vsel %vm2158_vm7, %v2157_v35, %v2140_v38  ;;  %v2214_v0 = vpop.permute.xlu0 %2213 }
 0x605   : > { %v2230_v29 = vsel %vm2158_vm7, %v2228_v39, %v2214_v0  ;;  %3023 = vmatmul.mubr.msk.f32.vlgmr.msra.gmra.mrb[36].mxu1 %vm2246_vm8, %v2160_v34 }
 0x606   : > { %3042 = vmatmul.mubr.msk.f32.vlgmr.msra.gmra.mrb[36].mxu0 %vm2246_vm8, %v2230_v29 }
 0x6d8   : > { %v3024_v42 = vpop.f32.mrb[36].mxu1 }
 0x6d9   : > { %v2325_v32 = vadd.f32 %v3024_v42, %v2714_v36  ;;  %v2319_v43 = vpop.f32.mrb[37].mxu1  ;;  %v3043_v44 = vpop.f32.mrb[36].mxu0 }
 0x6da   : > { %v2320_v33 = vadd.f32 %v2714_v36, %v2319_v43  ;;  %v2421_v41 = vadd.f32 %v3043_v44, %v2717_v40  ;;  %v2415_v47 = vpop.f32.mrb[37].mxu0 }
 0x6db   : > { %2425 = vst.msk [vmem:[%s520_s14 + $0x8] sm:$0xff] %vm572_vm0, %v2325_v32  ;;  %v2416_v37 = vadd.f32 %v2717_v40, %v2415_v47 }
 0x6dc   : > { %2424 = vst.msk [vmem:[%s520_s14] sm:$0xff] %vm572_vm0, %v2320_v33  ;;  %2427 = vst.msk [vmem:[%s527_s19 + $0x8] sm:$0xff] %vm572_vm0, %v2421_v41 }
 0x6dd   : > { %2426 = vst.msk [vmem:[%s527_s19] sm:$0xff] %vm572_vm0, %v2416_v37 }
 0x6de   : > { %3351 = shalt.err (!%p3348_p5)
}
 0x6df   : > { %s3352_s14 = scalar_lea.hbm %s4289_s22, 256  ;;  %s3356_s28 = scalar_lea.hbm %s4388_s12, 512 }
 0x6e0   : > { %p3353_p6 = scmp.ne.s32.totalorder %s4289_s22, %s3352_s14  ;;  %p3357_p10 = scmp.lt.u32.totalorder %s4289_s22, %s4388_s12 }
 0x6e1   : > { %p3358_p11 = scmp.lt.u32.totalorder %s3356_s28, %s3352_s14  ;;  %p3360_p13 = scmp.lt.u32.totalorder %s3352_s14, %s4289_s22 }
 0x6e2   : > { %p3354_p7 = pnand %p3353_p6, %p3574_p4 }
 0x6e3   : > { %p3359_p12 = por %p3358_p11, %p3357_p10 }
 0x6e4   : > { %p3355_p9 = pneg %p3354_p7 }
 0x6e5   : > { %p3361_p0 = por %p3360_p13, %p3359_p12 }
 0x6e7   : > { %p3362_p1 = pnand %p3361_p0, %p3355_p9 }
 0x6e9   : > { %3365 = shalt.err (!%p3362_p1)
}
 0x6ea   : > { %s3462_s0 = smov 128   ;;  %s4418_s24 = smov 8  }
 0x6eb   : > { %3128 = dma.vmem_to_hbm [thread:$0]  (%p3574_p4), %s4282_s17, 256, %s4289_s22, %s2429_s27, %s3462_s0, %s3462_s0, %s4418_s24  }
 0x6ec   : > { %s2434_s23 = scalar_lea.sflag [#allocation5], %s4272_s29  ;;  %s3366_s14 = scalar_lea.vmem %s4284_s16, 256 }
 0x6ed   : > { %p3367_p2 = scmp.ne.s32.totalorder %s4284_s16, %s3366_s14  ;;  %s3463_s19 = smov [#allocation4]  }
 0x6ee   : > { %s3370_s15 = sshll.u32 %s3463_s19, 4  ;;  %s3371_s15 = int_to_ptr.vmem [resolvable:$false] %s3370_s15 }
 0x6ef   : > { %p3368_p3 = pnand %p3367_p2, %p3574_p4  ;;  %s3372_s28 = scalar_lea.vmem %s3371_s15, 512 }
 0x6f0   : > { %p3373_p6 = scmp.lt.s32.totalorder %s4284_s16, %s3371_s15  ;;  %p3374_p7 = scmp.lt.s32.totalorder %s3372_s28, %s3366_s14 }
 0x6f1   : > { %p3369_p5 = pneg %p3368_p3 }
 0x6f2   : > { %p3375_p9 = por %p3374_p7, %p3373_p6 }
 0x6f4   : > { %p3376_p10 = pnand %p3375_p9, %p3369_p5 }
 0x6f6   : > { %3379 = shalt.err (!%p3376_p10)
}
 0x6f7   : > { %s3380_s17 = scalar_lea.hbm %s4295_s5, 256  ;;  %s3384_s21 = scalar_lea.hbm %s4389_s13, 512 }
 0x6f8   : > { %p3381_p11 = scmp.ne.s32.totalorder %s4295_s5, %s3380_s17  ;;  %p3385_p0 = scmp.lt.u32.totalorder %s4295_s5, %s4389_s13 }
 0x6f9   : > { %p3386_p1 = scmp.lt.u32.totalorder %s3384_s21, %s3380_s17  ;;  %p3388_p3 = scmp.lt.u32.totalorder %s3380_s17, %s4295_s5 }
 0x6fa   : > { %p3382_p12 = pnand %p3381_p11, %p3574_p4 }
 0x6fb   : > { %p3387_p2 = por %p3386_p1, %p3385_p0 }
 0x6fc   : > { %p3383_p13 = pneg %p3382_p12 }
 0x6fd   : > { %p3389_p5 = por %p3388_p3, %p3387_p2 }
 0x6ff   : > { %p3390_p6 = pnand %p3389_p5, %p3383_p13 }
 0x701   : > { %3393 = shalt.err (!%p3390_p6)
}
 0x702   : > { %3129 = dma.vmem_to_hbm [thread:$0]  (%p3574_p4), %s4284_s16, 256, %s4295_s5, %s2434_s23, %s3462_s0, %s3462_s0, %s4418_s24  }
 0x703 PF: > { %p3139_p7 = scmp.ge.s32.totalorder %s3448_s30, 2  ;;  %s2482_s14 = sand.u32 1, %s3428_s25  }
 0x704   : > { %s2483_s15 = scalar_lea.sflag [#allocation3], %s2482_s14 }
 0x705   : > { %p3133_p9 = pnand %p3139_p7, %p3581_p8 }
 0x707   : > { %3419 = dma.done.wait (!%p3133_p9), %s2483_s15, 256  }
 0x708   : > { %3421 = vsyncadd (!%p3133_p9), %s2483_s15, 4294967040  ;;  %s2492_s18 = scalar_lea.sflag [#allocation5], %s2482_s14 }
 0x709   : > { %3423 = dma.done.wait (!%p3133_p9), %s2492_s18, 256  }
 0x70a   : > { %3425 = vsyncadd (!%p3133_p9), %s2492_s18, 4294967040  ;;  %s30_s30 = sadd.s32 1, %s3448_s30   ;;  %s4419_s29 = sld [smem:[#allocation8_spill]] }
 0x70b   : > { %p27_p10 = scmp.ge.s32.totalorder %s30_s30, 4   ;;  %s4420_s27 = sld [smem:[#allocation11_spill]] }
 0x70c   : > { %s4421_s28 = sld [smem:[#allocation9_spill]]  ;;  %s4422_s16 = sld [smem:[#allocation10_spill]] }
 0x70d   : > { %s4423_s25 = smov %s3432_s26  ;;  %29 = sbr.rel (!%p27_p10) target bundleno = 10 (0xa), region = 129 }
 0x710   : > { %s4424_s26 = smov %s4419_s29 }
 0x712   : > { %s4425_s29 = smov %s4422_s16 }
 0x714   :  { %2497 = vsyncpa [#allocation3], 1 }
 0x715   :  { %2499 = vsyncpa [#allocation3 + $0x1], 1 }
 0x716   :  { %2500 = vsyncpa [#allocation5], 1 }
 0x717   :  { %2502 = vsyncpa [#allocation5 + $0x1], 1 }

</bundles_post_ra>
